<compile_context>
chip_gen: v6e
topology: v6e:2x2x1
jax: 0.10.0
libtpu: 0.0.40
codegen_flags: <defaults>
</compile_context>

<pallas_src>
from dataclasses import dataclass
from typing import List

import numpy as np
import jax
import jax.numpy as jnp
from jax import lax
from jax.experimental import pallas as pl
from jax.experimental.pallas import tpu as pltpu


@dataclass
class Chromosome:
    gene: List[int]
    phenome: float
    length: int = 0

    def __post_init__(self):
        self.length = len(self.gene)


def _make_kernel(cut: int):
    """Build the kernel with the static crossover cut baked in."""

    def kernel(p_ref, dT_ref, c_ref, ph_ref):
        # p_ref : (2, L, T) int32   parent pair; gene pos on sublanes, pair on lanes
        # dT_ref: (N, N)   float32  distance matrix, TRANSPOSED; resident across steps
        # c_ref : (2, L, T) int32   children (same transposed layout)
        # ph_ref: (2, T)   float32  phenomes (row 0 = child A, row 1 = child B)
        _, L, T = p_ref.shape
        N = dT_ref.shape[0]

        a = p_ref[0]                                   # (L, T)
        b = p_ref[1]                                   # (L, T)
        d_t = dT_ref[...]                              # (N, N) == D.T, loaded once

        # ---- single-point crossover at `cut` (elementwise select, VPU) ------
        pos = lax.broadcasted_iota(jnp.int32, (L, T), 0)
        take_a = pos < cut
        ca = jnp.where(take_a, a, b)
        cb = jnp.where(take_a, b, a)
        c_ref[0] = ca                                  # lane-dense stores
        c_ref[1] = cb

        # ---- fitness: closed-tour length under the distance metric ----------
        # Both children side by side on the lane axis -> one pass over (L, 2T).
        ch = jnp.concatenate([ca, cb], axis=1)         # (L, 2T), lane-dense
        T2 = 2 * T

        # One-hot with the city index on the SUBLANE axis: (L, N, 2T).
        # Built ONCE; the "next city" one-hot is simply oh[(l+1) % L].
        city = lax.broadcasted_iota(jnp.int32, (L, N, T2), 1)
        oh = (ch[:, None, :] == city).astype(jnp.float32)

        phen = jnp.zeros((1, T2), jnp.float32)
        for l in range(L):                             # static unroll (L small)
            # stage 1 (MXU): rows[c, t] = D[ch[l, t], c]  ==  (D.T @ one_hot)[c, t]
            rows = jnp.dot(d_t, oh[l], preferred_element_type=jnp.float32)   # (N, 2T)
            # stage 2 (VPU + sublane reduce): pick column ch[(l+1) % L, t]
            phen = phen + jnp.sum(rows * oh[(l + 1) % L], axis=0, keepdims=True)

        # Merged phenome writeback: two lane-dense (1, T) rows in one block.
        ph_ref[0:1, :] = phen[:, :T]
        ph_ref[1:2, :] = phen[:, T:]

    return kernel


def crossover_forward(parents_genes: jax.Array, dmat: jax.Array, *, tile_pairs: int = 512):
    """Layout plumbing (one transpose each way) + tiled pallas_call."""
    P, L = parents_genes.shape
    assert P % 2 == 0, "parents must come in pairs"
    P2 = P // 2
    N = dmat.shape[0]

    # Pair-dimension tile: multiple of 128 (lane-dense); pad P2 up to a tile
    # multiple instead of falling back to a single un-pipelined block.
    p2_128 = -(-P2 // 128) * 128
    tile = max(128, min((tile_pairs // 128) * 128, p2_128))
    P2pad = -(-P2 // tile) * tile
    grid = (P2pad // tile,)

    pg = parents_genes.astype(jnp.int32).reshape(P2, 2, L)
    pT = jnp.transpose(pg, (1, 2, 0))                    # (2, L, P2) -- one transpose
    if P2pad != P2:
        pT = jnp.pad(pT, ((0, 0), (0, 0), (0, P2pad - P2)))
    d_t = dmat.astype(jnp.float32).T                     # (N, N) transposed for row gather

    kernel = _make_kernel(L // 2)

    flops = 2 * P * L * N * N + 6 * P * L * N            # MXU row gather + VPU column pick
    bytes_accessed = 2 * P * L * 4 + N * N * 4 + P * 4

    children_t, phen_t = pl.pallas_call(
        kernel,
        out_shape=(
            jax.ShapeDtypeStruct((2, L, P2pad), jnp.int32),    # children A/B (transposed)
            jax.ShapeDtypeStruct((2, P2pad), jnp.float32),     # phenomes A/B (lane-dense)
        ),
        grid_spec=pltpu.PrefetchScalarGridSpec(
            num_scalar_prefetch=0,
            grid=grid,
            in_specs=[
                pl.BlockSpec((2, L, tile), lambda i: (0, 0, i)),
                pl.BlockSpec((N, N), lambda i: (0, 0)),        # D.T stays resident
            ],
            out_specs=(
                pl.BlockSpec((2, L, tile), lambda i: (0, 0, i)),
                pl.BlockSpec((2, tile), lambda i: (0, i)),
            ),
        ),
        compiler_params=pltpu.CompilerParams(
            dimension_semantics=("parallel",),        # pair axis is embarrassingly parallel
            vmem_limit_bytes=32 * 1024 * 1024,        # per-step usage ~4 MiB; safe on v7x
        ),
        cost_estimate=pl.CostEstimate(
            flops=flops, transcendentals=0, bytes_accessed=bytes_accessed
        ),
    )(pT, d_t)

    # Single transpose back to the interleaved (child_a, child_b) order.
    children = jnp.transpose(children_t[:, :, :P2], (2, 0, 1)).reshape(P, L)
    phenome = jnp.transpose(phen_t[:, :P2], (1, 0)).reshape(P)
    return children, phenome


def crossover_forward_ref(parents_genes, dmat):
    """Pure-JAX reference for correctness checking."""
    P, L = parents_genes.shape
    a = parents_genes[0::2]
    b = parents_genes[1::2]
    pos = jnp.arange(L)[None, :]
    cut = L // 2
    ca = jnp.where(pos < cut, a, b)
    cb = jnp.where(pos < cut, b, a)
    ch = jnp.stack([ca, cb], axis=1).reshape(P, L)
    nxt = jnp.roll(ch, -1, axis=1)
    fit = dmat[ch, nxt].sum(axis=1)
    return ch, fit


if __name__ == "__main__":
    key = jax.random.PRNGKey(0)
    P = 2048   # number of parents (population), even; exercises grid=(2,) at tile=512
    L = 16     # gene length == number of cities
    N = L

    # deterministic "distance_metric": Euclidean base + an ASYMMETRIC perturbation
    # (asymmetry pins the tour direction in the correctness check).
    k_coords, k_asym, k_perm = jax.random.split(key, 3)
    coords = jax.random.uniform(k_coords, (N, 2), dtype=jnp.float32)
    diff = coords[:, None, :] - coords[None, :, :]
    base = jnp.sqrt(jnp.sum(diff * diff, axis=-1))
    asym = 0.25 * jax.random.uniform(k_asym, (N, N), dtype=jnp.float32)
    dmat = (base + asym).astype(jnp.float32)                      # (N, N), asymmetric

    # parents: P random permutations of the N cities (argsort of uniforms)
    u = jax.random.uniform(k_perm, (P, N))
    parents_genes = jnp.argsort(u, axis=1).astype(jnp.int32)      # (P, L)

    children, phenome = crossover_forward(parents_genes, dmat)
    children = jax.block_until_ready(children)
    phenome = jax.block_until_ready(phenome)

    # correctness check against pure-JAX reference
    ref_children, ref_phenome = crossover_forward_ref(parents_genes, dmat)
    np.testing.assert_array_equal(np.asarray(children), np.asarray(ref_children))
    np.testing.assert_allclose(
        np.asarray(phenome), np.asarray(ref_phenome), rtol=1e-5, atol=1e-5
    )

    # rebuild the List[Chromosome] return type of the original module
    children_np = np.asarray(children)
    phenome_np = np.asarray(phenome)
    offspring = [
        Chromosome(gene=[int(g) for g in children_np[i]], phenome=float(phenome_np[i]))
        for i in range(P)
    ]
    assert len(offspring) == P and offspring[0].length == L

    print("KERNEL_OK")
</pallas_src>

<mosaic_0001>
module attributes {stable_mosaic.version = 11 : i64} {
  func.func @kernel(%arg0: i32, %arg1: memref<2x16x512xi32, #tpu.memory_space<vmem>>, %arg2: memref<16x16xf32, #tpu.memory_space<vmem>>, %arg3: memref<2x16x512xi32, #tpu.memory_space<vmem>>, %arg4: memref<2x512xf32, #tpu.memory_space<vmem>>) attributes {dimension_semantics = [#tpu.dimension_semantics<parallel>], iteration_bounds = array<i64: 2>, scalar_prefetch = 0 : i64, scratch_operands = 0 : i64, tpu.core_type = #tpu.core_type<tc>, window_params = [{transform_indices = @transform_0, window_bounds = array<i64: 2, 16, 512>}, {pipeline_mode = #tpu.pipeline_mode<synchronous>, transform_indices = @transform_1, window_bounds = array<i64: 16, 16>}, {transform_indices = @transform_2, window_bounds = array<i64: 2, 16, 512>}, {transform_indices = @transform_3, window_bounds = array<i64: 2, 512>}]} {
    %c0 = arith.constant 0 : index
    %c0_0 = arith.constant 0 : index
    %c0_1 = arith.constant 0 : index
    %0 = vector.load %arg1[%c0, %c0_0, %c0_1] : memref<2x16x512xi32, #tpu.memory_space<vmem>>, vector<1x16x512xi32>
    %1 = vector.shape_cast %0 : vector<1x16x512xi32> to vector<16x512xi32>
    %c1 = arith.constant 1 : index
    %c0_2 = arith.constant 0 : index
    %c0_3 = arith.constant 0 : index
    %2 = vector.load %arg1[%c1, %c0_2, %c0_3] : memref<2x16x512xi32, #tpu.memory_space<vmem>>, vector<1x16x512xi32>
    %3 = vector.shape_cast %2 : vector<1x16x512xi32> to vector<16x512xi32>
    %c0_4 = arith.constant 0 : index
    %c0_5 = arith.constant 0 : index
    %4 = vector.load %arg2[%c0_4, %c0_5] : memref<16x16xf32, #tpu.memory_space<vmem>>, vector<16x16xf32>
    %5 = tpu.iota {dimensions = array<i32: 0>} : vector<16x512xi32>
    %c8_i32 = arith.constant 8 : i32
    %6 = vector.broadcast %c8_i32 : i32 to vector<16x512xi32>
    %7 = arith.cmpi slt, %5, %6 : vector<16x512xi32>
    %8 = arith.select %7, %1, %3 : vector<16x512xi1>, vector<16x512xi32>
    %9 = arith.select %7, %3, %1 : vector<16x512xi1>, vector<16x512xi32>
    %c0_6 = arith.constant 0 : index
    %c0_7 = arith.constant 0 : index
    %c0_8 = arith.constant 0 : index
    %10 = vector.load %arg3[%c0_6, %c0_7, %c0_8] : memref<2x16x512xi32, #tpu.memory_space<vmem>>, vector<1x16x512xi32>
    %11 = vector.shape_cast %10 : vector<1x16x512xi32> to vector<16x512xi32>
    %12 = vector.shape_cast %8 : vector<16x512xi32> to vector<1x16x512xi32>
    tpu.vector_store %arg3[%c0_6, %c0_7, %c0_8], %12 {strides = array<i32>} : memref<2x16x512xi32, #tpu.memory_space<vmem>>, vector<1x16x512xi32>,
    %c1_9 = arith.constant 1 : index
    %c0_10 = arith.constant 0 : index
    %c0_11 = arith.constant 0 : index
    %13 = vector.load %arg3[%c1_9, %c0_10, %c0_11] : memref<2x16x512xi32, #tpu.memory_space<vmem>>, vector<1x16x512xi32>
    %14 = vector.shape_cast %13 : vector<1x16x512xi32> to vector<16x512xi32>
    %15 = vector.shape_cast %9 : vector<16x512xi32> to vector<1x16x512xi32>
    tpu.vector_store %arg3[%c1_9, %c0_10, %c0_11], %15 {strides = array<i32>} : memref<2x16x512xi32, #tpu.memory_space<vmem>>, vector<1x16x512xi32>,
    %16 = tpu.concatenate %8, %9 in 1 : vector<16x512xi32>, vector<16x512xi32> -> vector<16x1024xi32>
    %17 = tpu.iota {dimensions = array<i32: 1>} : vector<16x16x1024xi32>
    %18 = vector.shape_cast %16 : vector<16x1024xi32> to vector<16x1x1024xi32>
    %19 = vector.broadcast %18 : vector<16x1x1024xi32> to vector<16x16x1024xi32>
    %20 = arith.cmpi eq, %19, %17 : vector<16x16x1024xi32>
    %21 = arith.extui %20 : vector<16x16x1024xi1> to vector<16x16x1024xi32>
    %22 = arith.sitofp %21 : vector<16x16x1024xi32> to vector<16x16x1024xf32>
    %cst = arith.constant 0.000000e+00 : f32
    %23 = vector.broadcast %cst : f32 to vector<1x1024xf32>
    %24 = vector.extract_strided_slice %22 {offsets = [0, 0, 0], sizes = [1, 16, 1024], strides = [1, 1, 1]} : vector<16x16x1024xf32> to vector<1x16x1024xf32>
    %25 = vector.shape_cast %24 : vector<1x16x1024xf32> to vector<16x1024xf32>
    %cst_12 = arith.constant dense<0.000000e+00> : vector<16x1024xf32>
    %26 = tpu.matmul %4, %25, %cst_12 {dimension_numbers = #tpu.dot_dimension_numbers<[1], [0], [0], [1], [0, 0, 1, 1], [], []>} : vector<16x16xf32>, vector<16x1024xf32>, vector<16x1024xf32> -> vector<16x1024xf32>
    %27 = vector.extract_strided_slice %22 {offsets = [1, 0, 0], sizes = [1, 16, 1024], strides = [1, 1, 1]} : vector<16x16x1024xf32> to vector<1x16x1024xf32>
    %28 = vector.shape_cast %27 : vector<1x16x1024xf32> to vector<16x1024xf32>
    %29 = arith.mulf %26, %28 : vector<16x1024xf32>
    %cst_13 = arith.constant dense<0.000000e+00> : vector<1024xf32>
    %30 = vector.multi_reduction <add>, %29, %cst_13 [0] : vector<16x1024xf32> to vector<1024xf32>
    %31 = vector.shape_cast %30 : vector<1024xf32> to vector<1x1024xf32>
    %32 = arith.addf %23, %31 : vector<1x1024xf32>
    %33 = vector.extract_strided_slice %22 {offsets = [1, 0, 0], sizes = [1, 16, 1024], strides = [1, 1, 1]} : vector<16x16x1024xf32> to vector<1x16x1024xf32>
    %34 = vector.shape_cast %33 : vector<1x16x1024xf32> to vector<16x1024xf32>
    %cst_14 = arith.constant dense<0.000000e+00> : vector<16x1024xf32>
    %35 = tpu.matmul %4, %34, %cst_14 {dimension_numbers = #tpu.dot_dimension_numbers<[1], [0], [0], [1], [0, 0, 1, 1], [], []>} : vector<16x16xf32>, vector<16x1024xf32>, vector<16x1024xf32> -> vector<16x1024xf32>
    %36 = vector.extract_strided_slice %22 {offsets = [2, 0, 0], sizes = [1, 16, 1024], strides = [1, 1, 1]} : vector<16x16x1024xf32> to vector<1x16x1024xf32>
    %37 = vector.shape_cast %36 : vector<1x16x1024xf32> to vector<16x1024xf32>
    %38 = arith.mulf %35, %37 : vector<16x1024xf32>
    %cst_15 = arith.constant dense<0.000000e+00> : vector<1024xf32>
    %39 = vector.multi_reduction <add>, %38, %cst_15 [0] : vector<16x1024xf32> to vector<1024xf32>
    %40 = vector.shape_cast %39 : vector<1024xf32> to vector<1x1024xf32>
    %41 = arith.addf %32, %40 : vector<1x1024xf32>
    %42 = vector.extract_strided_slice %22 {offsets = [2, 0, 0], sizes = [1, 16, 1024], strides = [1, 1, 1]} : vector<16x16x1024xf32> to vector<1x16x1024xf32>
    %43 = vector.shape_cast %42 : vector<1x16x1024xf32> to vector<16x1024xf32>
    %cst_16 = arith.constant dense<0.000000e+00> : vector<16x1024xf32>
    %44 = tpu.matmul %4, %43, %cst_16 {dimension_numbers = #tpu.dot_dimension_numbers<[1], [0], [0], [1], [0, 0, 1, 1], [], []>} : vector<16x16xf32>, vector<16x1024xf32>, vector<16x1024xf32> -> vector<16x1024xf32>
    %45 = vector.extract_strided_slice %22 {offsets = [3, 0, 0], sizes = [1, 16, 1024], strides = [1, 1, 1]} : vector<16x16x1024xf32> to vector<1x16x1024xf32>
    %46 = vector.shape_cast %45 : vector<1x16x1024xf32> to vector<16x1024xf32>
    %47 = arith.mulf %44, %46 : vector<16x1024xf32>
    %cst_17 = arith.constant dense<0.000000e+00> : vector<1024xf32>
    %48 = vector.multi_reduction <add>, %47, %cst_17 [0] : vector<16x1024xf32> to vector<1024xf32>
    %49 = vector.shape_cast %48 : vector<1024xf32> to vector<1x1024xf32>
    %50 = arith.addf %41, %49 : vector<1x1024xf32>
    %51 = vector.extract_strided_slice %22 {offsets = [3, 0, 0], sizes = [1, 16, 1024], strides = [1, 1, 1]} : vector<16x16x1024xf32> to vector<1x16x1024xf32>
    %52 = vector.shape_cast %51 : vector<1x16x1024xf32> to vector<16x1024xf32>
    %cst_18 = arith.constant dense<0.000000e+00> : vector<16x1024xf32>
    %53 = tpu.matmul %4, %52, %cst_18 {dimension_numbers = #tpu.dot_dimension_numbers<[1], [0], [0], [1], [0, 0, 1, 1], [], []>} : vector<16x16xf32>, vector<16x1024xf32>, vector<16x1024xf32> -> vector<16x1024xf32>
    %54 = vector.extract_strided_slice %22 {offsets = [4, 0, 0], sizes = [1, 16, 1024], strides = [1, 1, 1]} : vector<16x16x1024xf32> to vector<1x16x1024xf32>
    %55 = vector.shape_cast %54 : vector<1x16x1024xf32> to vector<16x1024xf32>
    %56 = arith.mulf %53, %55 : vector<16x1024xf32>
    %cst_19 = arith.constant dense<0.000000e+00> : vector<1024xf32>
    %57 = vector.multi_reduction <add>, %56, %cst_19 [0] : vector<16x1024xf32> to vector<1024xf32>
    %58 = vector.shape_cast %57 : vector<1024xf32> to vector<1x1024xf32>
    %59 = arith.addf %50, %58 : vector<1x1024xf32>
    %60 = vector.extract_strided_slice %22 {offsets = [4, 0, 0], sizes = [1, 16, 1024], strides = [1, 1, 1]} : vector<16x16x1024xf32> to vector<1x16x1024xf32>
    %61 = vector.shape_cast %60 : vector<1x16x1024xf32> to vector<16x1024xf32>
    %cst_20 = arith.constant dense<0.000000e+00> : vector<16x1024xf32>
    %62 = tpu.matmul %4, %61, %cst_20 {dimension_numbers = #tpu.dot_dimension_numbers<[1], [0], [0], [1], [0, 0, 1, 1], [], []>} : vector<16x16xf32>, vector<16x1024xf32>, vector<16x1024xf32> -> vector<16x1024xf32>
    %63 = vector.extract_strided_slice %22 {offsets = [5, 0, 0], sizes = [1, 16, 1024], strides = [1, 1, 1]} : vector<16x16x1024xf32> to vector<1x16x1024xf32>
    %64 = vector.shape_cast %63 : vector<1x16x1024xf32> to vector<16x1024xf32>
    %65 = arith.mulf %62, %64 : vector<16x1024xf32>
    %cst_21 = arith.constant dense<0.000000e+00> : vector<1024xf32>
    %66 = vector.multi_reduction <add>, %65, %cst_21 [0] : vector<16x1024xf32> to vector<1024xf32>
    %67 = vector.shape_cast %66 : vector<1024xf32> to vector<1x1024xf32>
    %68 = arith.addf %59, %67 : vector<1x1024xf32>
    %69 = vector.extract_strided_slice %22 {offsets = [5, 0, 0], sizes = [1, 16, 1024], strides = [1, 1, 1]} : vector<16x16x1024xf32> to vector<1x16x1024xf32>
    %70 = vector.shape_cast %69 : vector<1x16x1024xf32> to vector<16x1024xf32>
    %cst_22 = arith.constant dense<0.000000e+00> : vector<16x1024xf32>
    %71 = tpu.matmul %4, %70, %cst_22 {dimension_numbers = #tpu.dot_dimension_numbers<[1], [0], [0], [1], [0, 0, 1, 1], [], []>} : vector<16x16xf32>, vector<16x1024xf32>, vector<16x1024xf32> -> vector<16x1024xf32>
    %72 = vector.extract_strided_slice %22 {offsets = [6, 0, 0], sizes = [1, 16, 1024], strides = [1, 1, 1]} : vector<16x16x1024xf32> to vector<1x16x1024xf32>
    %73 = vector.shape_cast %72 : vector<1x16x1024xf32> to vector<16x1024xf32>
    %74 = arith.mulf %71, %73 : vector<16x1024xf32>
    %cst_23 = arith.constant dense<0.000000e+00> : vector<1024xf32>
    %75 = vector.multi_reduction <add>, %74, %cst_23 [0] : vector<16x1024xf32> to vector<1024xf32>
    %76 = vector.shape_cast %75 : vector<1024xf32> to vector<1x1024xf32>
    %77 = arith.addf %68, %76 : vector<1x1024xf32>
    %78 = vector.extract_strided_slice %22 {offsets = [6, 0, 0], sizes = [1, 16, 1024], strides = [1, 1, 1]} : vector<16x16x1024xf32> to vector<1x16x1024xf32>
    %79 = vector.shape_cast %78 : vector<1x16x1024xf32> to vector<16x1024xf32>
    %cst_24 = arith.constant dense<0.000000e+00> : vector<16x1024xf32>
    %80 = tpu.matmul %4, %79, %cst_24 {dimension_numbers = #tpu.dot_dimension_numbers<[1], [0], [0], [1], [0, 0, 1, 1], [], []>} : vector<16x16xf32>, vector<16x1024xf32>, vector<16x1024xf32> -> vector<16x1024xf32>
    %81 = vector.extract_strided_slice %22 {offsets = [7, 0, 0], sizes = [1, 16, 1024], strides = [1, 1, 1]} : vector<16x16x1024xf32> to vector<1x16x1024xf32>
    %82 = vector.shape_cast %81 : vector<1x16x1024xf32> to vector<16x1024xf32>
    %83 = arith.mulf %80, %82 : vector<16x1024xf32>
    %cst_25 = arith.constant dense<0.000000e+00> : vector<1024xf32>
    %84 = vector.multi_reduction <add>, %83, %cst_25 [0] : vector<16x1024xf32> to vector<1024xf32>
    %85 = vector.shape_cast %84 : vector<1024xf32> to vector<1x1024xf32>
    %86 = arith.addf %77, %85 : vector<1x1024xf32>
    %87 = vector.extract_strided_slice %22 {offsets = [7, 0, 0], sizes = [1, 16, 1024], strides = [1, 1, 1]} : vector<16x16x1024xf32> to vector<1x16x1024xf32>
    %88 = vector.shape_cast %87 : vector<1x16x1024xf32> to vector<16x1024xf32>
    %cst_26 = arith.constant dense<0.000000e+00> : vector<16x1024xf32>
    %89 = tpu.matmul %4, %88, %cst_26 {dimension_numbers = #tpu.dot_dimension_numbers<[1], [0], [0], [1], [0, 0, 1, 1], [], []>} : vector<16x16xf32>, vector<16x1024xf32>, vector<16x1024xf32> -> vector<16x1024xf32>
    %90 = vector.extract_strided_slice %22 {offsets = [8, 0, 0], sizes = [1, 16, 1024], strides = [1, 1, 1]} : vector<16x16x1024xf32> to vector<1x16x1024xf32>
    %91 = vector.shape_cast %90 : vector<1x16x1024xf32> to vector<16x1024xf32>
    %92 = arith.mulf %89, %91 : vector<16x1024xf32>
    %cst_27 = arith.constant dense<0.000000e+00> : vector<1024xf32>
    %93 = vector.multi_reduction <add>, %92, %cst_27 [0] : vector<16x1024xf32> to vector<1024xf32>
    %94 = vector.shape_cast %93 : vector<1024xf32> to vector<1x1024xf32>
    %95 = arith.addf %86, %94 : vector<1x1024xf32>
    %96 = vector.extract_strided_slice %22 {offsets = [8, 0, 0], sizes = [1, 16, 1024], strides = [1, 1, 1]} : vector<16x16x1024xf32> to vector<1x16x1024xf32>
    %97 = vector.shape_cast %96 : vector<1x16x1024xf32> to vector<16x1024xf32>
    %cst_28 = arith.constant dense<0.000000e+00> : vector<16x1024xf32>
    %98 = tpu.matmul %4, %97, %cst_28 {dimension_numbers = #tpu.dot_dimension_numbers<[1], [0], [0], [1], [0, 0, 1, 1], [], []>} : vector<16x16xf32>, vector<16x1024xf32>, vector<16x1024xf32> -> vector<16x1024xf32>
    %99 = vector.extract_strided_slice %22 {offsets = [9, 0, 0], sizes = [1, 16, 1024], strides = [1, 1, 1]} : vector<16x16x1024xf32> to vector<1x16x1024xf32>
    %100 = vector.shape_cast %99 : vector<1x16x1024xf32> to vector<16x1024xf32>
    %101 = arith.mulf %98, %100 : vector<16x1024xf32>
    %cst_29 = arith.constant dense<0.000000e+00> : vector<1024xf32>
    %102 = vector.multi_reduction <add>, %101, %cst_29 [0] : vector<16x1024xf32> to vector<1024xf32>
    %103 = vector.shape_cast %102 : vector<1024xf32> to vector<1x1024xf32>
    %104 = arith.addf %95, %103 : vector<1x1024xf32>
    %105 = vector.extract_strided_slice %22 {offsets = [9, 0, 0], sizes = [1, 16, 1024], strides = [1, 1, 1]} : vector<16x16x1024xf32> to vector<1x16x1024xf32>
    %106 = vector.shape_cast %105 : vector<1x16x1024xf32> to vector<16x1024xf32>
    %cst_30 = arith.constant dense<0.000000e+00> : vector<16x1024xf32>
    %107 = tpu.matmul %4, %106, %cst_30 {dimension_numbers = #tpu.dot_dimension_numbers<[1], [0], [0], [1], [0, 0, 1, 1], [], []>} : vector<16x16xf32>, vector<16x1024xf32>, vector<16x1024xf32> -> vector<16x1024xf32>
    %108 = vector.extract_strided_slice %22 {offsets = [10, 0, 0], sizes = [1, 16, 1024], strides = [1, 1, 1]} : vector<16x16x1024xf32> to vector<1x16x1024xf32>
    %109 = vector.shape_cast %108 : vector<1x16x1024xf32> to vector<16x1024xf32>
    %110 = arith.mulf %107, %109 : vector<16x1024xf32>
    %cst_31 = arith.constant dense<0.000000e+00> : vector<1024xf32>
    %111 = vector.multi_reduction <add>, %110, %cst_31 [0] : vector<16x1024xf32> to vector<1024xf32>
    %112 = vector.shape_cast %111 : vector<1024xf32> to vector<1x1024xf32>
    %113 = arith.addf %104, %112 : vector<1x1024xf32>
    %114 = vector.extract_strided_slice %22 {offsets = [10, 0, 0], sizes = [1, 16, 1024], strides = [1, 1, 1]} : vector<16x16x1024xf32> to vector<1x16x1024xf32>
    %115 = vector.shape_cast %114 : vector<1x16x1024xf32> to vector<16x1024xf32>
    %cst_32 = arith.constant dense<0.000000e+00> : vector<16x1024xf32>
    %116 = tpu.matmul %4, %115, %cst_32 {dimension_numbers = #tpu.dot_dimension_numbers<[1], [0], [0], [1], [0, 0, 1, 1], [], []>} : vector<16x16xf32>, vector<16x1024xf32>, vector<16x1024xf32> -> vector<16x1024xf32>
    %117 = vector.extract_strided_slice %22 {offsets = [11, 0, 0], sizes = [1, 16, 1024], strides = [1, 1, 1]} : vector<16x16x1024xf32> to vector<1x16x1024xf32>
    %118 = vector.shape_cast %117 : vector<1x16x1024xf32> to vector<16x1024xf32>
    %119 = arith.mulf %116, %118 : vector<16x1024xf32>
    %cst_33 = arith.constant dense<0.000000e+00> : vector<1024xf32>
    %120 = vector.multi_reduction <add>, %119, %cst_33 [0] : vector<16x1024xf32> to vector<1024xf32>
    %121 = vector.shape_cast %120 : vector<1024xf32> to vector<1x1024xf32>
    %122 = arith.addf %113, %121 : vector<1x1024xf32>
    %123 = vector.extract_strided_slice %22 {offsets = [11, 0, 0], sizes = [1, 16, 1024], strides = [1, 1, 1]} : vector<16x16x1024xf32> to vector<1x16x1024xf32>
    %124 = vector.shape_cast %123 : vector<1x16x1024xf32> to vector<16x1024xf32>
    %cst_34 = arith.constant dense<0.000000e+00> : vector<16x1024xf32>
    %125 = tpu.matmul %4, %124, %cst_34 {dimension_numbers = #tpu.dot_dimension_numbers<[1], [0], [0], [1], [0, 0, 1, 1], [], []>} : vector<16x16xf32>, vector<16x1024xf32>, vector<16x1024xf32> -> vector<16x1024xf32>
    %126 = vector.extract_strided_slice %22 {offsets = [12, 0, 0], sizes = [1, 16, 1024], strides = [1, 1, 1]} : vector<16x16x1024xf32> to vector<1x16x1024xf32>
    %127 = vector.shape_cast %126 : vector<1x16x1024xf32> to vector<16x1024xf32>
    %128 = arith.mulf %125, %127 : vector<16x1024xf32>
    %cst_35 = arith.constant dense<0.000000e+00> : vector<1024xf32>
    %129 = vector.multi_reduction <add>, %128, %cst_35 [0] : vector<16x1024xf32> to vector<1024xf32>
    %130 = vector.shape_cast %129 : vector<1024xf32> to vector<1x1024xf32>
    %131 = arith.addf %122, %130 : vector<1x1024xf32>
    %132 = vector.extract_strided_slice %22 {offsets = [12, 0, 0], sizes = [1, 16, 1024], strides = [1, 1, 1]} : vector<16x16x1024xf32> to vector<1x16x1024xf32>
    %133 = vector.shape_cast %132 : vector<1x16x1024xf32> to vector<16x1024xf32>
    %cst_36 = arith.constant dense<0.000000e+00> : vector<16x1024xf32>
    %134 = tpu.matmul %4, %133, %cst_36 {dimension_numbers = #tpu.dot_dimension_numbers<[1], [0], [0], [1], [0, 0, 1, 1], [], []>} : vector<16x16xf32>, vector<16x1024xf32>, vector<16x1024xf32> -> vector<16x1024xf32>
    %135 = vector.extract_strided_slice %22 {offsets = [13, 0, 0], sizes = [1, 16, 1024], strides = [1, 1, 1]} : vector<16x16x1024xf32> to vector<1x16x1024xf32>
    %136 = vector.shape_cast %135 : vector<1x16x1024xf32> to vector<16x1024xf32>
    %137 = arith.mulf %134, %136 : vector<16x1024xf32>
    %cst_37 = arith.constant dense<0.000000e+00> : vector<1024xf32>
    %138 = vector.multi_reduction <add>, %137, %cst_37 [0] : vector<16x1024xf32> to vector<1024xf32>
    %139 = vector.shape_cast %138 : vector<1024xf32> to vector<1x1024xf32>
    %140 = arith.addf %131, %139 : vector<1x1024xf32>
    %141 = vector.extract_strided_slice %22 {offsets = [13, 0, 0], sizes = [1, 16, 1024], strides = [1, 1, 1]} : vector<16x16x1024xf32> to vector<1x16x1024xf32>
    %142 = vector.shape_cast %141 : vector<1x16x1024xf32> to vector<16x1024xf32>
    %cst_38 = arith.constant dense<0.000000e+00> : vector<16x1024xf32>
    %143 = tpu.matmul %4, %142, %cst_38 {dimension_numbers = #tpu.dot_dimension_numbers<[1], [0], [0], [1], [0, 0, 1, 1], [], []>} : vector<16x16xf32>, vector<16x1024xf32>, vector<16x1024xf32> -> vector<16x1024xf32>
    %144 = vector.extract_strided_slice %22 {offsets = [14, 0, 0], sizes = [1, 16, 1024], strides = [1, 1, 1]} : vector<16x16x1024xf32> to vector<1x16x1024xf32>
    %145 = vector.shape_cast %144 : vector<1x16x1024xf32> to vector<16x1024xf32>
    %146 = arith.mulf %143, %145 : vector<16x1024xf32>
    %cst_39 = arith.constant dense<0.000000e+00> : vector<1024xf32>
    %147 = vector.multi_reduction <add>, %146, %cst_39 [0] : vector<16x1024xf32> to vector<1024xf32>
    %148 = vector.shape_cast %147 : vector<1024xf32> to vector<1x1024xf32>
    %149 = arith.addf %140, %148 : vector<1x1024xf32>
    %150 = vector.extract_strided_slice %22 {offsets = [14, 0, 0], sizes = [1, 16, 1024], strides = [1, 1, 1]} : vector<16x16x1024xf32> to vector<1x16x1024xf32>
    %151 = vector.shape_cast %150 : vector<1x16x1024xf32> to vector<16x1024xf32>
    %cst_40 = arith.constant dense<0.000000e+00> : vector<16x1024xf32>
    %152 = tpu.matmul %4, %151, %cst_40 {dimension_numbers = #tpu.dot_dimension_numbers<[1], [0], [0], [1], [0, 0, 1, 1], [], []>} : vector<16x16xf32>, vector<16x1024xf32>, vector<16x1024xf32> -> vector<16x1024xf32>
    %153 = vector.extract_strided_slice %22 {offsets = [15, 0, 0], sizes = [1, 16, 1024], strides = [1, 1, 1]} : vector<16x16x1024xf32> to vector<1x16x1024xf32>
    %154 = vector.shape_cast %153 : vector<1x16x1024xf32> to vector<16x1024xf32>
    %155 = arith.mulf %152, %154 : vector<16x1024xf32>
    %cst_41 = arith.constant dense<0.000000e+00> : vector<1024xf32>
    %156 = vector.multi_reduction <add>, %155, %cst_41 [0] : vector<16x1024xf32> to vector<1024xf32>
    %157 = vector.shape_cast %156 : vector<1024xf32> to vector<1x1024xf32>
    %158 = arith.addf %149, %157 : vector<1x1024xf32>
    %159 = vector.extract_strided_slice %22 {offsets = [15, 0, 0], sizes = [1, 16, 1024], strides = [1, 1, 1]} : vector<16x16x1024xf32> to vector<1x16x1024xf32>
    %160 = vector.shape_cast %159 : vector<1x16x1024xf32> to vector<16x1024xf32>
    %cst_42 = arith.constant dense<0.000000e+00> : vector<16x1024xf32>
    %161 = tpu.matmul %4, %160, %cst_42 {dimension_numbers = #tpu.dot_dimension_numbers<[1], [0], [0], [1], [0, 0, 1, 1], [], []>} : vector<16x16xf32>, vector<16x1024xf32>, vector<16x1024xf32> -> vector<16x1024xf32>
    %162 = vector.extract_strided_slice %22 {offsets = [0, 0, 0], sizes = [1, 16, 1024], strides = [1, 1, 1]} : vector<16x16x1024xf32> to vector<1x16x1024xf32>
    %163 = vector.shape_cast %162 : vector<1x16x1024xf32> to vector<16x1024xf32>
    %164 = arith.mulf %161, %163 : vector<16x1024xf32>
    %cst_43 = arith.constant dense<0.000000e+00> : vector<1024xf32>
    %165 = vector.multi_reduction <add>, %164, %cst_43 [0] : vector<16x1024xf32> to vector<1024xf32>
    %166 = vector.shape_cast %165 : vector<1024xf32> to vector<1x1024xf32>
    %167 = arith.addf %158, %166 : vector<1x1024xf32>
    %168 = vector.extract_strided_slice %167 {offsets = [0, 0], sizes = [1, 512], strides = [1, 1]} : vector<1x1024xf32> to vector<1x512xf32>
    %c0_44 = arith.constant 0 : index
    %c0_45 = arith.constant 0 : index
    %169 = vector.load %arg4[%c0_44, %c0_45] : memref<2x512xf32, #tpu.memory_space<vmem>>, vector<1x512xf32>
    tpu.vector_store %arg4[%c0_44, %c0_45], %168 {strides = array<i32>} : memref<2x512xf32, #tpu.memory_space<vmem>>, vector<1x512xf32>,
    %170 = vector.extract_strided_slice %167 {offsets = [0, 512], sizes = [1, 512], strides = [1, 1]} : vector<1x1024xf32> to vector<1x512xf32>
    %c1_46 = arith.constant 1 : index
    %c0_47 = arith.constant 0 : index
    %171 = vector.load %arg4[%c1_46, %c0_47] : memref<2x512xf32, #tpu.memory_space<vmem>>, vector<1x512xf32>
    tpu.vector_store %arg4[%c1_46, %c0_47], %170 {strides = array<i32>} : memref<2x512xf32, #tpu.memory_space<vmem>>, vector<1x512xf32>,
    return
  }
  func.func @transform_0(%arg0: i32) -> (i32, i32, i32) {
    %c0_i32 = arith.constant 0 : i32
    %c0_i32_0 = arith.constant 0 : i32
    %c0_i32_1 = arith.constant 0 : i32
    return %c0_i32, %c0_i32_0, %arg0 : i32, i32, i32
  }
  func.func @transform_1(%arg0: i32) -> (i32, i32) {
    %c0_i32 = arith.constant 0 : i32
    %c0_i32_0 = arith.constant 0 : i32
    %c0_i32_1 = arith.constant 0 : i32
    return %c0_i32, %c0_i32_0 : i32, i32
  }
  func.func @transform_2(%arg0: i32) -> (i32, i32, i32) {
    %c0_i32 = arith.constant 0 : i32
    %c0_i32_0 = arith.constant 0 : i32
    %c0_i32_1 = arith.constant 0 : i32
    return %c0_i32, %c0_i32_0, %arg0 : i32, i32, i32
  }
  func.func @transform_3(%arg0: i32) -> (i32, i32) {
    %c0_i32 = arith.constant 0 : i32
    %c0_i32_0 = arith.constant 0 : i32
    return %c0_i32, %arg0 : i32, i32
  }
}

</mosaic_0001>

<bundles_post_ra>
// kernel: tpu_custom_call.1
= control target key start
LH: loop header
LB: loop body
LE: loop exit
PB: predicated region body
PF: predicated region fallthrough
CT: control target
= control target key end

     0   :  { %9 = vsyncpa [#allocation3], 0  ;;  %s14449_s0 = inlined_call_operand.hbm [shape: s32[2,16,1024], index: 0, kind: input, shape index: {}]   ;;  %s14450_s1 = inlined_call_operand.hbm [shape: f32[16,16], index: 1, kind: input, shape index: {}]   ;;  %s14451_s2 = inlined_call_operand.hbm [shape: s32[2,16,1024], index: 2, kind: output, shape index: {0}]   ;;  %s14452_s3 = inlined_call_operand.hbm [shape: f32[2,1024], index: 3, kind: output, shape index: {1}]  }
   0x1   :  { %11 = vsyncpa [#allocation3 + $0x1], 0 }
   0x2   :  { %12 = vsyncpa [#allocation6], 0 }
   0x3   :  { %13 = vsyncpa [#allocation4], 0 }
   0x4   :  { %15 = vsyncpa [#allocation4 + $0x1], 0 }
   0x5   :  { %16 = vsyncpa [#allocation9], 0 }
   0x6   :  { %18 = vsyncpa [#allocation9 + $0x1], 0  ;;  %s9225_s12 = smov 0   ;;  %s9227_s13 = smov 0  }
   0x7   :  { %s9229_s14 = smov 0   ;;  %s9231_s15 = smov 0  }
   0x8 LB: > { %s9246_s16 = sadd.s32 4294967295, %s9188_s15   ;;  %s8255_s17 = sadd.s32 4294967294, %s9188_s15   ;;  %s9188_s15 = sphi %s9231_s15, %s15605_s15   ;;  %s9184_s14 = sphi %s9229_s14, %s15604_s14   ;;  %s9180_s13 = sphi %s9227_s13, %s15603_s13   ;;  %s9176_s12 = sphi %s9225_s12, %s15602_s12  }
   0x9   : > { %s9250_s18 = sadd.s32 1, %s9188_s15   ;;  %s31_s19 = sadd.s32 1, %s9184_s14 }
   0xa   : > { %s28_s20 = ssub.s32 %s9188_s15, %s9250_s18  ;;  %p38_p0 = scmp.ne.s32.totalorder %s9184_s14, %s9180_s13 }
   0xb   : > { %p29_p1 = scmp.eq.s32.totalorder %s28_s20, 0  ;;  %p39_p2 = scmp.eq.s32.totalorder %s9188_s15, 0 }
   0xc   : > { %p44_p3 = scmp.ne.s32.totalorder %s9180_s13, %s9176_s12  ;;  %p14456_p4 = scmp.eq.s32.totalorder %s9246_s16, 0 }
   0xd   : > { %s9262_s21 = scalar_select %p29_p1, %s9184_s14, %s31_s19  }
   0xe   : > { %p9264_p5 = por %p39_p2, %p38_p0  ;;  %p9270_p6 = por %p14456_p4, %p44_p3 }
   0xf   : > { %p89_p7 = scmp.eq.s32.totalorder %s9246_s16, 1  ;;  %p95_p8 = scmp.eq.s32.totalorder %s8255_s17, 1 }
  0x10   : > { %s14909_s23 = scalar_select %p9270_p6, 1, 0 }
  0x11   : > { %p8256_p9 = scmp.ge.s32.totalorder %s9188_s15, 1  ;;  %p128_p10 = scmp.lt.s32.totalorder %s9188_s15, 3 }
  0x12   : > { %p9277_p11 = por %p89_p7, %p38_p0  ;;  %p9281_p12 = por %p95_p8, %p44_p3 }
  0x13   : > { %p9285_p13 = pnand %p8256_p9, %p128_p10  ;;  %s9190_s27 = smov [#allocation5]  }
  0x14   : > { %s14910_s24 = scalar_select %p9277_p11, 1, 0 }
  0x15   : > { %s14911_s25 = scalar_select %p9281_p12, 1, 0 }
  0x16   : > { %s14912_s26 = scalar_select %p9285_p13, 1, 0 }
  0x17   : > { %p8945_p1 = pneg %p9285_p13  ;;  %s140_s28 = sshll.u32 %s9190_s27, 4  ;;  %s141_s28 = int_to_ptr.vmem [resolvable:$true] %s140_s28 }
  0x18   : > { %p8961_p3 = scmp.lt.s32.totalorder %s9188_s15, 2  ;;  %s154_s30 = sand.u32 1, %s9184_s14  }
  0x19   : > { %p9293_p2 = pnand %p8945_p1, %p14456_p4  ;;  %s9047_s4 = scalar_lea.vmem %s141_s28, 256 }
  0x1a   : > { %p9048_p8 = scmp.ne.s32.totalorder %s141_s28, %s9047_s4  ;;  %p9055_p12 = scmp.lt.s32.totalorder %s141_s28, %s141_s28 }
  0x1b   : > { %p9038_p7 = pneg %p9293_p2  ;;  %p9056_p11 = scmp.lt.s32.totalorder %s9047_s4, %s9047_s4 }
  0x1d   : > { %p9050_p9 = pnand %p9048_p8, %p9038_p7  ;;  %p9057_p6 = por %p9056_p11, %p9055_p12 }
  0x1f   : > { %p9051_p10 = pneg %p9050_p9 }
  0x21   : > { %p9058_p13 = pnand %p9057_p6, %p9051_p10 }
  0x23   : > { %9061 = shalt.err (!%p9058_p13)
}
  0x24   : > { %s9191_s5 = smov 128   ;;  %s9192_s6 = smov 8  }
  0x25   : > { %8948 = dma.hbm_to_vmem [thread:$0]  (!%p9293_p2), %s14450_s1, 256, %s141_s28, [#allocation6], %s9191_s5, %s9191_s5, %s9192_s6  }
  0x26   : > { %p9311_p1 = pnand %p8961_p3, %p9264_p5  ;;  %s8259_s10 = sshll.u32 %s154_s30, 7 }
  0x27   : > { %s8932_s11 = sshll.u32 %s9188_s15, 9  ;;  %s158_s27 = scalar_lea.vmem [#allocation2], %s8259_s10 }
  0x28   : > { %s9319_s20 = scalar_lea.hbm %s14449_s0, %s8932_s11  ;;  %s165_s29 = sshll.u32 %s158_s27, 4  ;;  %s9321_s29 = int_to_ptr.vmem [resolvable:$true] %s165_s29 }
  0x29   : > { %s9323_s22 = scalar_lea.sflag [#allocation3], %s154_s30  ;;  %s9062_s28 = scalar_lea.hbm %s9319_s20, 2048 }
  0x2a   : > { %p9063_p5 = scmp.ne.s32.totalorder %s9319_s20, %s9062_s28  ;;  %p9064_p6 = pneg %p9311_p1 }
  0x2b   : > { %s9067_s6 = scalar_lea.hbm %s14449_s0, 4096  ;;  %p9068_p13 = scmp.lt.s32.totalorder %s9319_s20, %s14449_s0 }
  0x2c   : > { %p9065_p11 = pnand %p9064_p6, %p9063_p5  ;;  %p9069_p2 = scmp.lt.s32.totalorder %s9067_s6, %s9062_s28 }
  0x2e   : > { %p9066_p12 = pneg %p9065_p11  ;;  %p9070_p3 = por %p9069_p2, %p9068_p13 }
  0x30   : > { %p9071_p7 = pnand %p9070_p3, %p9066_p12 }
  0x32   : > { %9074 = shalt.err (!%p9071_p7)
}
  0x33   : > { %s9075_s30 = scalar_lea.vmem %s9321_s29, 2048  ;;  %s9193_s10 = smov [#allocation2]  }
  0x34   : > { %p9076_p8 = scmp.ne.s32.totalorder %s9321_s29, %s9075_s30  ;;  %s9080_s11 = sshll.u32 %s9193_s10, 4  ;;  %s9081_s11 = int_to_ptr.vmem [resolvable:$false] %s9080_s11 }
  0x35   : > { %s9082_s17 = scalar_lea.vmem %s9081_s11, 4096  ;;  %p9083_p5 = scmp.lt.s32.totalorder %s9321_s29, %s9081_s11 }
  0x36   : > { %p9078_p9 = pnand %p9076_p8, %p9064_p6  ;;  %p9084_p11 = scmp.lt.s32.totalorder %s9082_s17, %s9075_s30 }
  0x38   : > { %p9079_p10 = pneg %p9078_p9  ;;  %p9085_p0 = por %p9084_p11, %p9083_p5 }
  0x3a   : > { %p9086_p4 = pnand %p9085_p0, %p9079_p10 }
  0x3c   : > { %9089 = shalt.err (!%p9086_p4)
}
  0x3d   : > { %s9194_s19 = smov 1024   ;;  %s9195_s27 = smov 512  }
  0x3e   : > { %s9196_s28 = smov 32   ;;  %p14915_p6 = scmp.ne.s32.totalorder %s14912_s26, 0 }
  0x3f   : > { %8952 = dma.hbm_to_vmem [thread:$0]  (!%p9311_p1), %s9319_s20, 2048, %s9321_s29, %s9323_s22, %s9194_s19, %s9195_s27, %s9196_s28  }
  0x40   : > { %177 = sbr.rel (%p14915_p6) target bundleno = 766 (0x2fe), region = 28 }
  0x45   : > { %s9347_s4 = sand.u32 1, %s9180_s13   ;;  %p14916_p4 = scmp.ne.s32.totalorder %s14909_s23, 0 }
  0x46   : > { %s8263_s5 = sshll.u32 %s9347_s4, 7  ;;  %s180_s6 = scalar_lea.sflag [#allocation3], %s9347_s4 }
  0x47   : > { %s9351_s7 = scalar_lea.vmem [#allocation2], %s8263_s5 }
  0x48   : > { %9159 = dma.done.wait (%p14916_p4), %s180_s6, 2048  }
  0x49   : > { %9161 = vsyncadd (%p14916_p4), %s180_s6, 4294965248  ;;  %p14917_p0 = scmp.eq.s32.totalorder %s9246_s16, 0 }
  0x4b   : > { %9163 = dma.done.wait (%p14917_p0), [#allocation6], 256   ;;  %p14918_p1 = pmov %p14917_p0 }
  0x4c   : > { %v14505_v0 = vlaneseq  ;;  %v9197_v1 = vmov 1966171168   ;;  %v14515_v4 = vmov 0.0   ;;  %v9370_v7 = vld [vmem:[%s9351_s7] sm:$0xff]  ;;  %v9373_v8 = vld [vmem:[%s9351_s7 + $0x8] sm:$0xff]  ;;  %v9376_v9 = vld [vmem:[%s9351_s7 + $0x10] sm:$0xff] }
  0x4d   : > { %9165 = vsyncadd (%p14918_p1), [#allocation6], 4294967040  ;;  %v284_v2 = vunpack.c.l.s4 %v9197_v1  ;;  %1898 = vmatprep.mubr.f32.mxu0 %v14515_v4  ;;  %1975 = vmatprep.mubr.f32.mxu1 %v14515_v4  ;;  %v9379_v10 = vld [vmem:[%s9351_s7 + $0x18] sm:$0xff]  ;;  %v9382_v11 = vld [vmem:[%s9351_s7 + $0x40] sm:$0xff]  ;;  %s9387_s23 = scalar_lea.vmem [#allocation7], %s8263_s5  ;;  %v275_v13 = vcombine.low %v9370_v7, %v9373_v8  ;;  %v14509_v57 = vmov 1.0  }
  0x4e   : > { %v9362_v3 = vshrl.u32 %v14505_v0, 7  ;;  %v9385_v12 = vld [vmem:[%s9351_s7 + $0x48] sm:$0xff]  ;;  %258 = vst [vmem:[%s9387_s23] sm:$0xff] %v9370_v7  ;;  %259 = vst [vmem:[%s9387_s23 + $0x8] sm:$0xff] %v9373_v8  ;;  %v9398_v14 = vld [vmem:[%s9351_s7 + $0x50] sm:$0xff]  ;;  %v277_v16 = vcombine.low %v9376_v9, %v9379_v10  ;;  %vm1827_vm8 = vcmask 130048   ;;  %s8933_s26 = sshll.u32 %s9246_s16, 9 }
  0x4f   : > { %v285_v5 = vunpack.c.0.s8 %v284_v2  ;;  %260 = vst [vmem:[%s9387_s23 + $0x10] sm:$0xff] %v9376_v9  ;;  %v9401_v15 = vld [vmem:[%s9351_s7 + $0x58] sm:$0xff]  ;;  %261 = vst [vmem:[%s9387_s23 + $0x18] sm:$0xff] %v9379_v10  ;;  %v279_v17 = vcombine.low %v9382_v11, %v9385_v12  ;;  %v9421_v20 = vld [vmem:[%s9351_s7 + $0x20] sm:$0xff]  ;;  %s13806_s29 = scalar_lea.hbm %s14451_s2, %s8933_s26  ;;  %s8126_s22 = sshll.u32 %s9387_s23, 4  ;;  %s13815_s22 = int_to_ptr.vmem [resolvable:$true] %s8126_s22 }
  0x50   : > { %14919 = vst [vmem:[#allocation14_spill] sm:$0xff] %v9362_v3  ;;  %8275 = vst [vmem:[%s9387_s23 + $0x40] sm:$0xff] %v9382_v11  ;;  %v281_v18 = vcombine.low %v9398_v14, %v9401_v15  ;;  %v9424_v21 = vld [vmem:[%s9351_s7 + $0x28] sm:$0xff]  ;;  %v9429_v24 = vld [vmem:[%s9351_s7 + $0x30] sm:$0xff]  ;;  %v9467_v34 = vsub.s32 1, %v9362_v3  ;;  %v9473_v38 = vsub.s32 3, %v9362_v3 }
  0x51   : > { %v9367_v6 = vsub.s32 %v285_v5, %v9362_v3  ;;  %8276 = vst [vmem:[%s9387_s23 + $0x48] sm:$0xff] %v9385_v12  ;;  %8277 = vst [vmem:[%s9387_s23 + $0x50] sm:$0xff] %v9398_v14  ;;  %v9432_v25 = vld [vmem:[%s9351_s7 + $0x38] sm:$0xff]  ;;  %v9435_v26 = vld [vmem:[%s9351_s7 + $0x60] sm:$0xff]  ;;  %v9476_v39 = vsub.s32 0, %v9362_v3  ;;  %v9479_v40 = vsub.s32 2, %v9362_v3 }
  0x52   : > { %8278 = vst [vmem:[%s9387_s23 + $0x58] sm:$0xff] %v9401_v15  ;;  %8279 = vst [vmem:[%s9387_s23 + $0x60] sm:$0xff] %v9421_v20  ;;  %v9443_v28 = vld [vmem:[%s9351_s7 + $0x68] sm:$0xff]  ;;  %v9446_v29 = vld [vmem:[%s9351_s7 + $0x70] sm:$0xff]  ;;  %v9482_v41 = vsub.s32 5, %v9362_v3  ;;  %v9485_v42 = vsub.s32 7, %v9362_v3 }
  0x53   : > { %14920 = vst [vmem:[#allocation15_spill] sm:$0xff] %v9367_v6  ;;  %v289_v19 = vrot.slane %v275_v13, %v9367_v6  ;;  %v303_v22 = vrot.slane %v277_v16, %v9367_v6  ;;  %v317_v23 = vrot.slane %v279_v17, %v9367_v6  ;;  %8280 = vst [vmem:[%s9387_s23 + $0x68] sm:$0xff] %v9424_v21  ;;  %v9449_v30 = vld [vmem:[%s9351_s7 + $0x78] sm:$0xff]  ;;  %v9488_v43 = vsub.s32 4, %v9362_v3  ;;  %v9560_v58 = vld [vmem:[#allocation5] sm:$0xff]  ;;  %s8108_s8 = scalar_lea.sflag [#allocation4], %s9347_s4 }
  0x54   : > { %v331_v27 = vrot.slane %v281_v18, %v9367_v6  ;;  %262 = vst [vmem:[%s9387_s23 + $0x20] sm:$0xff] %v9435_v26  ;;  %8281 = vst [vmem:[%s9387_s23 + $0x70] sm:$0xff] %v9429_v24  ;;  %v9491_v44 = vsub.s32 6, %v9362_v3  ;;  %v9494_v45 = vadd.s32 8, %v9362_v3  ;;  %v9600_v60 = vld [vmem:[#allocation5 + $0x8] sm:$0xff]  ;;  %s9090_s30 = scalar_lea.vmem %s13815_s22, 2048 }
  0x55   : > { %8282 = vst [vmem:[%s9387_s23 + $0x78] sm:$0xff] %v9432_v25  ;;  %v339_v31 = vcombine.low %v289_v19, %v303_v22  ;;  %263 = vst [vmem:[%s9387_s23 + $0x28] sm:$0xff] %v9443_v28  ;;  %v340_v35 = vcombine.high %v289_v19, %v303_v22  ;;  %p9091_p12 = scmp.ne.s32.totalorder %s13815_s22, %s9090_s30  ;;  %p15501_p13 = scmp.ne.s32.totalorder %s14910_s24, 0 }
  0x56   : > { %264 = vst [vmem:[%s9387_s23 + $0x30] sm:$0xff] %v9446_v29  ;;  %265 = vst [vmem:[%s9387_s23 + $0x38] sm:$0xff] %v9449_v30  ;;  %v343_v32 = vcombine.low %v317_v23, %v331_v27  ;;  %v344_v36 = vcombine.high %v317_v23, %v331_v27  ;;  %s9200_s10 = smov [#allocation7]  }
  0x57   : > { %v9464_v33 = vrot.slane %v339_v31, %v9367_v6  ;;  %14921 = vst [vmem:[#allocation16_spill] sm:$0xff] %v9494_v45  ;;  %v9499_v47 = vrot.slane %v340_v35, %v9367_v6  ;;  %v276_v35 = vcombine.high %v9370_v7, %v9373_v8  ;;  %p9092_p2 = pnand %p9091_p12, %p15501_p13  ;;  %s9094_s11 = sshll.u32 %s9200_s10, 4  ;;  %s9095_s11 = int_to_ptr.vmem [resolvable:$false] %s9094_s11 }
  0x58   : > { %v9470_v37 = vrot.slane %v343_v32, %v9367_v6  ;;  %v9502_v48 = vrot.slane %v344_v36, %v9367_v6  ;;  %v278_v36 = vcombine.high %v9376_v9, %v9379_v10  ;;  %s9096_s17 = scalar_lea.vmem %s9095_s11, 4096  ;;  %p9097_p7 = scmp.lt.s32.totalorder %s13815_s22, %s9095_s11 }
  0x59   : > { %v9895_v8 = vrot.slane %v276_v35, %v9367_v6  ;;  %p9093_p3 = pneg %p9092_p2  ;;  %p9098_p8 = scmp.lt.s32.totalorder %s9096_s17, %s9090_s30 }
  0x5a   : > { %v403_v46 = vcombine.low %v9464_v33, %v9470_v37  ;;  %v407_v59 = vcombine.low %v9499_v47, %v9502_v48  ;;  %v404_v17 = vcombine.high %v9464_v33, %v9470_v37  ;;  %v280_v37 = vcombine.high %v9382_v11, %v9385_v12 }
  0x5b   : > { %v408_v7 = vcombine.high %v9499_v47, %v9502_v48  ;;  %v9898_v9 = vrot.slane %v278_v36, %v9367_v6  ;;  %p9099_p9 = por %p9098_p8, %p9097_p7 }
  0x5c   : > { %v9505_v49 = vrot.slane %v403_v46, %v9467_v34  ;;  %v9508_v50 = vrot.slane %v403_v46, %v9473_v38  ;;  %v9511_v51 = vrot.slane %v403_v46, %v9476_v39  ;;  %v9514_v52 = vrot.slane %v403_v46, %v9479_v40 }
  0x5d   : > { %v9517_v53 = vrot.slane %v403_v46, %v9482_v41  ;;  %v9520_v54 = vrot.slane %v403_v46, %v9485_v42  ;;  %v9523_v55 = vrot.slane %v403_v46, %v9488_v43  ;;  %v9526_v56 = vrot.slane %v403_v46, %v9491_v44  ;;  %p9100_p10 = pnand %p9099_p9, %p9093_p3 }
  0x5e   : > { %14922 = vst [vmem:[#allocation17_spill] sm:$0xff] %v9505_v49  ;;  %14923 = vst [vmem:[#allocation18_spill] sm:$0xff] %v9508_v50  ;;  %vm14466_vm0 = vcmp.eq.s32.totalorder %v9505_v49, %v9494_v45  ;;  %vm14465_vm1 = vcmp.eq.s32.totalorder %v9508_v50, %v9494_v45  ;;  %vm14468_vm2 = vcmp.eq.s32.totalorder %v9511_v51, %v9494_v45 }
  0x5f   : > { %14924 = vst [vmem:[#allocation19_spill] sm:$0xff] %v9511_v51  ;;  %14925 = vst [vmem:[#allocation20_spill] sm:$0xff] %v9514_v52  ;;  %vm14467_vm3 = vcmp.eq.s32.totalorder %v9514_v52, %v9494_v45  ;;  %8539 = vmatprep.subr.msk.mxu0 %vm14466_vm0, %v14509_v57  ;;  %8545 = vmatprep.subr.msk.mxu1 %vm14465_vm1, %v14509_v57  ;;  %vm14470_vm4 = vcmp.eq.s32.totalorder %v9505_v49, %v9362_v3 }
  0x60   : > { %14926 = vst [vmem:[#allocation21_spill] sm:$0xff] %v9517_v53  ;;  %14927 = vst [vmem:[#allocation22_spill] sm:$0xff] %v9520_v54  ;;  %vm14469_vm5 = vcmp.eq.s32.totalorder %v9508_v50, %v9362_v3  ;;  %vm14472_vm6 = vcmp.eq.s32.totalorder %v9511_v51, %v9362_v3  ;;  %8540 = vmatpush1.msk.msra.mxu0 %vm14468_vm2, %v14509_v57  ;;  %8546 = vmatpush1.msk.msra.mxu1 %vm14467_vm3, %v14509_v57 }
  0x61   : > { %14928 = vst [vmem:[#allocation23_spill] sm:$0xff] %v9523_v55  ;;  %14929 = vst [vmem:[#allocation24_spill] sm:$0xff] %v9526_v56  ;;  %vm14471_vm7 = vcmp.eq.s32.totalorder %v9514_v52, %v9362_v3  ;;  %8541 = vmatprep.subr.msk.mxu0 %vm14470_vm4, %v14509_v57  ;;  %8547 = vmatprep.subr.msk.mxu1 %vm14469_vm5, %v14509_v57  ;;  %vm14458_vm9 = vcmp.eq.s32.totalorder %v9517_v53, %v9494_v45 }
  0x62   : > { %vm14457_vm10 = vcmp.eq.s32.totalorder %v9520_v54, %v9494_v45  ;;  %8542 = vmatpush1.msk.msra.mxu0 %vm14472_vm6, %v14509_v57  ;;  %8548 = vmatpush1.msk.msra.mxu1 %vm14471_vm7, %v14509_v57  ;;  %vm14460_vm11 = vcmp.eq.s32.totalorder %v9523_v55, %v9494_v45  ;;  %vm14459_vm12 = vcmp.eq.s32.totalorder %v9526_v56, %v9494_v45 }
  0x63   : > { %8543 = vmatmul.mubr.msk.f32.vlgmr.msra.gmra.mxu0 %vm1827_vm8, %v9560_v58  ;;  %8549 = vmatmul.mubr.msk.f32.vlgmr.msra.gmra.mxu1 %vm1827_vm8, %v9560_v58  ;;  %vm14462_vm13 = vcmp.eq.s32.totalorder %v9517_v53, %v9362_v3  ;;  %vm14461_vm14 = vcmp.eq.s32.totalorder %v9520_v54, %v9362_v3  ;;  %vm14464_vm15 = vcmp.eq.s32.totalorder %v9523_v55, %v9362_v3 }
  0x64   : > { %8551 = vmatprep.subr.msk.mxu0 %vm14458_vm9, %v14509_v57  ;;  %8557 = vmatprep.subr.msk.mxu1 %vm14457_vm10, %v14509_v57  ;;  %v9617_v61 = vrot.slane %v407_v59, %v9467_v34  ;;  %v9620_v62 = vrot.slane %v407_v59, %v9473_v38  ;;  %vm14463_vm10 = vcmp.eq.s32.totalorder %v9526_v56, %v9362_v3  ;;  %v14933_v56 = vmov 1.0  }
  0x65   : > { %8552 = vmatpush1.msk.msra.mxu0 %vm14460_vm11, %v14509_v57  ;;  %8558 = vmatpush1.msk.msra.mxu1 %vm14459_vm12, %v14509_v57  ;;  %v9627_v63 = vrot.slane %v407_v59, %v9476_v39  ;;  %v9630_v1 = vrot.slane %v407_v59, %v9479_v40  ;;  %v9675_v2 = vrot.slane %v407_v59, %v9482_v41 }
  0x66   : > { %1904 = vmatprep.mubr.f32.mxu0 %v14515_v4  ;;  %1981 = vmatprep.mubr.f32.mxu1 %v14515_v4  ;;  %vm1084_vm9 = vcmp.eq.s32.totalorder %v9617_v61, %v9494_v45  ;;  %vm1086_vm12 = vcmp.eq.s32.totalorder %v9620_v62, %v9494_v45  ;;  %v9678_v5 = vrot.slane %v407_v59, %v9485_v42 }
  0x67   : > { %8544 = vmatmul.mubr.msk.f32.gmra.mxu0 %vm1827_vm8, %v9600_v60  ;;  %8550 = vmatmul.mubr.msk.f32.gmra.mxu1 %vm1827_vm8, %v9600_v60  ;;  %vm1083_vm11 = vcmp.eq.s32.totalorder %v9627_v63, %v9494_v45  ;;  %vm1077_vm1 = vcmp.eq.s32.totalorder %v9630_v1, %v9362_v3  ;;  %v9699_v13 = vrot.slane %v407_v59, %v9488_v43 }
  0x68   : > { %8553 = vmatprep.subr.msk.mxu0 %vm14462_vm13, %v14509_v57  ;;  %8559 = vmatprep.subr.msk.mxu1 %vm14461_vm14, %v14509_v57  ;;  %vm1085_vm14 = vcmp.eq.s32.totalorder %v9630_v1, %v9494_v45  ;;  %vm1076_vm13 = vcmp.eq.s32.totalorder %v9617_v61, %v9362_v3  ;;  %v9702_v16 = vrot.slane %v407_v59, %v9491_v44 }
  0x69   : > { %8554 = vmatpush1.msk.msra.mxu0 %vm14464_vm15, %v14509_v57  ;;  %8560 = vmatpush1.msk.msra.mxu1 %vm14463_vm10, %v14509_v57  ;;  %vm1078_vm10 = vcmp.eq.s32.totalorder %v9620_v62, %v9362_v3  ;;  %vm1075_vm15 = vcmp.eq.s32.totalorder %v9627_v63, %v9362_v3  ;;  %vm14474_vm0 = vcmp.eq.s32.totalorder %v9675_v2, %v9494_v45 }
  0x6a   : > { %2052 = vmatprep.mubr.f32.mxu0 %v14515_v4  ;;  %2129 = vmatprep.mubr.f32.mxu1 %v14515_v4  ;;  %vm14473_vm3 = vcmp.eq.s32.totalorder %v9678_v5, %v9494_v45  ;;  %vm14476_vm2 = vcmp.eq.s32.totalorder %v9699_v13, %v9494_v45  ;;  %vm14475_vm5 = vcmp.eq.s32.totalorder %v9702_v16, %v9494_v45 }
  0x6b   : > { %8555 = vmatmul.mubr.msk.f32.vlgmr.msra.gmra.mxu0 %vm1827_vm8, %v9560_v58  ;;  %8561 = vmatmul.mubr.msk.f32.vlgmr.msra.gmra.mxu1 %vm1827_vm8, %v9560_v58  ;;  %vm14478_vm4 = vcmp.eq.s32.totalorder %v9675_v2, %v9362_v3  ;;  %vm14477_vm7 = vcmp.eq.s32.totalorder %v9678_v5, %v9362_v3  ;;  %vm14599_vm6 = vcmp.eq.s32.totalorder %v9699_v13, %v9362_v3 }
  0x6c   : > { %8563 = vmatprep.subr.msk.mxu0 %vm1084_vm9, %v14509_v57  ;;  %8569 = vmatprep.subr.msk.mxu1 %vm1086_vm12, %v14509_v57  ;;  %v9763_v18 = vrot.slane %v404_v17, %v9467_v34  ;;  %v9766_v19 = vrot.slane %v404_v17, %v9473_v38  ;;  %v9773_v22 = vrot.slane %v404_v17, %v9476_v39 }
  0x6d   : > { %8564 = vmatpush1.msk.msra.mxu0 %vm1083_vm11, %v14509_v57  ;;  %8570 = vmatpush1.msk.msra.mxu1 %vm1085_vm14, %v14509_v57  ;;  %v9776_v23 = vrot.slane %v404_v17, %v9479_v40  ;;  %v9835_v27 = vrot.slane %v404_v17, %v9482_v41  ;;  %v9838_v31 = vrot.slane %v404_v17, %v9485_v42 }
  0x6e   : > { %2058 = vmatprep.mubr.f32.mxu0 %v14515_v4  ;;  %2135 = vmatprep.mubr.f32.mxu1 %v14515_v4  ;;  %v9845_v32 = vrot.slane %v404_v17, %v9488_v43  ;;  %v9848_v33 = vrot.slane %v404_v17, %v9491_v44  ;;  %v282_v46 = vcombine.high %v9398_v14, %v9401_v15 }
  0x6f   : > { %8556 = vmatmul.mubr.msk.f32.gmra.mxu0 %vm1827_vm8, %v9600_v60  ;;  %8562 = vmatmul.mubr.msk.f32.gmra.mxu1 %vm1827_vm8, %v9600_v60  ;;  %v9901_v10 = vrot.slane %v280_v37, %v9367_v6  ;;  %v9929_v12 = vrot.slane %v408_v7, %v9467_v34  ;;  %v9932_v14 = vrot.slane %v408_v7, %v9473_v38 }
  0x70   : > { %8565 = vmatprep.subr.msk.mxu0 %vm1076_vm13, %v14509_v57  ;;  %8571 = vmatprep.subr.msk.mxu1 %vm1078_vm10, %v14509_v57  ;;  %v9916_v11 = vrot.slane %v282_v46, %v9367_v6  ;;  %v9939_v15 = vrot.slane %v408_v7, %v9476_v39  ;;  %v9942_v47 = vrot.slane %v408_v7, %v9479_v40 }
  0x71   : > { %8566 = vmatpush1.msk.msra.mxu0 %vm1075_vm15, %v14509_v57  ;;  %8572 = vmatpush1.msk.msra.mxu1 %vm1077_vm1, %v14509_v57  ;;  %v341_v48 = vcombine.low %v9895_v8, %v9898_v9  ;;  %v10011_v36 = vrot.slane %v408_v7, %v9482_v41  ;;  %v10014_v37 = vrot.slane %v408_v7, %v9485_v42 }
  0x72   : > { %2286 = vmatprep.mubr.f32.mxu0 %v14515_v4  ;;  %2363 = vmatprep.mubr.f32.mxu1 %v14515_v4  ;;  %v345_v59 = vcombine.low %v9901_v10, %v9916_v11  ;;  %v10021_v46 = vrot.slane %v408_v7, %v9488_v43  ;;  %v342_v53 = vcombine.high %v9895_v8, %v9898_v9  ;;  %v14934_v8 = vmov 0.0  }
  0x73   : > { %8567 = vmatmul.mubr.msk.f32.vlgmr.msra.gmra.mxu0 %vm1827_vm8, %v9560_v58  ;;  %8573 = vmatmul.mubr.msk.f32.vlgmr.msra.gmra.mxu1 %vm1827_vm8, %v9560_v58  ;;  %v9983_v17 = vrot.slane %v341_v48, %v9367_v6  ;;  %v10024_v48 = vrot.slane %v408_v7, %v9491_v44  ;;  %v11152_v1 = vsel %vm1084_vm9, 1.0, %v14934_v8 }
  0x74   : > { %8575 = vmatprep.subr.msk.mxu0 %vm14474_vm0, %v14509_v57  ;;  %8581 = vmatprep.subr.msk.mxu1 %vm14473_vm3, %v14509_v57  ;;  %vm14479_vm3 = vcmp.eq.s32.totalorder %v9702_v16, %v9362_v3  ;;  %vm14480_vm0 = vcmp.eq.s32.totalorder %v9763_v18, %v9494_v45  ;;  %v9998_v35 = vrot.slane %v345_v59, %v9367_v6 }
  0x75   : > { %8576 = vmatpush1.msk.msra.mxu0 %vm14476_vm2, %v14509_v57  ;;  %8582 = vmatpush1.msk.msra.mxu1 %vm14475_vm5, %v14509_v57  ;;  %vm14481_vm5 = vcmp.eq.s32.totalorder %v9766_v19, %v9494_v45  ;;  %vm14483_vm2 = vcmp.eq.s32.totalorder %v9773_v22, %v9494_v45  ;;  %v10139_v9 = vrot.slane %v342_v53, %v9367_v6 }
  0x76   : > { %2292 = vmatprep.mubr.f32.mxu0 %v14515_v4  ;;  %2369 = vmatprep.mubr.f32.mxu1 %v14515_v4  ;;  %v405_v7 = vcombine.low %v9983_v17, %v9998_v35 }
  0x77   : > { %8568 = vmatmul.mubr.msk.f32.gmra.mxu0 %vm1827_vm8, %v9600_v60  ;;  %8574 = vmatmul.mubr.msk.f32.gmra.mxu1 %vm1827_vm8, %v9600_v60 }
  0x78   : > { %8577 = vmatprep.subr.msk.mxu0 %vm14478_vm4, %v14509_v57  ;;  %8583 = vmatprep.subr.msk.mxu1 %vm14477_vm7, %v14509_v57  ;;  %vm14482_vm7 = vcmp.eq.s32.totalorder %v9776_v23, %v9494_v45  ;;  %vm14485_vm4 = vcmp.eq.s32.totalorder %v9763_v18, %v9362_v3  ;;  %v10085_v59 = vrot.slane %v405_v7, %v9467_v34 }
  0x79   : > { %8578 = vmatpush1.msk.msra.mxu0 %vm14599_vm6, %v14509_v57  ;;  %8584 = vmatpush1.msk.msra.mxu1 %vm14479_vm3, %v14509_v57  ;;  %vm14484_vm3 = vcmp.eq.s32.totalorder %v9766_v19, %v9362_v3  ;;  %v10088_v0 = vrot.slane %v405_v7, %v9473_v38  ;;  %v10095_v54 = vrot.slane %v405_v7, %v9476_v39 }
  0x7a   : > { %2440 = vmatprep.mubr.f32.mxu0 %v14515_v4  ;;  %2517 = vmatprep.mubr.f32.mxu1 %v14515_v4  ;;  %14930 = vst [vmem:[#allocation25_spill] sm:$0xff] %v10085_v59  ;;  %v10167_v53 = vrot.slane %v405_v7, %v9482_v41  ;;  %v10180_v55 = vrot.slane %v405_v7, %v9491_v44 }
  0x7b   : > { %8579 = vmatmul.mubr.msk.f32.vlgmr.msra.gmra.mxu0 %vm1827_vm8, %v9560_v58  ;;  %8585 = vmatmul.mubr.msk.f32.vlgmr.msra.gmra.mxu1 %vm1827_vm8, %v9560_v58  ;;  %14931 = vst [vmem:[#allocation26_spill] sm:$0xff] %v10088_v0 }
  0x7c   : > { %8587 = vmatprep.subr.msk.mxu0 %vm14480_vm0, %v14509_v57  ;;  %8593 = vmatprep.subr.msk.mxu1 %vm14481_vm5, %v14509_v57  ;;  %vm14487_vm0 = vcmp.eq.s32.totalorder %v9773_v22, %v9362_v3  ;;  %vm14486_vm5 = vcmp.eq.s32.totalorder %v9776_v23, %v9362_v3  ;;  %14935 = vst [vmem:[#allocation28_spill] sm:$0xff] %v10167_v53  ;;  %14938 = vst [vmem:[#allocation31_spill] sm:$0xff] %v10180_v55 }
  0x7d   : > { %8588 = vmatpush1.msk.msra.mxu0 %vm14483_vm2, %v14509_v57  ;;  %8594 = vmatpush1.msk.msra.mxu1 %vm14482_vm7, %v14509_v57  ;;  %vm14489_vm7 = vcmp.eq.s32.totalorder %v9835_v27, %v9494_v45  ;;  %vm14488_vm2 = vcmp.eq.s32.totalorder %v9838_v31, %v9494_v45 }
  0x7e   : > { %2446 = vmatprep.mubr.f32.mxu0 %v14515_v4  ;;  %2523 = vmatprep.mubr.f32.mxu1 %v14515_v4 }
  0x7f   : > { %8580 = vmatmul.mubr.msk.f32.gmra.mxu0 %vm1827_vm8, %v9600_v60  ;;  %8586 = vmatmul.mubr.msk.f32.gmra.mxu1 %vm1827_vm8, %v9600_v60 }
  0x80   : > { %8589 = vmatprep.subr.msk.mxu0 %vm14485_vm4, %v14509_v57  ;;  %8595 = vmatprep.subr.msk.mxu1 %vm14484_vm3, %v14509_v57  ;;  %vm14491_vm3 = vcmp.eq.s32.totalorder %v9845_v32, %v9494_v45  ;;  %vm14490_vm4 = vcmp.eq.s32.totalorder %v9848_v33, %v9494_v45 }
  0x81   : > { %8590 = vmatpush1.msk.msra.mxu0 %vm14487_vm0, %v14509_v57  ;;  %8596 = vmatpush1.msk.msra.mxu1 %vm14486_vm5, %v14509_v57  ;;  %vm14493_vm5 = vcmp.eq.s32.totalorder %v9835_v27, %v9362_v3  ;;  %vm14492_vm0 = vcmp.eq.s32.totalorder %v9838_v31, %v9362_v3 }
  0x82   : > { %2674 = vmatprep.mubr.f32.mxu0 %v14515_v4  ;;  %2751 = vmatprep.mubr.f32.mxu1 %v14515_v4 }
  0x83   : > { %8591 = vmatmul.mubr.msk.f32.vlgmr.msra.gmra.mxu0 %vm1827_vm8, %v9560_v58  ;;  %8597 = vmatmul.mubr.msk.f32.vlgmr.msra.gmra.mxu1 %vm1827_vm8, %v9560_v58 }
  0x84   : > { %8599 = vmatprep.subr.msk.mxu0 %vm14489_vm7, %v14509_v57  ;;  %8605 = vmatprep.subr.msk.mxu1 %vm14488_vm2, %v14509_v57  ;;  %vm14495_vm2 = vcmp.eq.s32.totalorder %v9845_v32, %v9362_v3  ;;  %vm14494_vm7 = vcmp.eq.s32.totalorder %v9848_v33, %v9362_v3 }
  0x85   : > { %8600 = vmatpush1.msk.msra.mxu0 %vm14491_vm3, %v14509_v57  ;;  %8606 = vmatpush1.msk.msra.mxu1 %vm14490_vm4, %v14509_v57  ;;  %vm14497_vm4 = vcmp.eq.s32.totalorder %v9929_v12, %v9494_v45  ;;  %vm14496_vm3 = vcmp.eq.s32.totalorder %v9932_v14, %v9494_v45 }
  0x86   : > { %2680 = vmatprep.mubr.f32.mxu0 %v14515_v4  ;;  %2757 = vmatprep.mubr.f32.mxu1 %v14515_v4 }
  0x87   : > { %8592 = vmatmul.mubr.msk.f32.gmra.mxu0 %vm1827_vm8, %v9600_v60  ;;  %8598 = vmatmul.mubr.msk.f32.gmra.mxu1 %vm1827_vm8, %v9600_v60 }
  0x88   : > { %8601 = vmatprep.subr.msk.mxu0 %vm14493_vm5, %v14509_v57  ;;  %8607 = vmatprep.subr.msk.mxu1 %vm14492_vm0, %v14509_v57  ;;  %vm14499_vm0 = vcmp.eq.s32.totalorder %v9939_v15, %v9494_v45  ;;  %vm14498_vm5 = vcmp.eq.s32.totalorder %v9942_v47, %v9494_v45 }
  0x89   : > { %8602 = vmatpush1.msk.msra.mxu0 %vm14495_vm2, %v14509_v57  ;;  %8608 = vmatpush1.msk.msra.mxu1 %vm14494_vm7, %v14509_v57  ;;  %vm14501_vm7 = vcmp.eq.s32.totalorder %v9929_v12, %v9362_v3  ;;  %vm14500_vm2 = vcmp.eq.s32.totalorder %v9932_v14, %v9362_v3 }
  0x8a   : > { %2828 = vmatprep.mubr.f32.mxu0 %v14515_v4  ;;  %2905 = vmatprep.mubr.f32.mxu1 %v14515_v4 }
  0x8b   : > { %8603 = vmatmul.mubr.msk.f32.vlgmr.msra.gmra.mxu0 %vm1827_vm8, %v9560_v58  ;;  %8609 = vmatmul.mubr.msk.f32.vlgmr.msra.gmra.mxu1 %vm1827_vm8, %v9560_v58 }
  0x8c   : > { %8611 = vmatprep.subr.msk.mxu0 %vm14497_vm4, %v14509_v57  ;;  %8617 = vmatprep.subr.msk.mxu1 %vm14496_vm3, %v14509_v57  ;;  %vm14503_vm3 = vcmp.eq.s32.totalorder %v9939_v15, %v9362_v3  ;;  %vm14502_vm4 = vcmp.eq.s32.totalorder %v9942_v47, %v9362_v3 }
  0x8d   : > { %8612 = vmatpush1.msk.msra.mxu0 %vm14499_vm0, %v14509_v57  ;;  %8618 = vmatpush1.msk.msra.mxu1 %vm14498_vm5, %v14509_v57  ;;  %vm14504_vm5 = vcmp.eq.s32.totalorder %v10011_v36, %v9494_v45  ;;  %vm14506_vm0 = vcmp.eq.s32.totalorder %v10014_v37, %v9494_v45 }
  0x8e   : > { %2834 = vmatprep.mubr.f32.mxu0 %v14515_v4  ;;  %2911 = vmatprep.mubr.f32.mxu1 %v14515_v4 }
  0x8f   : > { %8604 = vmatmul.mubr.msk.f32.gmra.mxu0 %vm1827_vm8, %v9600_v60  ;;  %8610 = vmatmul.mubr.msk.f32.gmra.mxu1 %vm1827_vm8, %v9600_v60 }
  0x90   : > { %8613 = vmatprep.subr.msk.mxu0 %vm14501_vm7, %v14509_v57  ;;  %8619 = vmatprep.subr.msk.mxu1 %vm14500_vm2, %v14509_v57  ;;  %vm14518_vm2 = vcmp.eq.s32.totalorder %v10021_v46, %v9494_v45  ;;  %vm14517_vm7 = vcmp.eq.s32.totalorder %v10024_v48, %v9494_v45 }
  0x91   : > { %8614 = vmatpush1.msk.msra.mxu0 %vm14503_vm3, %v14509_v57  ;;  %8620 = vmatpush1.msk.msra.mxu1 %vm14502_vm4, %v14509_v57  ;;  %vm14520_vm4 = vcmp.eq.s32.totalorder %v10011_v36, %v9362_v3  ;;  %vm14519_vm3 = vcmp.eq.s32.totalorder %v10014_v37, %v9362_v3 }
  0x92   : > { %3062 = vmatprep.mubr.f32.mxu0 %v14515_v4  ;;  %3139 = vmatprep.mubr.f32.mxu1 %v14515_v4 }
  0x93   : > { %8615 = vmatmul.mubr.msk.f32.vlgmr.msra.gmra.mxu0 %vm1827_vm8, %v9560_v58  ;;  %8621 = vmatmul.mubr.msk.f32.vlgmr.msra.gmra.mxu1 %vm1827_vm8, %v9560_v58 }
  0x94   : > { %8623 = vmatprep.subr.msk.mxu0 %vm14504_vm5, %v14509_v57  ;;  %8629 = vmatprep.subr.msk.mxu1 %vm14506_vm0, %v14509_v57  ;;  %vm14522_vm5 = vcmp.eq.s32.totalorder %v10021_v46, %v9362_v3  ;;  %vm14521_vm0 = vcmp.eq.s32.totalorder %v10024_v48, %v9362_v3 }
  0x95   : > { %8624 = vmatpush1.msk.msra.mxu0 %vm14518_vm2, %v14509_v57  ;;  %8630 = vmatpush1.msk.msra.mxu1 %vm14517_vm7, %v14509_v57  ;;  %v10098_v57 = vrot.slane %v405_v7, %v9479_v40  ;;  %vm14524_vm7 = vcmp.eq.s32.totalorder %v10085_v59, %v9494_v45  ;;  %vm14523_vm2 = vcmp.eq.s32.totalorder %v10088_v0, %v9494_v45 }
  0x96   : > { %3068 = vmatprep.mubr.f32.mxu0 %v14515_v4  ;;  %3145 = vmatprep.mubr.f32.mxu1 %v14515_v4  ;;  %v346_v4 = vcombine.high %v9901_v10, %v9916_v11  ;;  %v10170_v11 = vrot.slane %v405_v7, %v9485_v42 }
  0x97   : > { %14932 = vst [vmem:[#allocation27_spill] sm:$0xff] %v10098_v57  ;;  %8616 = vmatmul.mubr.msk.f32.gmra.mxu0 %vm1827_vm8, %v9600_v60  ;;  %8622 = vmatmul.mubr.msk.f32.gmra.mxu1 %vm1827_vm8, %v9600_v60 }
  0x98   : > { %8625 = vmatprep.subr.msk.mxu0 %vm14520_vm4, %v14933_v56  ;;  %8631 = vmatprep.subr.msk.mxu1 %vm14519_vm3, %v14933_v56  ;;  %vm14528_vm3 = vcmp.eq.s32.totalorder %v10095_v54, %v9494_v45  ;;  %vm14527_vm4 = vcmp.eq.s32.totalorder %v10098_v57, %v9494_v45  ;;  %v10154_v10 = vrot.slane %v346_v4, %v9367_v6 }
  0x99   : > { %8626 = vmatpush1.msk.msra.mxu0 %vm14522_vm5, %v14933_v56  ;;  %8632 = vmatpush1.msk.msra.mxu1 %vm14521_vm0, %v14933_v56  ;;  %vm14530_vm0 = vcmp.eq.s32.totalorder %v10085_v59, %v9362_v3  ;;  %vm14529_vm5 = vcmp.eq.s32.totalorder %v10088_v0, %v9362_v3  ;;  %14936 = vst [vmem:[#allocation29_spill] sm:$0xff] %v10170_v11  ;;  %v9033_v59 = vld [vmem:[%s9387_s23 + $0x78] sm:$0xff] }
  0x9a   : > { %3216 = vmatprep.mubr.f32.mxu0 %v14934_v8  ;;  %3293 = vmatprep.mubr.f32.mxu1 %v14934_v8  ;;  %v10177_v4 = vrot.slane %v405_v7, %v9488_v43  ;;  %v409_v7 = vcombine.low %v10139_v9, %v10154_v10  ;;  %v411_v0 = vcombine.low %v9435_v26, %v9443_v28 }
  0x9b   : > { %8627 = vmatmul.mubr.msk.f32.vlgmr.msra.gmra.mxu0 %vm1827_vm8, %v9560_v58  ;;  %8633 = vmatmul.mubr.msk.f32.vlgmr.msra.gmra.mxu1 %vm1827_vm8, %v9560_v58 }
  0x9c   : > { %8635 = vmatprep.subr.msk.mxu0 %vm14524_vm7, %v14933_v56  ;;  %8641 = vmatprep.subr.msk.mxu1 %vm14523_vm2, %v14933_v56  ;;  %vm14532_vm2 = vcmp.eq.s32.totalorder %v10095_v54, %v9362_v3  ;;  %vm14531_vm7 = vcmp.eq.s32.totalorder %v10098_v57, %v9362_v3  ;;  %14937 = vst [vmem:[#allocation30_spill] sm:$0xff] %v10177_v4 }
  0x9d   : > { %8636 = vmatpush1.msk.msra.mxu0 %vm14528_vm3, %v14933_v56  ;;  %8642 = vmatpush1.msk.msra.mxu1 %vm14527_vm4, %v14933_v56  ;;  %vm14533_vm4 = vcmp.eq.s32.totalorder %v10167_v53, %v9494_v45  ;;  %vm14538_vm3 = vcmp.eq.s32.totalorder %v10170_v11, %v9494_v45  ;;  %v10241_v50 = vrot.slane %v409_v7, %v9467_v34 }
  0x9e   : > { %3222 = vmatprep.mubr.f32.mxu0 %v14934_v8  ;;  %3299 = vmatprep.mubr.f32.mxu1 %v14934_v8  ;;  %v10244_v49 = vrot.slane %v409_v7, %v9473_v38  ;;  %v10251_v52 = vrot.slane %v409_v7, %v9476_v39  ;;  %v10254_v51 = vrot.slane %v409_v7, %v9479_v40 }
  0x9f   : > { %8628 = vmatmul.mubr.msk.f32.gmra.mxu0 %vm1827_vm8, %v9600_v60  ;;  %8634 = vmatmul.mubr.msk.f32.gmra.mxu1 %vm1827_vm8, %v9600_v60  ;;  %14939 = vst [vmem:[#allocation32_spill] sm:$0xff] %v10241_v50  ;;  %v10553_v28 = vrot.slane %v411_v0, %v9367_v6 }
  0xa0   : > { %8637 = vmatprep.subr.msk.mxu0 %vm14530_vm0, %v14933_v56  ;;  %8643 = vmatprep.subr.msk.mxu1 %vm14529_vm5, %v14933_v56  ;;  %vm14544_vm5 = vcmp.eq.s32.totalorder %v10177_v4, %v9494_v45  ;;  %vm14543_vm0 = vcmp.eq.s32.totalorder %v10180_v55, %v9494_v45  ;;  %14940 = vst [vmem:[#allocation33_spill] sm:$0xff] %v10244_v49  ;;  %14941 = vst [vmem:[#allocation34_spill] sm:$0xff] %v10251_v52 }
  0xa1   : > { %8638 = vmatpush1.msk.msra.mxu0 %vm14532_vm2, %v14933_v56  ;;  %8644 = vmatpush1.msk.msra.mxu1 %vm14531_vm7, %v14933_v56  ;;  %vm14546_vm7 = vcmp.eq.s32.totalorder %v10167_v53, %v9362_v3  ;;  %vm14545_vm2 = vcmp.eq.s32.totalorder %v10170_v11, %v9362_v3  ;;  %14942 = vst [vmem:[#allocation35_spill] sm:$0xff] %v10254_v51 }
  0xa2   : > { %3450 = vmatprep.mubr.f32.mxu0 %v14934_v8  ;;  %3527 = vmatprep.mubr.f32.mxu1 %v14934_v8  ;;  %v10313_v11 = vrot.slane %v409_v7, %v9482_v41  ;;  %v10316_v53 = vrot.slane %v409_v7, %v9485_v42 }
  0xa3   : > { %8639 = vmatmul.mubr.msk.f32.vlgmr.msra.gmra.mxu0 %vm1827_vm8, %v9560_v58  ;;  %8645 = vmatmul.mubr.msk.f32.vlgmr.msra.gmra.mxu1 %vm1827_vm8, %v9560_v58 }
  0xa4   : > { %8647 = vmatprep.subr.msk.mxu0 %vm14533_vm4, %v14933_v56  ;;  %8653 = vmatprep.subr.msk.mxu1 %vm14538_vm3, %v14933_v56  ;;  %vm14548_vm4 = vcmp.eq.s32.totalorder %v10177_v4, %v9362_v3  ;;  %vm14547_vm3 = vcmp.eq.s32.totalorder %v10180_v55, %v9362_v3  ;;  %14943 = vst [vmem:[#allocation36_spill] sm:$0xff] %v10313_v11  ;;  %14944 = vst [vmem:[#allocation37_spill] sm:$0xff] %v10316_v53 }
  0xa5   : > { %8648 = vmatpush1.msk.msra.mxu0 %vm14544_vm5, %v14933_v56  ;;  %8654 = vmatpush1.msk.msra.mxu1 %vm14543_vm0, %v14933_v56  ;;  %vm14549_vm0 = vcmp.eq.s32.totalorder %v10241_v50, %v9494_v45  ;;  %vm14554_vm5 = vcmp.eq.s32.totalorder %v10244_v49, %v9494_v45  ;;  %v10323_v55 = vrot.slane %v409_v7, %v9488_v43 }
  0xa6   : > { %3456 = vmatprep.mubr.f32.mxu0 %v14934_v8  ;;  %3533 = vmatprep.mubr.f32.mxu1 %v14934_v8  ;;  %v10326_v4 = vrot.slane %v409_v7, %v9491_v44  ;;  %v406_v7 = vcombine.high %v9983_v17, %v9998_v35 }
  0xa7   : > { %8640 = vmatmul.mubr.msk.f32.gmra.mxu0 %vm1827_vm8, %v9600_v60  ;;  %8646 = vmatmul.mubr.msk.f32.gmra.mxu1 %vm1827_vm8, %v9600_v60  ;;  %14945 = vst [vmem:[#allocation38_spill] sm:$0xff] %v10323_v55 }
  0xa8   : > { %8649 = vmatprep.subr.msk.mxu0 %vm14546_vm7, %v14933_v56  ;;  %8655 = vmatprep.subr.msk.mxu1 %vm14545_vm2, %v14933_v56  ;;  %vm14560_vm2 = vcmp.eq.s32.totalorder %v10251_v52, %v9494_v45  ;;  %vm14559_vm7 = vcmp.eq.s32.totalorder %v10254_v51, %v9494_v45  ;;  %14946 = vst [vmem:[#allocation39_spill] sm:$0xff] %v10326_v4 }
  0xa9   : > { %8650 = vmatpush1.msk.msra.mxu0 %vm14548_vm4, %v14933_v56  ;;  %8656 = vmatpush1.msk.msra.mxu1 %vm14547_vm3, %v14933_v56  ;;  %vm14562_vm3 = vcmp.eq.s32.totalorder %v10241_v50, %v9362_v3  ;;  %vm14561_vm4 = vcmp.eq.s32.totalorder %v10244_v49, %v9362_v3  ;;  %v10387_v17 = vrot.slane %v406_v7, %v9467_v34 }
  0xaa   : > { %3604 = vmatprep.mubr.f32.mxu0 %v14934_v8  ;;  %3681 = vmatprep.mubr.f32.mxu1 %v14934_v8  ;;  %v10390_v35 = vrot.slane %v406_v7, %v9473_v38  ;;  %v10397_v49 = vrot.slane %v406_v7, %v9476_v39  ;;  %v10400_v50 = vrot.slane %v406_v7, %v9479_v40 }
  0xab   : > { %8651 = vmatmul.mubr.msk.f32.vlgmr.msra.gmra.mxu0 %vm1827_vm8, %v9560_v58  ;;  %8657 = vmatmul.mubr.msk.f32.vlgmr.msra.gmra.mxu1 %vm1827_vm8, %v9560_v58  ;;  %14947 = vst [vmem:[#allocation40_spill] sm:$0xff] %v10387_v17 }
  0xac   : > { %8659 = vmatprep.subr.msk.mxu0 %vm14549_vm0, %v14933_v56  ;;  %8665 = vmatprep.subr.msk.mxu1 %vm14554_vm5, %v14933_v56  ;;  %vm14564_vm0 = vcmp.eq.s32.totalorder %v10251_v52, %v9362_v3  ;;  %vm14563_vm5 = vcmp.eq.s32.totalorder %v10254_v51, %v9362_v3  ;;  %14948 = vst [vmem:[#allocation41_spill] sm:$0xff] %v10390_v35  ;;  %14949 = vst [vmem:[#allocation42_spill] sm:$0xff] %v10397_v49 }
  0xad   : > { %8660 = vmatpush1.msk.msra.mxu0 %vm14560_vm2, %v14933_v56  ;;  %8666 = vmatpush1.msk.msra.mxu1 %vm14559_vm7, %v14933_v56  ;;  %vm14565_vm7 = vcmp.eq.s32.totalorder %v10313_v11, %v9494_v45  ;;  %vm14566_vm2 = vcmp.eq.s32.totalorder %v10316_v53, %v9494_v45  ;;  %14950 = vst [vmem:[#allocation43_spill] sm:$0xff] %v10400_v50 }
  0xae   : > { %3610 = vmatprep.mubr.f32.mxu0 %v14934_v8  ;;  %3687 = vmatprep.mubr.f32.mxu1 %v14934_v8  ;;  %v415_v51 = vcombine.low %v9421_v20, %v9424_v21  ;;  %v417_v52 = vcombine.low %v9429_v24, %v9432_v25  ;;  %v413_v20 = vcombine.low %v9446_v29, %v9449_v30 }
  0xaf   : > { %8652 = vmatmul.mubr.msk.f32.gmra.mxu0 %vm1827_vm8, %v9600_v60  ;;  %8658 = vmatmul.mubr.msk.f32.gmra.mxu1 %vm1827_vm8, %v9600_v60 }
  0xb0   : > { %8661 = vmatprep.subr.msk.mxu0 %vm14562_vm3, %v14933_v56  ;;  %8667 = vmatprep.subr.msk.mxu1 %vm14561_vm4, %v14933_v56  ;;  %vm14572_vm4 = vcmp.eq.s32.totalorder %v10323_v55, %v9494_v45  ;;  %vm14571_vm3 = vcmp.eq.s32.totalorder %v10326_v4, %v9494_v45  ;;  %v10521_v21 = vrot.slane %v415_v51, %v9367_v6 }
  0xb1   : > { %8662 = vmatpush1.msk.msra.mxu0 %vm14564_vm0, %v14933_v56  ;;  %8668 = vmatpush1.msk.msra.mxu1 %vm14563_vm5, %v14933_v56  ;;  %vm14574_vm5 = vcmp.eq.s32.totalorder %v10313_v11, %v9362_v3  ;;  %vm14573_vm0 = vcmp.eq.s32.totalorder %v10316_v53, %v9362_v3  ;;  %v10459_v53 = vrot.slane %v406_v7, %v9482_v41 }
  0xb2   : > { %3838 = vmatprep.mubr.f32.mxu0 %v14934_v8  ;;  %3915 = vmatprep.mubr.f32.mxu1 %v14934_v8  ;;  %v10462_v11 = vrot.slane %v406_v7, %v9485_v42  ;;  %v10524_v24 = vrot.slane %v417_v52, %v9367_v6  ;;  %v10556_v29 = vrot.slane %v413_v20, %v9367_v6 }
  0xb3   : > { %8663 = vmatmul.mubr.msk.f32.vlgmr.msra.gmra.mxu0 %vm1827_vm8, %v9560_v58  ;;  %8669 = vmatmul.mubr.msk.f32.vlgmr.msra.gmra.mxu1 %vm1827_vm8, %v9560_v58  ;;  %14951 = vst [vmem:[#allocation44_spill] sm:$0xff] %v10459_v53 }
  0xb4   : > { %8671 = vmatprep.subr.msk.mxu0 %vm14565_vm7, %v14933_v56  ;;  %8677 = vmatprep.subr.msk.mxu1 %vm14566_vm2, %v14933_v56  ;;  %vm14576_vm7 = vcmp.eq.s32.totalorder %v10323_v55, %v9362_v3  ;;  %vm14575_vm2 = vcmp.eq.s32.totalorder %v10326_v4, %v9362_v3  ;;  %14952 = vst [vmem:[#allocation45_spill] sm:$0xff] %v10462_v11 }
  0xb5   : > { %8672 = vmatpush1.msk.msra.mxu0 %vm14572_vm4, %v14933_v56  ;;  %8678 = vmatpush1.msk.msra.mxu1 %vm14571_vm3, %v14933_v56  ;;  %vm14577_vm3 = vcmp.eq.s32.totalorder %v10387_v17, %v9494_v45  ;;  %vm14582_vm4 = vcmp.eq.s32.totalorder %v10390_v35, %v9494_v45  ;;  %v10469_v4 = vrot.slane %v406_v7, %v9488_v43 }
  0xb6   : > { %3844 = vmatprep.mubr.f32.mxu0 %v14934_v8  ;;  %3921 = vmatprep.mubr.f32.mxu1 %v14934_v8  ;;  %v10472_v55 = vrot.slane %v406_v7, %v9491_v44  ;;  %v410_v7 = vcombine.high %v10139_v9, %v10154_v10  ;;  %v475_v0 = vcombine.low %v10553_v28, %v10556_v29 }
  0xb7   : > { %8664 = vmatmul.mubr.msk.f32.gmra.mxu0 %vm1827_vm8, %v9600_v60  ;;  %8670 = vmatmul.mubr.msk.f32.gmra.mxu1 %vm1827_vm8, %v9600_v60  ;;  %14953 = vst [vmem:[#allocation46_spill] sm:$0xff] %v10469_v4  ;;  %vm14607_vm6 = vcmp.eq.s32.totalorder %v10469_v4, %v9362_v3  ;;  %v479_v52 = vcombine.low %v10521_v21, %v10524_v24 }
  0xb8   : > { %8673 = vmatprep.subr.msk.mxu0 %vm14574_vm5, %v14933_v56  ;;  %8679 = vmatprep.subr.msk.mxu1 %vm14573_vm0, %v14933_v56  ;;  %vm14594_vm0 = vcmp.eq.s32.totalorder %v10397_v49, %v9494_v45  ;;  %vm14593_vm5 = vcmp.eq.s32.totalorder %v10400_v50, %v9494_v45  ;;  %14954 = vst [vmem:[#allocation47_spill] sm:$0xff] %v10472_v55 }
  0xb9   : > { %8674 = vmatpush1.msk.msra.mxu0 %vm14576_vm7, %v14933_v56  ;;  %8680 = vmatpush1.msk.msra.mxu1 %vm14575_vm2, %v14933_v56  ;;  %vm14596_vm2 = vcmp.eq.s32.totalorder %v10387_v17, %v9362_v3  ;;  %vm14595_vm7 = vcmp.eq.s32.totalorder %v10390_v35, %v9362_v3  ;;  %v10539_v25 = vrot.slane %v410_v7, %v9467_v34  ;;  %v9030_v17 = vld [vmem:[%s9387_s23 + $0x60] sm:$0xff] }
  0xba   : > { %3992 = vmatprep.mubr.f32.mxu0 %v14934_v8  ;;  %4069 = vmatprep.mubr.f32.mxu1 %v14934_v8  ;;  %v10550_v26 = vrot.slane %v410_v7, %v9473_v38  ;;  %v10563_v30 = vrot.slane %v410_v7, %v9476_v39  ;;  %v10566_v51 = vrot.slane %v410_v7, %v9479_v40 }
  0xbb   : > { %8675 = vmatmul.mubr.msk.f32.vlgmr.msra.gmra.mxu0 %vm1827_vm8, %v9560_v58  ;;  %8681 = vmatmul.mubr.msk.f32.vlgmr.msra.gmra.mxu1 %vm1827_vm8, %v9560_v58  ;;  %14955 = vst [vmem:[#allocation48_spill] sm:$0xff] %v10539_v25  ;;  %v10621_v9 = vrot.slane %v410_v7, %v9482_v41  ;;  %v10632_v10 = vrot.slane %v410_v7, %v9485_v42 }
  0xbc   : > { %8683 = vmatprep.subr.msk.mxu0 %vm14577_vm3, %v14933_v56  ;;  %8689 = vmatprep.subr.msk.mxu1 %vm14582_vm4, %v14933_v56  ;;  %vm14598_vm3 = vcmp.eq.s32.totalorder %v10397_v49, %v9362_v3  ;;  %vm14597_vm4 = vcmp.eq.s32.totalorder %v10400_v50, %v9362_v3  ;;  %14956 = vst [vmem:[#allocation49_spill] sm:$0xff] %v10550_v26  ;;  %14957 = vst [vmem:[#allocation50_spill] sm:$0xff] %v10563_v30  ;;  %v9031_v50 = vld [vmem:[%s9387_s23 + $0x68] sm:$0xff] }
  0xbd   : > { %8684 = vmatpush1.msk.msra.mxu0 %vm14594_vm0, %v14933_v56  ;;  %8690 = vmatpush1.msk.msra.mxu1 %vm14593_vm5, %v14933_v56  ;;  %vm14601_vm5 = vcmp.eq.s32.totalorder %v10459_v53, %v9494_v45  ;;  %vm14600_vm0 = vcmp.eq.s32.totalorder %v10462_v11, %v9494_v45  ;;  %14958 = vst [vmem:[#allocation51_spill] sm:$0xff] %v10566_v51  ;;  %14959 = vst [vmem:[#allocation52_spill] sm:$0xff] %v10621_v9 }
  0xbe   : > { %3998 = vmatprep.mubr.f32.mxu0 %v14934_v8  ;;  %4075 = vmatprep.mubr.f32.mxu1 %v14934_v8  ;;  %14960 = vst [vmem:[#allocation53_spill] sm:$0xff] %v10632_v10  ;;  %v10635_v20 = vrot.slane %v475_v0, %v9367_v6  ;;  %v416_v49 = vcombine.high %v9030_v17, %v9031_v50 }
  0xbf   : > { %8676 = vmatmul.mubr.msk.f32.gmra.mxu0 %vm1827_vm8, %v9600_v60  ;;  %8682 = vmatmul.mubr.msk.f32.gmra.mxu1 %vm1827_vm8, %v9600_v60 }
  0xc0   : > { %8685 = vmatprep.subr.msk.mxu0 %vm14596_vm2, %v14933_v56  ;;  %8691 = vmatprep.subr.msk.mxu1 %vm14595_vm7, %v14933_v56  ;;  %vm14603_vm7 = vcmp.eq.s32.totalorder %v10469_v4, %v9494_v45  ;;  %vm14602_vm2 = vcmp.eq.s32.totalorder %v10472_v55, %v9494_v45  ;;  %v9029_v4 = vld [vmem:[%s9387_s23 + $0x38] sm:$0xff] }
  0xc1   : > { %8686 = vmatpush1.msk.msra.mxu0 %vm14598_vm3, %v14933_v56  ;;  %8692 = vmatpush1.msk.msra.mxu1 %vm14597_vm4, %v14933_v56  ;;  %vm14605_vm4 = vcmp.eq.s32.totalorder %v10459_v53, %v9362_v3  ;;  %vm14604_vm3 = vcmp.eq.s32.totalorder %v10462_v11, %v9362_v3  ;;  %v10638_v11 = vrot.slane %v479_v52, %v9367_v6 }
  0xc2   : > { %4226 = vmatprep.mubr.f32.mxu0 %v14934_v8  ;;  %4303 = vmatprep.mubr.f32.mxu1 %v14934_v8  ;;  %v10645_v53 = vrot.slane %v410_v7, %v9488_v43 }
  0xc3   : > { %8687 = vmatmul.mubr.msk.f32.vlgmr.msra.gmra.mxu0 %vm1827_vm8, %v9560_v58  ;;  %8693 = vmatmul.mubr.msk.f32.vlgmr.msra.gmra.mxu1 %vm1827_vm8, %v9560_v58  ;;  %v10990_v50 = vcombine.high %v10635_v20, %v10638_v11 }
  0xc4   : > { %8695 = vmatprep.subr.msk.mxu0 %vm14601_vm5, %v14933_v56  ;;  %8701 = vmatprep.subr.msk.mxu1 %vm14600_vm0, %v14933_v56  ;;  %vm14606_vm0 = vcmp.eq.s32.totalorder %v10472_v55, %v9362_v3  ;;  %vm14615_vm5 = vcmp.eq.s32.totalorder %v10539_v25, %v9494_v45  ;;  %14961 = vst [vmem:[#allocation54_spill] sm:$0xff] %v10645_v53 }
  0xc5   : > { %8696 = vmatpush1.msk.msra.mxu0 %vm14603_vm7, %v14933_v56  ;;  %8702 = vmatpush1.msk.msra.mxu1 %vm14602_vm2, %v14933_v56  ;;  %vm14610_vm2 = vcmp.eq.s32.totalorder %v10550_v26, %v9494_v45  ;;  %vm14617_vm7 = vcmp.eq.s32.totalorder %v10563_v30, %v9494_v45  ;;  %v10648_v55 = vrot.slane %v410_v7, %v9491_v44 }
  0xc6   : > { %4232 = vmatprep.mubr.f32.mxu0 %v14934_v8  ;;  %4309 = vmatprep.mubr.f32.mxu1 %v14934_v8  ;;  %v539_v7 = vcombine.low %v10635_v20, %v10638_v11  ;;  %v11009_v11 = vrot.slane %v416_v49, %v9367_v6  ;;  %v11038_v49 = vrot.slane %v10990_v50, %v9467_v34  ;;  %v11098_v20 = vsel %vm1075_vm15, 1.0, %v14934_v8 }
  0xc7   : > { %8688 = vmatmul.mubr.msk.f32.gmra.mxu0 %vm1827_vm8, %v9600_v60  ;;  %8694 = vmatmul.mubr.msk.f32.gmra.mxu1 %vm1827_vm8, %v9600_v60  ;;  %14962 = vst [vmem:[#allocation55_spill] sm:$0xff] %v10648_v55  ;;  %v11054_v17 = vrot.slane %v10990_v50, %v9479_v40  ;;  %v11146_v63 = vrot.slane %v10990_v50, %v9482_v41 }
  0xc8   : > { %8697 = vmatprep.subr.msk.mxu0 %vm14605_vm4, %v14933_v56  ;;  %8703 = vmatprep.subr.msk.mxu1 %vm14604_vm3, %v14933_v56  ;;  %vm14616_vm3 = vcmp.eq.s32.totalorder %v10566_v51, %v9494_v45  ;;  %vm14619_vm4 = vcmp.eq.s32.totalorder %v10539_v25, %v9362_v3  ;;  %v10709_v0 = vrot.slane %v539_v7, %v9467_v34 }
  0xc9   : > { %8698 = vmatpush1.msk.msra.mxu0 %vm14607_vm6, %v14933_v56  ;;  %8704 = vmatpush1.msk.msra.mxu1 %vm14606_vm0, %v14933_v56  ;;  %vm14618_vm0 = vcmp.eq.s32.totalorder %v10550_v26, %v9362_v3  ;;  %vm14773_vm6 = vcmp.eq.s32.totalorder %v10563_v30, %v9362_v3  ;;  %v10712_v52 = vrot.slane %v539_v7, %v9473_v38 }
  0xca   : > { %4380 = vmatprep.mubr.f32.mxu0 %v14934_v8  ;;  %4457 = vmatprep.mubr.f32.mxu1 %v14934_v8  ;;  %14963 = vst [vmem:[#allocation56_spill] sm:$0xff] %v10709_v0  ;;  %v10719_v26 = vrot.slane %v539_v7, %v9476_v39  ;;  %v10722_v25 = vrot.slane %v539_v7, %v9479_v40  ;;  %14979 = vst [vmem:[#allocation72_spill] sm:$0xff] %v11038_v49 }
  0xcb   : > { %8699 = vmatmul.mubr.msk.f32.vlgmr.msra.gmra.mxu0 %vm1827_vm8, %v9560_v58  ;;  %8705 = vmatmul.mubr.msk.f32.vlgmr.msra.gmra.mxu1 %vm1827_vm8, %v9560_v58  ;;  %14964 = vst [vmem:[#allocation57_spill] sm:$0xff] %v10712_v52  ;;  %v476_v30 = vcombine.high %v10553_v28, %v10556_v29  ;;  %v10777_v28 = vrot.slane %v539_v7, %v9485_v42  ;;  %14982 = vst [vmem:[#allocation75_spill] sm:$0xff] %v11054_v17 }
  0xcc   : > { %8707 = vmatprep.subr.msk.mxu0 %vm14615_vm5, %v14933_v56  ;;  %8713 = vmatprep.subr.msk.mxu1 %vm14610_vm2, %v14933_v56  ;;  %vm14620_vm2 = vcmp.eq.s32.totalorder %v10566_v51, %v9362_v3  ;;  %vm14621_vm5 = vcmp.eq.s32.totalorder %v10621_v9, %v9494_v45  ;;  %14965 = vst [vmem:[#allocation58_spill] sm:$0xff] %v10719_v26  ;;  %14966 = vst [vmem:[#allocation59_spill] sm:$0xff] %v10722_v25 }
  0xcd   : > { %8708 = vmatpush1.msk.msra.mxu0 %vm14617_vm7, %v14933_v56  ;;  %8714 = vmatpush1.msk.msra.mxu1 %vm14616_vm3, %v14933_v56  ;;  %vm14622_vm3 = vcmp.eq.s32.totalorder %v10632_v10, %v9494_v45  ;;  %vm14632_vm7 = vcmp.eq.s32.totalorder %v10645_v53, %v9494_v45  ;;  %v480_v51 = vcombine.high %v10521_v21, %v10524_v24 }
  0xce   : > { %4386 = vmatprep.mubr.f32.mxu0 %v14934_v8  ;;  %4463 = vmatprep.mubr.f32.mxu1 %v14934_v8  ;;  %v10774_v24 = vrot.slane %v539_v7, %v9482_v41  ;;  %14968 = vst [vmem:[#allocation61_spill] sm:$0xff] %v10777_v28  ;;  %v10780_v29 = vrot.slane %v476_v30, %v9367_v6  ;;  %14983 = vst [vmem:[#allocation76_spill] sm:$0xff] %v11146_v63 }
  0xcf   : > { %8700 = vmatmul.mubr.msk.f32.gmra.mxu0 %vm1827_vm8, %v9600_v60  ;;  %8706 = vmatmul.mubr.msk.f32.gmra.mxu1 %vm1827_vm8, %v9600_v60  ;;  %v10763_v21 = vrot.slane %v480_v51, %v9367_v6  ;;  %v10801_v30 = vrot.slane %v539_v7, %v9488_v43  ;;  %v10804_v51 = vrot.slane %v539_v7, %v9491_v44 }
  0xd0   : > { %8709 = vmatprep.subr.msk.mxu0 %vm14619_vm4, %v14933_v56  ;;  %8715 = vmatprep.subr.msk.mxu1 %vm14618_vm0, %v14933_v56  ;;  %vm14631_vm0 = vcmp.eq.s32.totalorder %v10648_v55, %v9494_v45  ;;  %vm14634_vm4 = vcmp.eq.s32.totalorder %v10621_v9, %v9362_v3  ;;  %14967 = vst [vmem:[#allocation60_spill] sm:$0xff] %v10774_v24  ;;  %v9027_v9 = vld [vmem:[%s9387_s23 + $0x28] sm:$0xff] }
  0xd1   : > { %8710 = vmatpush1.msk.msra.mxu0 %vm14773_vm6, %v14933_v56  ;;  %8716 = vmatpush1.msk.msra.mxu1 %vm14620_vm2, %v14933_v56  ;;  %vm14633_vm2 = vcmp.eq.s32.totalorder %v10632_v10, %v9362_v3  ;;  %14969 = vst [vmem:[#allocation62_spill] sm:$0xff] %v10801_v30  ;;  %14970 = vst [vmem:[#allocation63_spill] sm:$0xff] %v10804_v51  ;;  %v543_v7 = vcombine.low %v10780_v29, %v10763_v21  ;;  %v9026_v10 = vld [vmem:[%s9387_s23 + $0x20] sm:$0xff] }
  0xd2   : > { %4614 = vmatprep.mubr.f32.mxu0 %v14934_v8  ;;  %4691 = vmatprep.mubr.f32.mxu1 %v14934_v8  ;;  %v11172_v61 = vrot.slane %v10990_v50, %v9485_v42  ;;  %v11176_v62 = vrot.slane %v10990_v50, %v9488_v43  ;;  %vm14991_vm15 = vcmp.eq.s32.totalorder %v9678_v5, %v9362_v3 }
  0xd3   : > { %8711 = vmatmul.mubr.msk.f32.vlgmr.msra.gmra.mxu0 %vm1827_vm8, %v9560_v58  ;;  %8717 = vmatmul.mubr.msk.f32.vlgmr.msra.gmra.mxu1 %vm1827_vm8, %v9560_v58  ;;  %vm15063_vm6 = vcmp.eq.s32.totalorder %v9932_v14, %v9494_v45 }
  0xd4   : > { %8719 = vmatprep.subr.msk.mxu0 %vm14621_vm5, %v14933_v56  ;;  %8725 = vmatprep.subr.msk.mxu1 %vm14622_vm3, %v14933_v56  ;;  %vm14644_vm5 = vcmp.eq.s32.totalorder %v10645_v53, %v9362_v3  ;;  %vm14637_vm3 = vcmp.eq.s32.totalorder %v10648_v55, %v9362_v3  ;;  %v412_v55 = vcombine.high %v9026_v10, %v9027_v9  ;;  %v9028_v53 = vld [vmem:[%s9387_s23 + $0x30] sm:$0xff]  ;;  %v11126_v10 = vsel %vm1083_vm11, 1.0, %v14934_v8 }
  0xd5   : > { %8720 = vmatpush1.msk.msra.mxu0 %vm14632_vm7, %v14933_v56  ;;  %8726 = vmatpush1.msk.msra.mxu1 %vm14631_vm0, %v14933_v56  ;;  %vm14636_vm0 = vcmp.eq.s32.totalorder %v10709_v0, %v9494_v45  ;;  %vm14635_vm7 = vcmp.eq.s32.totalorder %v10712_v52, %v9494_v45  ;;  %v414_v35 = vcombine.high %v9028_v53, %v9029_v4  ;;  %v11132_v9 = vsel %vm1085_vm14, 1.0, %v14934_v8 }
  0xd6   : > { %4620 = vmatprep.mubr.f32.mxu0 %v14934_v8  ;;  %4697 = vmatprep.mubr.f32.mxu1 %v14934_v8  ;;  %v11050_v4 = vrot.slane %v10990_v50, %v9476_v39  ;;  %14984 = vst [vmem:[#allocation77_spill] sm:$0xff] %v11172_v61  ;;  %14985 = vst [vmem:[#allocation78_spill] sm:$0xff] %v11176_v62  ;;  %vm14990_vm14 = vcmp.eq.s32.totalorder %v9675_v2, %v9362_v3 }
  0xd7   : > { %8712 = vmatmul.mubr.msk.f32.gmra.mxu0 %vm1827_vm8, %v9600_v60  ;;  %8718 = vmatmul.mubr.msk.f32.gmra.mxu1 %vm1827_vm8, %v9600_v60  ;;  %v11006_v53 = vrot.slane %v414_v35, %v9367_v6  ;;  %v11070_v35 = vcombine.high %v10780_v29, %v10763_v21  ;;  %v11104_v21 = vsel %vm1077_vm1, 1.0, %v14934_v8  ;;  %v11114_v29 = vsel %vm1076_vm13, 1.0, %v14934_v8 }
  0xd8   : > { %8721 = vmatprep.subr.msk.mxu0 %vm14634_vm4, %v14933_v56  ;;  %8727 = vmatprep.subr.msk.mxu1 %vm14633_vm2, %v14933_v56  ;;  %vm14638_vm2 = vcmp.eq.s32.totalorder %v10719_v26, %v9494_v45  ;;  %vm14639_vm4 = vcmp.eq.s32.totalorder %v10722_v25, %v9494_v45  ;;  %14981 = vst [vmem:[#allocation74_spill] sm:$0xff] %v11050_v4 }
  0xd9   : > { %8722 = vmatpush1.msk.msra.mxu0 %vm14644_vm5, %v14933_v56  ;;  %8728 = vmatpush1.msk.msra.mxu1 %vm14637_vm3, %v14933_v56  ;;  %vm14642_vm3 = vcmp.eq.s32.totalorder %v10719_v26, %v9362_v3  ;;  %vm14655_vm5 = vcmp.eq.s32.totalorder %v10777_v28, %v9362_v3  ;;  %v10954_v26 = vld [vmem:[#allocation5 + $0x8] sm:$0xff]  ;;  %vm14726_vm1 = vcmp.eq.s32.totalorder %v11038_v49, %v9362_v3 }
  0xda   : > { %4768 = vmatprep.mubr.f32.mxu0 %v14934_v8  ;;  %4845 = vmatprep.mubr.f32.mxu1 %v14934_v8  ;;  %vm14744_vm11 = vcmp.eq.s32.totalorder %v11050_v4, %v9362_v3  ;;  %vm14988_vm13 = vcmp.eq.s32.totalorder %v9702_v16, %v9362_v3 }
  0xdb   : > { %8723 = vmatmul.mubr.msk.f32.vlgmr.msra.gmra.mxu0 %vm1827_vm8, %v9560_v58  ;;  %8729 = vmatmul.mubr.msk.f32.vlgmr.msra.gmra.mxu1 %vm1827_vm8, %v9560_v58 }
  0xdc   : > { %8731 = vmatprep.subr.msk.mxu0 %vm14636_vm0, %v14933_v56  ;;  %8737 = vmatprep.subr.msk.mxu1 %vm14635_vm7, %v14933_v56  ;;  %vm14640_vm7 = vcmp.eq.s32.totalorder %v10709_v0, %v9362_v3  ;;  %vm14641_vm0 = vcmp.eq.s32.totalorder %v10712_v52, %v9362_v3  ;;  %v10868_v52 = vrot.slane %v543_v7, %v9473_v38 }
  0xdd   : > { %8732 = vmatpush1.msk.msra.mxu0 %vm14638_vm2, %v14933_v56  ;;  %8738 = vmatpush1.msk.msra.mxu1 %vm14639_vm4, %v14933_v56  ;;  %vm14643_vm2 = vcmp.eq.s32.totalorder %v10722_v25, %v9362_v3  ;;  %vm14645_vm4 = vcmp.eq.s32.totalorder %v10774_v24, %v9494_v45  ;;  %v10875_v0 = vrot.slane %v543_v7, %v9476_v39 }
  0xde   : > { %4774 = vmatprep.mubr.f32.mxu0 %v14934_v8  ;;  %4851 = vmatprep.mubr.f32.mxu1 %v14934_v8  ;;  %14972 = vst [vmem:[#allocation65_spill] sm:$0xff] %v10868_v52  ;;  %v10878_v25 = vrot.slane %v543_v7, %v9479_v40 }
  0xdf   : > { %8724 = vmatmul.mubr.msk.f32.gmra.mxu0 %vm1827_vm8, %v9600_v60  ;;  %8730 = vmatmul.mubr.msk.f32.gmra.mxu1 %vm1827_vm8, %v9600_v60  ;;  %14973 = vst [vmem:[#allocation66_spill] sm:$0xff] %v10875_v0 }
  0xe0   : > { %8733 = vmatprep.subr.msk.mxu0 %vm14640_vm7, %v14933_v56  ;;  %8739 = vmatprep.subr.msk.mxu1 %vm14641_vm0, %v14933_v56  ;;  %vm14648_vm7 = vcmp.eq.s32.totalorder %v10777_v28, %v9494_v45  ;;  %vm14654_vm0 = vcmp.eq.s32.totalorder %v10801_v30, %v9494_v45  ;;  %14974 = vst [vmem:[#allocation67_spill] sm:$0xff] %v10878_v25 }
  0xe1   : > { %8734 = vmatpush1.msk.msra.mxu0 %vm14642_vm3, %v14933_v56  ;;  %8740 = vmatpush1.msk.msra.mxu1 %vm14643_vm2, %v14933_v56  ;;  %vm14653_vm3 = vcmp.eq.s32.totalorder %v10804_v51, %v9494_v45  ;;  %vm14656_vm2 = vcmp.eq.s32.totalorder %v10774_v24, %v9362_v3  ;;  %v10939_v28 = vrot.slane %v543_v7, %v9482_v41 }
  0xe2   : > { %5002 = vmatprep.mubr.f32.mxu0 %v14934_v8  ;;  %5079 = vmatprep.mubr.f32.mxu1 %v14934_v8  ;;  %v10942_v24 = vrot.slane %v543_v7, %v9485_v42 }
  0xe3   : > { %8735 = vmatmul.mubr.msk.f32.vlgmr.msra.gmra.mxu0 %vm1827_vm8, %v9560_v58  ;;  %8741 = vmatmul.mubr.msk.f32.vlgmr.msra.gmra.mxu1 %vm1827_vm8, %v9560_v58  ;;  %v10865_v58 = vrot.slane %v543_v7, %v9467_v34  ;;  %14975 = vst [vmem:[#allocation68_spill] sm:$0xff] %v10939_v28 }
  0xe4   : > { %8743 = vmatprep.subr.msk.mxu0 %vm14645_vm4, %v14933_v56  ;;  %8749 = vmatprep.subr.msk.mxu1 %vm14648_vm7, %v14933_v56  ;;  %vm14658_vm4 = vcmp.eq.s32.totalorder %v10801_v30, %v9362_v3  ;;  %vm14657_vm7 = vcmp.eq.s32.totalorder %v10804_v51, %v9362_v3  ;;  %14976 = vst [vmem:[#allocation69_spill] sm:$0xff] %v10942_v24 }
  0xe5   : > { %8744 = vmatpush1.msk.msra.mxu0 %vm14654_vm0, %v14933_v56  ;;  %8750 = vmatpush1.msk.msra.mxu1 %vm14653_vm3, %v14933_v56  ;;  %14971 = vst [vmem:[#allocation64_spill] sm:$0xff] %v10865_v58  ;;  %vm14664_vm3 = vcmp.eq.s32.totalorder %v10865_v58, %v9494_v45  ;;  %vm14659_vm0 = vcmp.eq.s32.totalorder %v10868_v52, %v9494_v45 }
  0xe6   : > { %5008 = vmatprep.mubr.f32.mxu0 %v14934_v8  ;;  %5085 = vmatprep.mubr.f32.mxu1 %v14934_v8  ;;  %v10949_v51 = vrot.slane %v543_v7, %v9488_v43  ;;  %v10952_v30 = vrot.slane %v543_v7, %v9491_v44  ;;  %v9032_v7 = vld [vmem:[%s9387_s23 + $0x70] sm:$0xff] }
  0xe7   : > { %8736 = vmatmul.mubr.msk.f32.gmra.mxu0 %vm1827_vm8, %v9600_v60  ;;  %8742 = vmatmul.mubr.msk.f32.gmra.mxu1 %vm1827_vm8, %v9600_v60  ;;  %v10910_v60 = vld [vmem:[#allocation5] sm:$0xff]  ;;  %v418_v57 = vcombine.high %v9032_v7, %v9033_v59  ;;  %v11003_v59 = vrot.slane %v412_v55, %v9367_v6  ;;  %v11120_v7 = vsel %vm1078_vm10, 1.0, %v14934_v8  ;;  %vm14986_vm10 = vcmp.eq.s32.totalorder %v9699_v13, %v9362_v3 }
  0xe8   : > { %8745 = vmatprep.subr.msk.mxu0 %vm14656_vm2, %v14933_v56  ;;  %8751 = vmatprep.subr.msk.mxu1 %vm14655_vm5, %v14933_v56  ;;  %vm14694_vm5 = vcmp.eq.s32.totalorder %v10875_v0, %v9494_v45  ;;  %vm14693_vm2 = vcmp.eq.s32.totalorder %v10878_v25, %v9494_v45  ;;  %14977 = vst [vmem:[#allocation70_spill] sm:$0xff] %v10949_v51  ;;  %14978 = vst [vmem:[#allocation71_spill] sm:$0xff] %v10952_v30 }
  0xe9   : > { %8746 = vmatpush1.msk.msra.mxu0 %vm14658_vm4, %v14933_v56  ;;  %8752 = vmatpush1.msk.msra.mxu1 %vm14657_vm7, %v14933_v56  ;;  %vm14696_vm7 = vcmp.eq.s32.totalorder %v10865_v58, %v9362_v3  ;;  %vm14695_vm4 = vcmp.eq.s32.totalorder %v10868_v52, %v9362_v3  ;;  %v11024_v55 = vrot.slane %v418_v57, %v9367_v6  ;;  %v11218_v58 = vsel %vm14991_vm15, 1.0, %v14934_v8 }
  0xea   : > { %5156 = vmatprep.mubr.f32.mxu0 %v14934_v8  ;;  %5233 = vmatprep.mubr.f32.mxu1 %v14934_v8  ;;  %v11042_v57 = vrot.slane %v10990_v50, %v9473_v38  ;;  %v11206_v52 = vrot.slane %v11070_v35, %v9467_v34  ;;  %vm14994_vm15 = vcmp.eq.s32.totalorder %v9702_v16, %v9494_v45 }
  0xeb   : > { %8747 = vmatmul.mubr.msk.f32.vlgmr.msra.gmra.mxu0 %vm1827_vm8, %v10910_v60  ;;  %8753 = vmatmul.mubr.msk.f32.vlgmr.msra.gmra.mxu1 %vm1827_vm8, %v10910_v60  ;;  %v11278_v16 = vrot.slane %v11070_v35, %v9473_v38 }
  0xec   : > { %8755 = vmatprep.subr.msk.mxu0 %vm14664_vm3, %v14933_v56  ;;  %8761 = vmatprep.subr.msk.mxu1 %vm14659_vm0, %v14933_v56  ;;  %vm14698_vm0 = vcmp.eq.s32.totalorder %v10875_v0, %v9362_v3  ;;  %vm14697_vm3 = vcmp.eq.s32.totalorder %v10878_v25, %v9362_v3  ;;  %14980 = vst [vmem:[#allocation73_spill] sm:$0xff] %v11042_v57  ;;  %14989 = vst [vmem:[#allocation80_spill] sm:$0xff] %v11206_v52 }
  0xed   : > { %8756 = vmatpush1.msk.msra.mxu0 %vm14694_vm5, %v14933_v56  ;;  %8762 = vmatpush1.msk.msra.mxu1 %vm14693_vm2, %v14933_v56  ;;  %vm14700_vm2 = vcmp.eq.s32.totalorder %v10939_v28, %v9494_v45  ;;  %vm14699_vm5 = vcmp.eq.s32.totalorder %v10942_v24, %v9494_v45  ;;  %vm14725_vm9 = vcmp.eq.s32.totalorder %v11042_v57, %v9362_v3 }
  0xee   : > { %5162 = vmatprep.mubr.f32.mxu0 %v14934_v8  ;;  %5239 = vmatprep.mubr.f32.mxu1 %v14934_v8  ;;  %15000 = vst [vmem:[#allocation85_spill] sm:$0xff] %v11278_v16  ;;  %v478_v0 = vcombine.high %v11003_v59, %v11006_v53 }
  0xef   : > { %8748 = vmatmul.mubr.msk.f32.gmra.mxu0 %vm1827_vm8, %v10954_v26  ;;  %8754 = vmatmul.mubr.msk.f32.gmra.mxu1 %vm1827_vm8, %v10954_v26 }
  0xf0   : > { %8757 = vmatprep.subr.msk.mxu0 %vm14696_vm7, %v14933_v56  ;;  %8763 = vmatprep.subr.msk.mxu1 %vm14695_vm4, %v14933_v56  ;;  %vm14702_vm4 = vcmp.eq.s32.totalorder %v10949_v51, %v9494_v45  ;;  %vm14701_vm7 = vcmp.eq.s32.totalorder %v10952_v30, %v9494_v45 }
  0xf1   : > { %8758 = vmatpush1.msk.msra.mxu0 %vm14698_vm0, %v14933_v56  ;;  %8764 = vmatpush1.msk.msra.mxu1 %vm14697_vm3, %v14933_v56  ;;  %vm14704_vm3 = vcmp.eq.s32.totalorder %v10939_v28, %v9362_v3  ;;  %vm14703_vm0 = vcmp.eq.s32.totalorder %v10942_v24, %v9362_v3  ;;  %v11158_v24 = vsel %vm1086_vm12, 1.0, %v14934_v8  ;;  %v11182_v28 = vsel %vm14986_vm10, 1.0, %v14934_v8 }
  0xf2   : > { %5390 = vmatprep.mubr.f32.mxu0 %v14934_v8  ;;  %5467 = vmatprep.mubr.f32.mxu1 %v14934_v8  ;;  %vm14743_vm12 = vcmp.eq.s32.totalorder %v11054_v17, %v9362_v3  ;;  %vm14992_vm10 = vcmp.eq.s32.totalorder %v9699_v13, %v9494_v45  ;;  %v11242_v13 = vsel %vm14994_vm15, 1.0, %v14934_v8  ;;  %vm14735_vm15 = vcmp.eq.s32.totalorder %v11172_v61, %v9494_v45 }
  0xf3   : > { %8759 = vmatmul.mubr.msk.f32.vlgmr.msra.gmra.mxu0 %vm1827_vm8, %v10910_v60  ;;  %8765 = vmatmul.mubr.msk.f32.vlgmr.msra.gmra.mxu1 %vm1827_vm8, %v10910_v60  ;;  %v11224_v25 = vsel %vm14992_vm10, 1.0, %v14934_v8  ;;  %14995 = vst [vmem:[#allocation82_spill] sm:$0xff] %v11242_v13  ;;  %vm14996_vm10 = vcmp.eq.s32.totalorder %v9675_v2, %v9494_v45 }
  0xf4   : > { %8767 = vmatprep.subr.msk.mxu0 %vm14700_vm2, %v14933_v56  ;;  %8773 = vmatprep.subr.msk.mxu1 %vm14699_vm5, %v14933_v56  ;;  %vm14750_vm5 = vcmp.eq.s32.totalorder %v10949_v51, %v9362_v3  ;;  %vm14745_vm2 = vcmp.eq.s32.totalorder %v10952_v30, %v9362_v3  ;;  %v11192_v30 = vrot.slane %v10990_v50, %v9491_v44  ;;  %v11198_v51 = vsel %vm14988_vm13, 1.0, %v14934_v8 }
  0xf5   : > { %8768 = vmatpush1.msk.msra.mxu0 %vm14702_vm4, %v14933_v56  ;;  %8774 = vmatpush1.msk.msra.mxu1 %vm14701_vm7, %v14933_v56  ;;  %vm14722_vm7 = vcmp.eq.s32.totalorder %v11038_v49, %v9494_v45  ;;  %vm14721_vm4 = vcmp.eq.s32.totalorder %v11042_v57, %v9494_v45  ;;  %v11212_v50 = vsel %vm14990_vm14, 1.0, %v14934_v8  ;;  %14993 = vst [vmem:[#allocation81_spill] sm:$0xff] %v11224_v25  ;;  %v11248_v49 = vsel %vm14996_vm10, 1.0, %v14934_v8 }
  0xf6   : > { %5396 = vmatprep.mubr.f32.mxu0 %v14934_v8  ;;  %5473 = vmatprep.mubr.f32.mxu1 %v14934_v8  ;;  %14987 = vst [vmem:[#allocation79_spill] sm:$0xff] %v11192_v30  ;;  %vm14736_vm13 = vcmp.eq.s32.totalorder %v11146_v63, %v9494_v45  ;;  %vm14740_vm14 = vcmp.eq.s32.totalorder %v11146_v63, %v9362_v3  ;;  %14997 = vst [vmem:[#allocation83_spill] sm:$0xff] %v11248_v49 }
  0xf7   : > { %8760 = vmatmul.mubr.msk.f32.gmra.mxu0 %vm1827_vm8, %v10954_v26  ;;  %8766 = vmatmul.mubr.msk.f32.gmra.mxu1 %vm1827_vm8, %v10954_v26  ;;  %vm14739_vm10 = vcmp.eq.s32.totalorder %v11172_v61, %v9362_v3  ;;  %v11296_v57 = vrot.slane %v11070_v35, %v9476_v39 }
  0xf8   : > { %8769 = vmatprep.subr.msk.mxu0 %vm14704_vm3, %v14933_v56  ;;  %8775 = vmatprep.subr.msk.mxu1 %vm14703_vm0, %v14933_v56  ;;  %vm14724_vm0 = vcmp.eq.s32.totalorder %v11050_v4, %v9494_v45  ;;  %vm14723_vm3 = vcmp.eq.s32.totalorder %v11054_v17, %v9494_v45  ;;  %v11314_v4 = vrot.slane %v11070_v35, %v9479_v40 }
  0xf9   : > { %8770 = vmatpush1.msk.msra.mxu0 %vm14750_vm5, %v14933_v56  ;;  %8776 = vmatpush1.msk.msra.mxu1 %vm14745_vm2, %v14933_v56  ;;  %15003 = vst [vmem:[#allocation87_spill] sm:$0xff] %v11296_v57  ;;  %vm15026_vm5 = vcmp.eq.s32.totalorder %v9838_v31, %v9362_v3 }
  0xfa   : > { %5544 = vmatprep.mubr.f32.mxu0 %v14934_v8  ;;  %5621 = vmatprep.mubr.f32.mxu1 %v14934_v8  ;;  %15006 = vst [vmem:[#allocation89_spill] sm:$0xff] %v11314_v4  ;;  %v11476_v63 = vsel %vm15026_vm5, 1.0, %v14934_v8 }
  0xfb   : > { %8771 = vmatmul.mubr.msk.f32.vlgmr.msra.gmra.mxu0 %vm1827_vm8, %v10910_v60  ;;  %8777 = vmatmul.mubr.msk.f32.vlgmr.msra.gmra.mxu1 %vm1827_vm8, %v10910_v60  ;;  %15027 = vst [vmem:[#allocation98_spill] sm:$0xff] %v11476_v63 }
  0xfc   : > { %8779 = vmatprep.subr.msk.mxu0 %vm14722_vm7, %v14933_v56  ;;  %8785 = vmatprep.subr.msk.mxu1 %vm14721_vm4, %v14933_v56  ;;  %vm14738_vm4 = vcmp.eq.s32.totalorder %v11176_v62, %v9494_v45  ;;  %vm14998_vm7 = vcmp.eq.s32.totalorder %v9678_v5, %v9494_v45 }
  0xfd   : > { %8780 = vmatpush1.msk.msra.mxu0 %vm14724_vm0, %v14933_v56  ;;  %8786 = vmatpush1.msk.msra.mxu1 %vm14723_vm3, %v14933_v56  ;;  %v11268_v2 = vsel %vm14998_vm7, 1.0, %v14934_v8  ;;  %vm14737_vm3 = vcmp.eq.s32.totalorder %v11192_v30, %v9494_v45  ;;  %vm14742_vm0 = vcmp.eq.s32.totalorder %v11176_v62, %v9362_v3  ;;  %vm14741_vm7 = vcmp.eq.s32.totalorder %v11192_v30, %v9362_v3 }
  0xfe   : > { %5550 = vmatprep.mubr.f32.mxu0 %v14934_v8  ;;  %5627 = vmatprep.mubr.f32.mxu1 %v14934_v8  ;;  %14999 = vst [vmem:[#allocation84_spill] sm:$0xff] %v11268_v2  ;;  %v15009_v2 = vcombine.low %v11003_v59, %v11006_v53  ;;  %v11358_v59 = vrot.slane %v11070_v35, %v9482_v41 }
  0xff   : > { %8772 = vmatmul.mubr.msk.f32.gmra.mxu0 %vm1827_vm8, %v10954_v26  ;;  %8778 = vmatmul.mubr.msk.f32.gmra.mxu1 %vm1827_vm8, %v10954_v26 }
 0x100   : > { %8781 = vmatprep.subr.msk.mxu0 %vm14726_vm1, %v14933_v56  ;;  %8787 = vmatprep.subr.msk.mxu1 %vm14725_vm9, %v14933_v56  ;;  %vm15001_vm9 = vcmp.eq.s32.totalorder %v9773_v22, %v9362_v3  ;;  %vm14755_vm1 = vcmp.eq.s32.totalorder %v11206_v52, %v9494_v45  ;;  %v496_v49 = vrot.slane %v15009_v2, %v9367_v6 }
 0x101   : > { %8782 = vmatpush1.msk.msra.mxu0 %vm14744_vm11, %v14933_v56  ;;  %8788 = vmatpush1.msk.msra.mxu1 %vm14743_vm12, %v14933_v56  ;;  %v11284_v5 = vsel %vm15001_vm9, 1.0, %v14934_v8  ;;  %vm15004_vm9 = vcmp.eq.s32.totalorder %v9776_v23, %v9362_v3  ;;  %15012 = vst [vmem:[#allocation91_spill] sm:$0xff] %v11358_v59  ;;  %v11380_v2 = vrot.slane %v11070_v35, %v9491_v44 }
 0x102   : > { %5778 = vmatprep.mubr.f32.mxu0 %v14934_v8  ;;  %5855 = vmatprep.mubr.f32.mxu1 %v14934_v8  ;;  %15002 = vst [vmem:[#allocation86_spill] sm:$0xff] %v11284_v5  ;;  %v11302_v17 = vsel %vm15004_vm9, 1.0, %v14934_v8  ;;  %vm15007_vm9 = vcmp.eq.s32.totalorder %v9763_v18, %v9362_v3  ;;  %vm15020_vm12 = vcmp.eq.s32.totalorder %v9845_v32, %v9362_v3 }
 0x103   : > { %8783 = vmatmul.mubr.msk.f32.vlgmr.msra.gmra.mxu0 %vm1827_vm8, %v10910_v60  ;;  %8789 = vmatmul.mubr.msk.f32.vlgmr.msra.gmra.mxu1 %vm1827_vm8, %v10910_v60  ;;  %15005 = vst [vmem:[#allocation88_spill] sm:$0xff] %v11302_v17  ;;  %v482_v17 = vcombine.high %v11009_v11, %v11024_v55  ;;  %v11324_v5 = vsel %vm15007_vm9, 1.0, %v14934_v8  ;;  %vm15011_vm9 = vcmp.eq.s32.totalorder %v9766_v19, %v9362_v3  ;;  %15016 = vst [vmem:[#allocation94_spill] sm:$0xff] %v11380_v2 }
 0x104   : > { %8791 = vmatprep.subr.msk.mxu0 %vm14736_vm13, %v14933_v56  ;;  %8797 = vmatprep.subr.msk.mxu1 %vm14735_vm15, %v14933_v56  ;;  %15008 = vst [vmem:[#allocation90_spill] sm:$0xff] %v11324_v5  ;;  %vm14770_vm15 = vcmp.eq.s32.totalorder %v11206_v52, %v9362_v3  ;;  %v15010_v5 = vcombine.low %v11009_v11, %v11024_v55  ;;  %v11348_v25 = vsel %vm15011_vm9, 1.0, %v14934_v8 }
 0x105   : > { %8792 = vmatpush1.msk.msra.mxu0 %vm14738_vm4, %v14933_v56  ;;  %8798 = vmatpush1.msk.msra.mxu1 %vm14737_vm3, %v14933_v56  ;;  %vm14758_vm13 = vcmp.eq.s32.totalorder %v11278_v16, %v9494_v45  ;;  %vm14763_vm3 = vcmp.eq.s32.totalorder %v11278_v16, %v9362_v3  ;;  %vm15013_vm4 = vcmp.eq.s32.totalorder %v9773_v22, %v9494_v45 }
 0x106   : > { %v524_v13 = vrot.slane %v15010_v5, %v9367_v6  ;;  %5784 = vmatprep.mubr.f32.mxu0 %v14934_v8  ;;  %5861 = vmatprep.mubr.f32.mxu1 %v14934_v8  ;;  %v11364_v53 = vsel %vm15013_vm4, 1.0, %v14934_v8  ;;  %v11372_v11 = vrot.slane %v11070_v35, %v9485_v42  ;;  %v11376_v55 = vrot.slane %v11070_v35, %v9488_v43 }
 0x107   : > { %8784 = vmatmul.mubr.msk.f32.gmra.mxu0 %vm1827_vm8, %v10954_v26  ;;  %8790 = vmatmul.mubr.msk.f32.gmra.mxu1 %vm1827_vm8, %v10954_v26  ;;  %vm15017_vm4 = vcmp.eq.s32.totalorder %v9776_v23, %v9494_v45  ;;  %vm14760_vm9 = vcmp.eq.s32.totalorder %v11296_v57, %v9494_v45  ;;  %v11399_v35 = vrot.slane %v478_v0, %v9367_v6 }
 0x108   : > { %15014 = vst [vmem:[#allocation92_spill] sm:$0xff] %v11372_v11  ;;  %15015 = vst [vmem:[#allocation93_spill] sm:$0xff] %v11376_v55  ;;  %v11386_v22 = vsel %vm15017_vm4, 1.0, %v14934_v8  ;;  %8793 = vmatprep.subr.msk.mxu0 %vm14740_vm14, %v14933_v56  ;;  %8799 = vmatprep.subr.msk.mxu1 %vm14739_vm10, %v14933_v56  ;;  %v11402_v23 = vrot.slane %v482_v17, %v9367_v6  ;;  %vm15018_vm4 = vcmp.eq.s32.totalorder %v9763_v18, %v9494_v45 }
 0x109   : > { %v11408_v5 = vsel %vm15018_vm4, 1.0, %v14934_v8  ;;  %8794 = vmatpush1.msk.msra.mxu0 %vm14742_vm0, %v14933_v56  ;;  %8800 = vmatpush1.msk.msra.mxu1 %vm14741_vm7, %v14933_v56  ;;  %vm14759_vm10 = vcmp.eq.s32.totalorder %v11314_v4, %v9494_v45  ;;  %vm14772_vm14 = vcmp.eq.s32.totalorder %v11296_v57, %v9362_v3  ;;  %v541_v0 = vcombine.low %v496_v49, %v524_v13 }
 0x10a   : > { %vm15019_vm4 = vcmp.eq.s32.totalorder %v9766_v19, %v9494_v45  ;;  %5932 = vmatprep.mubr.f32.mxu0 %v14934_v8  ;;  %6009 = vmatprep.mubr.f32.mxu1 %v14934_v8  ;;  %vm14771_vm7 = vcmp.eq.s32.totalorder %v11314_v4, %v9362_v3  ;;  %vm14775_vm0 = vcmp.eq.s32.totalorder %v11358_v59, %v9494_v45  ;;  %v11438_v17 = vsel %vm15020_vm12, 1.0, %v14934_v8 }
 0x10b   : > { %v11426_v18 = vsel %vm15019_vm4, 1.0, %v14934_v8  ;;  %15021 = vst [vmem:[#allocation95_spill] sm:$0xff] %v11438_v17  ;;  %vm15022_vm4 = vcmp.eq.s32.totalorder %v9848_v33, %v9362_v3  ;;  %8795 = vmatmul.mubr.msk.f32.vlgmr.msra.gmra.mxu0 %vm1827_vm8, %v10910_v60  ;;  %8801 = vmatmul.mubr.msk.f32.vlgmr.msra.gmra.mxu1 %vm1827_vm8, %v10910_v60  ;;  %vm14774_vm11 = vcmp.eq.s32.totalorder %v11372_v11, %v9494_v45 }
 0x10c   : > { %v11444_v19 = vsel %vm15022_vm4, 1.0, %v14934_v8  ;;  %vm14780_vm2 = vcmp.eq.s32.totalorder %v11376_v55, %v9494_v45  ;;  %vm14776_vm12 = vcmp.eq.s32.totalorder %v11380_v2, %v9494_v45  ;;  %vm15024_vm4 = vcmp.eq.s32.totalorder %v9835_v27, %v9362_v3  ;;  %8803 = vmatprep.subr.msk.mxu0 %vm14755_vm1, %v14933_v56  ;;  %8809 = vmatprep.subr.msk.mxu1 %vm14758_vm13, %v14933_v56 }
 0x10d   : > { %15023 = vst [vmem:[#allocation96_spill] sm:$0xff] %v11444_v19  ;;  %v11460_v6 = vsel %vm15024_vm4, 1.0, %v14934_v8  ;;  %v545_v61 = vcombine.low %v11399_v35, %v11402_v23  ;;  %vm15028_vm4 = vcmp.eq.s32.totalorder %v9845_v32, %v9494_v45  ;;  %vm15030_vm1 = vcmp.eq.s32.totalorder %v9848_v33, %v9494_v45  ;;  %8804 = vmatpush1.msk.msra.mxu0 %vm14760_vm9, %v14933_v56 }
 0x10e   : > { %15025 = vst [vmem:[#allocation97_spill] sm:$0xff] %v11460_v6  ;;  %v11482_v30 = vsel %vm15028_vm4, 1.0, %v14934_v8  ;;  %v11488_v62 = vsel %vm15030_vm1, 1.0, %v14934_v8  ;;  %8810 = vmatpush1.msk.msra.mxu1 %vm14759_vm10, %v14933_v56  ;;  %vm14788_vm5 = vcmp.eq.s32.totalorder %v11358_v59, %v9362_v3  ;;  %vm14787_vm4 = vcmp.eq.s32.totalorder %v11372_v11, %v9362_v3  ;;  %5938 = vmatprep.mubr.f32.mxu0 %v14934_v8  ;;  %v15095_v59 = vld [vmem:[#allocation27_spill] sm:$0xff] }
 0x10f   : > { %15029 = vst [vmem:[#allocation99_spill] sm:$0xff] %v11482_v30  ;;  %15031 = vst [vmem:[#allocation100_spill] sm:$0xff] %v11488_v62  ;;  %v11503_v32 = vrot.slane %v541_v0, %v9467_v34  ;;  %v11506_v33 = vrot.slane %v541_v0, %v9473_v38  ;;  %v11508_v62 = vcombine.high %v496_v49, %v524_v13  ;;  %6015 = vmatprep.mubr.f32.mxu1 %v14934_v8 }
 0x110   : > { %vm15034_vm1 = vcmp.eq.s32.totalorder %v9835_v27, %v9494_v45  ;;  %vm14790_vm13 = vcmp.eq.s32.totalorder %v11376_v55, %v9362_v3  ;;  %vm14789_vm10 = vcmp.eq.s32.totalorder %v11380_v2, %v9362_v3  ;;  %v11523_v63 = vrot.slane %v541_v0, %v9476_v39  ;;  %8796 = vmatmul.mubr.msk.f32.gmra.mxu0 %vm1827_vm8, %v10954_v26  ;;  %v15101_v55 = vld [vmem:[#allocation25_spill] sm:$0xff] }
 0x111   : > { %15032 = vst [vmem:[#allocation101_spill] sm:$0xff] %v11503_v32  ;;  %15033 = vst [vmem:[#allocation102_spill] sm:$0xff] %v11506_v33  ;;  %v11514_v30 = vsel %vm15034_vm1, 1.0, %v14934_v8  ;;  %v11526_v49 = vrot.slane %v541_v0, %v9479_v40  ;;  %v11529_v27 = vrot.slane %v541_v0, %v9482_v41  ;;  %vm15039_vm1 = vcmp.eq.s32.totalorder %v9838_v31, %v9494_v45 }
 0x112   : > { %15035 = vst [vmem:[#allocation103_spill] sm:$0xff] %v11514_v30  ;;  %15036 = vst [vmem:[#allocation104_spill] sm:$0xff] %v11523_v63  ;;  %v11535_v13 = vsel %vm15039_vm1, 1.0, %v14934_v8  ;;  %8802 = vmatmul.mubr.msk.f32.gmra.mxu1 %vm1827_vm8, %v10954_v26  ;;  %v11542_v30 = vrot.slane %v541_v0, %v9485_v42  ;;  %v11545_v6 = vrot.slane %v541_v0, %v9488_v43  ;;  %8805 = vmatprep.subr.msk.mxu0 %vm14770_vm15, %v14933_v56 }
 0x113   : > { %15037 = vst [vmem:[#allocation105_spill] sm:$0xff] %v11526_v49  ;;  %15038 = vst [vmem:[#allocation106_spill] sm:$0xff] %v11529_v27  ;;  %vm15043_vm9 = vcmp.eq.s32.totalorder %v9939_v15, %v9362_v3  ;;  %vm15045_vm1 = vcmp.eq.s32.totalorder %v9942_v47, %v9362_v3  ;;  %8811 = vmatprep.subr.msk.mxu1 %vm14763_vm3, %v14933_v56  ;;  %8806 = vmatpush1.msk.msra.mxu0 %vm14772_vm14, %v14933_v56 }
 0x114   : > { %15040 = vst [vmem:[#allocation107_spill] sm:$0xff] %v11535_v13  ;;  %15041 = vst [vmem:[#allocation108_spill] sm:$0xff] %v11542_v30  ;;  %v11551_v19 = vsel %vm15043_vm9, 1.0, %v14934_v8  ;;  %v11557_v31 = vsel %vm15045_vm1, 1.0, %v14934_v8  ;;  %v11568_v13 = vrot.slane %v541_v0, %v9491_v44  ;;  %vm15049_vm9 = vcmp.eq.s32.totalorder %v9929_v12, %v9362_v3  ;;  %8812 = vmatpush1.msk.msra.mxu1 %vm14771_vm7, %v14933_v56 }
 0x115   : > { %15042 = vst [vmem:[#allocation109_spill] sm:$0xff] %v11545_v6  ;;  %15044 = vst [vmem:[#allocation110_spill] sm:$0xff] %v11551_v19  ;;  %v11571_v19 = vrot.slane %v545_v61, %v9467_v34  ;;  %vm15051_vm1 = vcmp.eq.s32.totalorder %v9932_v14, %v9362_v3  ;;  %vm14791_vm3 = vcmp.eq.s32.totalorder %v11506_v33, %v9494_v45  ;;  %6166 = vmatprep.mubr.f32.mxu0 %v14934_v8 }
 0x116   : > { %15046 = vst [vmem:[#allocation111_spill] sm:$0xff] %v11557_v31  ;;  %15047 = vst [vmem:[#allocation112_spill] sm:$0xff] %v11568_v13  ;;  %v11577_v31 = vsel %vm15049_vm9, 1.0, %v14934_v8  ;;  %v11583_v52 = vsel %vm15051_vm1, 1.0, %v14934_v8  ;;  %vm14792_vm9 = vcmp.eq.s32.totalorder %v11503_v32, %v9494_v45  ;;  %v11598_v0 = vrot.slane %v545_v61, %v9473_v38  ;;  %6243 = vmatprep.mubr.f32.mxu1 %v14934_v8 }
 0x117   : > { %15048 = vst [vmem:[#allocation113_spill] sm:$0xff] %v11571_v19  ;;  %15050 = vst [vmem:[#allocation114_spill] sm:$0xff] %v11577_v31  ;;  %v11601_v16 = vrot.slane %v545_v61, %v9476_v39  ;;  %v11604_v57 = vrot.slane %v545_v61, %v9479_v40  ;;  %vm15056_vm1 = vcmp.eq.s32.totalorder %v9939_v15, %v9494_v45  ;;  %v11637_v31 = vsel %vm15063_vm6, 1.0, %v14934_v8 }
 0x118   : > { %15052 = vst [vmem:[#allocation115_spill] sm:$0xff] %v11583_v52  ;;  %15053 = vst [vmem:[#allocation116_spill] sm:$0xff] %v11598_v0  ;;  %v11610_v4 = vsel %vm15056_vm1, 1.0, %v14934_v8  ;;  %vm14794_vm15 = vcmp.eq.s32.totalorder %v11523_v63, %v9494_v45  ;;  %vm14793_vm7 = vcmp.eq.s32.totalorder %v11526_v49, %v9494_v45  ;;  %v11619_v52 = vrot.slane %v545_v61, %v9482_v41 }
 0x119   : > { %15054 = vst [vmem:[#allocation117_spill] sm:$0xff] %v11601_v16  ;;  %15055 = vst [vmem:[#allocation118_spill] sm:$0xff] %v11604_v57  ;;  %vm15059_vm14 = vcmp.eq.s32.totalorder %v9942_v47, %v9494_v45  ;;  %vm15061_vm1 = vcmp.eq.s32.totalorder %v9929_v12, %v9494_v45  ;;  %8807 = vmatmul.mubr.msk.f32.vlgmr.msra.gmra.mxu0 %vm1827_vm8, %v10910_v60  ;;  %8813 = vmatmul.mubr.msk.f32.vlgmr.msra.gmra.mxu1 %vm1827_vm8, %v10910_v60 }
 0x11a   : > { %15057 = vst [vmem:[#allocation119_spill] sm:$0xff] %v11610_v4  ;;  %15058 = vst [vmem:[#allocation120_spill] sm:$0xff] %v11619_v52  ;;  %v11625_v15 = vsel %vm15059_vm14, 1.0, %v14934_v8  ;;  %v11631_v4 = vsel %vm15061_vm1, 1.0, %v14934_v8  ;;  %v11644_v47 = vrot.slane %v545_v61, %v9485_v42  ;;  %v11650_v12 = vrot.slane %v545_v61, %v9491_v44  ;;  %8815 = vmatprep.subr.msk.mxu0 %vm14775_vm0, %v14933_v56 }
 0x11b   : > { %15060 = vst [vmem:[#allocation121_spill] sm:$0xff] %v11625_v15  ;;  %15062 = vst [vmem:[#allocation122_spill] sm:$0xff] %v11631_v4  ;;  %v11647_v15 = vrot.slane %v545_v61, %v9488_v43  ;;  %vm15068_vm6 = vcmp.eq.s32.totalorder %v10021_v46, %v9362_v3  ;;  %8821 = vmatprep.subr.msk.mxu1 %vm14774_vm11, %v14933_v56  ;;  %v11668_v61 = vrot.slane %v11508_v62, %v9467_v34 }
 0x11c   : > { %15064 = vst [vmem:[#allocation123_spill] sm:$0xff] %v11637_v31  ;;  %15065 = vst [vmem:[#allocation124_spill] sm:$0xff] %v11644_v47  ;;  %v11656_v14 = vsel %vm15068_vm6, 1.0, %v14934_v8  ;;  %v11672_v31 = vrot.slane %v11508_v62, %v9473_v38  ;;  %vm15072_vm14 = vcmp.eq.s32.totalorder %v10024_v48, %v9362_v3  ;;  %v546_v4 = vcombine.high %v11399_v35, %v11402_v23 }
 0x11d   : > { %15066 = vst [vmem:[#allocation125_spill] sm:$0xff] %v11647_v15  ;;  %15067 = vst [vmem:[#allocation126_spill] sm:$0xff] %v11650_v12  ;;  %8816 = vmatpush1.msk.msra.mxu0 %vm14780_vm2, %v14933_v56  ;;  %8822 = vmatpush1.msk.msra.mxu1 %vm14776_vm12, %v14933_v56  ;;  %vm14804_vm1 = vcmp.eq.s32.totalorder %v11503_v32, %v9362_v3  ;;  %vm14803_vm6 = vcmp.eq.s32.totalorder %v11506_v33, %v9362_v3  ;;  %v15162_v32 = vld [vmem:[#allocation36_spill] sm:$0xff]  ;;  %v15165_v33 = vld [vmem:[#allocation37_spill] sm:$0xff] }
 0x11e   : > { %15069 = vst [vmem:[#allocation127_spill] sm:$0xff] %v11656_v14  ;;  %15070 = vst [vmem:[#allocation128_spill] sm:$0xff] %v11668_v61  ;;  %v11678_v14 = vsel %vm15072_vm14, 1.0, %v14934_v8  ;;  %vm15075_vm14 = vcmp.eq.s32.totalorder %v10011_v36, %v9362_v3  ;;  %vm15077_vm11 = vcmp.eq.s32.totalorder %v10014_v37, %v9362_v3  ;;  %vm15079_vm0 = vcmp.eq.s32.totalorder %v10021_v46, %v9494_v45 }
 0x11f   : > { %15071 = vst [vmem:[#allocation129_spill] sm:$0xff] %v11672_v31  ;;  %15073 = vst [vmem:[#allocation130_spill] sm:$0xff] %v11678_v14  ;;  %v11696_v14 = vrot.slane %v11508_v62, %v9476_v39  ;;  %v11702_v35 = vsel %vm15075_vm14, 1.0, %v14934_v8  ;;  %v11708_v23 = vsel %vm15077_vm11, 1.0, %v14934_v8  ;;  %v11714_v17 = vsel %vm15079_vm0, 1.0, %v14934_v8  ;;  %6172 = vmatprep.mubr.f32.mxu0 %v14934_v8  ;;  %6249 = vmatprep.mubr.f32.mxu1 %v14934_v8 }
 0x120   : > { %15076 = vst [vmem:[#allocation132_spill] sm:$0xff] %v11702_v35  ;;  %15078 = vst [vmem:[#allocation133_spill] sm:$0xff] %v11708_v23  ;;  %vm14806_vm14 = vcmp.eq.s32.totalorder %v11523_v63, %v9362_v3  ;;  %vm14805_vm12 = vcmp.eq.s32.totalorder %v11526_v49, %v9362_v3  ;;  %v11724_v35 = vrot.slane %v11508_v62, %v9479_v40  ;;  %8808 = vmatmul.mubr.msk.f32.gmra.mxu0 %vm1827_vm8, %v10954_v26 }
 0x121   : > { %15074 = vst [vmem:[#allocation131_spill] sm:$0xff] %v11696_v14  ;;  %15080 = vst [vmem:[#allocation134_spill] sm:$0xff] %v11714_v17  ;;  %v11728_v23 = vrot.slane %v11508_v62, %v9482_v41  ;;  %vm15083_vm0 = vcmp.eq.s32.totalorder %v10024_v48, %v9494_v45  ;;  %vm15085_vm11 = vcmp.eq.s32.totalorder %v10011_v36, %v9494_v45  ;;  %8814 = vmatmul.mubr.msk.f32.gmra.mxu1 %vm1827_vm8, %v10954_v26 }
 0x122   : > { %15081 = vst [vmem:[#allocation135_spill] sm:$0xff] %v11724_v35  ;;  %v11734_v46 = vsel %vm15083_vm0, 1.0, %v14934_v8  ;;  %v11740_v17 = vsel %vm15085_vm11, 1.0, %v14934_v8  ;;  %v11752_v48 = vrot.slane %v11508_v62, %v9488_v43  ;;  %vm15090_vm0 = vcmp.eq.s32.totalorder %v10014_v37, %v9494_v45  ;;  %8817 = vmatprep.subr.msk.mxu0 %vm14788_vm5, %v14933_v56  ;;  %8823 = vmatprep.subr.msk.mxu1 %vm14787_vm4, %v14933_v56 }
 0x123   : > { %15082 = vst [vmem:[#allocation136_spill] sm:$0xff] %v11728_v23  ;;  %15084 = vst [vmem:[#allocation137_spill] sm:$0xff] %v11734_v46  ;;  %v11748_v23 = vrot.slane %v11508_v62, %v9485_v42  ;;  %v11756_v46 = vrot.slane %v11508_v62, %v9491_v44  ;;  %v11762_v36 = vsel %vm15090_vm0, 1.0, %v14934_v8  ;;  %v11776_v62 = vrot.slane %v546_v4, %v9473_v38 }
 0x124   : > { %15086 = vst [vmem:[#allocation138_spill] sm:$0xff] %v11740_v17  ;;  %15088 = vst [vmem:[#allocation140_spill] sm:$0xff] %v11752_v48  ;;  %v11773_v17 = vrot.slane %v546_v4, %v9467_v34  ;;  %vm15094_vm11 = vcmp.eq.s32.totalorder %v10095_v54, %v9362_v3  ;;  %vm15096_vm0 = vcmp.eq.s32.totalorder %v15095_v59, %v9362_v3  ;;  %8818 = vmatpush1.msk.msra.mxu0 %vm14790_vm13, %v14933_v56 }
 0x125   : > { %15087 = vst [vmem:[#allocation139_spill] sm:$0xff] %v11748_v23  ;;  %15089 = vst [vmem:[#allocation141_spill] sm:$0xff] %v11756_v46  ;;  %v11782_v37 = vsel %vm15094_vm11, 1.0, %v14934_v8  ;;  %8824 = vmatpush1.msk.msra.mxu1 %vm14789_vm10, %v14933_v56  ;;  %vm14808_vm11 = vcmp.eq.s32.totalorder %v11529_v27, %v9494_v45  ;;  %vm14807_vm2 = vcmp.eq.s32.totalorder %v11542_v30, %v9494_v45  ;;  %6320 = vmatprep.mubr.f32.mxu0 %v14934_v8 }
 0x126   : > { %15091 = vst [vmem:[#allocation142_spill] sm:$0xff] %v11762_v36  ;;  %15092 = vst [vmem:[#allocation143_spill] sm:$0xff] %v11773_v17  ;;  %v11788_v36 = vsel %vm15096_vm0, 1.0, %v14934_v8  ;;  %v11803_v34 = vrot.slane %v546_v4, %v9476_v39  ;;  %v11806_v38 = vrot.slane %v546_v4, %v9479_v40  ;;  %v11809_v11 = vrot.slane %v546_v4, %v9482_v41  ;;  %v15105_v40 = vld [vmem:[#allocation26_spill] sm:$0xff] }
 0x127   : > { %15093 = vst [vmem:[#allocation144_spill] sm:$0xff] %v11776_v62  ;;  %15097 = vst [vmem:[#allocation27_spill] sm:$0xff] %v11788_v36  ;;  %vm15102_vm0 = vcmp.eq.s32.totalorder %v15101_v55, %v9362_v3  ;;  %6397 = vmatprep.mubr.f32.mxu1 %v14934_v8  ;;  %vm14810_vm4 = vcmp.eq.s32.totalorder %v11545_v6, %v9494_v45  ;;  %vm14809_vm5 = vcmp.eq.s32.totalorder %v11568_v13, %v9494_v45 }
 0x128   : > { %15098 = vst [vmem:[#allocation145_spill] sm:$0xff] %v11803_v34  ;;  %15099 = vst [vmem:[#allocation146_spill] sm:$0xff] %v11806_v38  ;;  %v11815_v2 = vsel %vm15102_vm0, 1.0, %v14934_v8  ;;  %v11824_v39 = vrot.slane %v546_v4, %v9485_v42  ;;  %vm15106_vm10 = vcmp.eq.s32.totalorder %v15105_v40, %v9362_v3  ;;  %vm15108_vm0 = vcmp.eq.s32.totalorder %v10095_v54, %v9494_v45 }
 0x129   : > { %15100 = vst [vmem:[#allocation147_spill] sm:$0xff] %v11809_v11  ;;  %15103 = vst [vmem:[#allocation25_spill] sm:$0xff] %v11815_v2  ;;  %v11830_v41 = vsel %vm15106_vm10, 1.0, %v14934_v8  ;;  %v11836_v2 = vsel %vm15108_vm0, 1.0, %v14934_v8  ;;  %vm15109_vm13 = vcmp.eq.s32.totalorder %v15095_v59, %v9494_v45  ;;  %8819 = vmatmul.mubr.msk.f32.vlgmr.msra.gmra.mxu0 %vm1827_vm8, %v10910_v60  ;;  %8825 = vmatmul.mubr.msk.f32.vlgmr.msra.gmra.mxu1 %vm1827_vm8, %v10910_v60 }
 0x12a   : > { %15104 = vst [vmem:[#allocation148_spill] sm:$0xff] %v11824_v39  ;;  %15107 = vst [vmem:[#allocation26_spill] sm:$0xff] %v11830_v41  ;;  %v11842_v36 = vsel %vm15109_vm13, 1.0, %v14934_v8  ;;  %v11849_v42 = vrot.slane %v546_v4, %v9488_v43  ;;  %v11852_v41 = vrot.slane %v546_v4, %v9491_v44  ;;  %vm15113_vm10 = vcmp.eq.s32.totalorder %v15101_v55, %v9494_v45  ;;  %v15117_v43 = vld [vmem:[#allocation30_spill] sm:$0xff]  ;;  %v15120_v4 = vld [vmem:[#allocation31_spill] sm:$0xff] }
 0x12b   : > { %15110 = vst [vmem:[#allocation149_spill] sm:$0xff] %v11842_v36  ;;  %v11858_v54 = vsel %vm15113_vm10, 1.0, %v14934_v8  ;;  %vm15115_vm13 = vcmp.eq.s32.totalorder %v15105_v40, %v9494_v45  ;;  %8827 = vmatprep.subr.msk.mxu0 %vm14792_vm9, %v14933_v56  ;;  %8833 = vmatprep.subr.msk.mxu1 %vm14791_vm3, %v14933_v56  ;;  %vm15118_vm0 = vcmp.eq.s32.totalorder %v15117_v43, %v9362_v3  ;;  %v15123_v40 = vld [vmem:[#allocation28_spill] sm:$0xff] }
 0x12c   : > { %15111 = vst [vmem:[#allocation150_spill] sm:$0xff] %v11849_v42  ;;  %15112 = vst [vmem:[#allocation151_spill] sm:$0xff] %v11852_v41  ;;  %v11864_v59 = vsel %vm15115_vm13, 1.0, %v14934_v8  ;;  %v11878_v44 = vsel %vm15118_vm0, 1.0, %v14934_v8  ;;  %vm15121_vm10 = vcmp.eq.s32.totalorder %v15120_v4, %v9362_v3  ;;  %vm15124_vm13 = vcmp.eq.s32.totalorder %v15123_v40, %v9362_v3  ;;  %8828 = vmatpush1.msk.msra.mxu0 %vm14794_vm15, %v14933_v56 }
 0x12d   : > { %15114 = vst [vmem:[#allocation152_spill] sm:$0xff] %v11858_v54  ;;  %15116 = vst [vmem:[#allocation153_spill] sm:$0xff] %v11864_v59  ;;  %v11884_v55 = vsel %vm15121_vm10, 1.0, %v14934_v8  ;;  %v11890_v59 = vsel %vm15124_vm13, 1.0, %v14934_v8  ;;  %v15126_v54 = vld [vmem:[#allocation29_spill] sm:$0xff]  ;;  %8834 = vmatpush1.msk.msra.mxu1 %vm14793_vm7, %v14933_v56  ;;  %vm14820_vm0 = vcmp.eq.s32.totalorder %v11529_v27, %v9362_v3  ;;  %vm14819_vm10 = vcmp.eq.s32.totalorder %v11542_v30, %v9362_v3  ;;  %v15236_v27 = vld [vmem:[#allocation55_spill] sm:$0xff] }
 0x12e   : > { %15119 = vst [vmem:[#allocation30_spill] sm:$0xff] %v11878_v44  ;;  %15122 = vst [vmem:[#allocation31_spill] sm:$0xff] %v11884_v55  ;;  %vm15127_vm3 = vcmp.eq.s32.totalorder %v15126_v54, %v9362_v3  ;;  %vm15131_vm13 = vcmp.eq.s32.totalorder %v15120_v4, %v9494_v45  ;;  %vm15133_vm9 = vcmp.eq.s32.totalorder %v15123_v40, %v9494_v45  ;;  %6326 = vmatprep.mubr.f32.mxu0 %v14934_v8 }
 0x12f   : > { %15125 = vst [vmem:[#allocation28_spill] sm:$0xff] %v11890_v59  ;;  %v11896_v36 = vsel %vm15127_vm3, 1.0, %v14934_v8  ;;  %vm15129_vm3 = vcmp.eq.s32.totalorder %v15117_v43, %v9494_v45  ;;  %v11920_v59 = vsel %vm15131_vm13, 1.0, %v14934_v8  ;;  %v11926_v55 = vsel %vm15133_vm9, 1.0, %v14934_v8  ;;  %6403 = vmatprep.mubr.f32.mxu1 %v14934_v8  ;;  %v15137_v43 = vld [vmem:[#allocation34_spill] sm:$0xff]  ;;  %8820 = vmatmul.mubr.msk.f32.gmra.mxu0 %vm1827_vm8, %v10954_v26 }
 0x130   : > { %15128 = vst [vmem:[#allocation29_spill] sm:$0xff] %v11896_v36  ;;  %v11914_v36 = vsel %vm15129_vm3, 1.0, %v14934_v8  ;;  %15132 = vst [vmem:[#allocation155_spill] sm:$0xff] %v11920_v59  ;;  %vm15135_vm7 = vcmp.eq.s32.totalorder %v15126_v54, %v9494_v45  ;;  %vm14821_vm3 = vcmp.eq.s32.totalorder %v11545_v6, %v9362_v3  ;;  %vm15138_vm9 = vcmp.eq.s32.totalorder %v15137_v43, %v9362_v3  ;;  %v15140_v54 = vld [vmem:[#allocation35_spill] sm:$0xff]  ;;  %v15146_v59 = vld [vmem:[#allocation33_spill] sm:$0xff] }
 0x131   : > { %15130 = vst [vmem:[#allocation154_spill] sm:$0xff] %v11914_v36  ;;  %15134 = vst [vmem:[#allocation156_spill] sm:$0xff] %v11926_v55  ;;  %v11932_v44 = vsel %vm15135_vm7, 1.0, %v14934_v8  ;;  %v11944_v4 = vsel %vm15138_vm9, 1.0, %v14934_v8  ;;  %vm15141_vm7 = vcmp.eq.s32.totalorder %v15140_v54, %v9362_v3  ;;  %vm15147_vm13 = vcmp.eq.s32.totalorder %v15146_v59, %v9362_v3  ;;  %8826 = vmatmul.mubr.msk.f32.gmra.mxu1 %vm1827_vm8, %v10954_v26 }
 0x132   : > { %15136 = vst [vmem:[#allocation157_spill] sm:$0xff] %v11932_v44  ;;  %15139 = vst [vmem:[#allocation34_spill] sm:$0xff] %v11944_v4  ;;  %v11950_v40 = vsel %vm15141_vm7, 1.0, %v14934_v8  ;;  %v15143_v44 = vld [vmem:[#allocation32_spill] sm:$0xff]  ;;  %v11962_v36 = vsel %vm15147_vm13, 1.0, %v14934_v8  ;;  %vm15149_vm9 = vcmp.eq.s32.totalorder %v15137_v43, %v9494_v45  ;;  %vm15154_vm7 = vcmp.eq.s32.totalorder %v15146_v59, %v9494_v45  ;;  %8829 = vmatprep.subr.msk.mxu0 %vm14804_vm1, %v14933_v56  ;;  %v15159_v59 = vld [vmem:[#allocation39_spill] sm:$0xff] }
 0x133   : > { %15142 = vst [vmem:[#allocation35_spill] sm:$0xff] %v11950_v40  ;;  %vm15144_vm15 = vcmp.eq.s32.totalorder %v15143_v44, %v9362_v3  ;;  %15148 = vst [vmem:[#allocation33_spill] sm:$0xff] %v11962_v36  ;;  %v11972_v40 = vsel %vm15149_vm9, 1.0, %v14934_v8  ;;  %vm15152_vm13 = vcmp.eq.s32.totalorder %v15143_v44, %v9494_v45  ;;  %v11990_v4 = vsel %vm15154_vm7, 1.0, %v14934_v8  ;;  %8835 = vmatprep.subr.msk.mxu1 %vm14803_vm6, %v14933_v56  ;;  %v15156_v44 = vld [vmem:[#allocation38_spill] sm:$0xff] }
 0x134   : > { %v11956_v55 = vsel %vm15144_vm15, 1.0, %v14934_v8  ;;  %vm15150_vm15 = vcmp.eq.s32.totalorder %v15140_v54, %v9494_v45  ;;  %v11984_v36 = vsel %vm15152_vm13, 1.0, %v14934_v8  ;;  %15155 = vst [vmem:[#allocation160_spill] sm:$0xff] %v11990_v4  ;;  %vm15157_vm9 = vcmp.eq.s32.totalorder %v15156_v44, %v9362_v3  ;;  %8830 = vmatpush1.msk.msra.mxu0 %vm14806_vm14, %v14933_v56  ;;  %8836 = vmatpush1.msk.msra.mxu1 %vm14805_vm12, %v14933_v56 }
 0x135   : > { %15145 = vst [vmem:[#allocation32_spill] sm:$0xff] %v11956_v55  ;;  %v11978_v55 = vsel %vm15150_vm15, 1.0, %v14934_v8  ;;  %15153 = vst [vmem:[#allocation159_spill] sm:$0xff] %v11984_v36  ;;  %v12004_v43 = vsel %vm15157_vm9, 1.0, %v14934_v8  ;;  %vm15160_vm15 = vcmp.eq.s32.totalorder %v15159_v59, %v9362_v3  ;;  %vm15163_vm13 = vcmp.eq.s32.totalorder %v15162_v32, %v9362_v3  ;;  %6554 = vmatprep.mubr.f32.mxu0 %v14934_v8 }
 0x136   : > { %15151 = vst [vmem:[#allocation158_spill] sm:$0xff] %v11978_v55  ;;  %15158 = vst [vmem:[#allocation38_spill] sm:$0xff] %v12004_v43  ;;  %v12010_v54 = vsel %vm15160_vm15, 1.0, %v14934_v8  ;;  %v12016_v4 = vsel %vm15163_vm13, 1.0, %v14934_v8  ;;  %vm15166_vm7 = vcmp.eq.s32.totalorder %v15165_v33, %v9362_v3  ;;  %vm14823_vm9 = vcmp.eq.s32.totalorder %v11571_v19, %v9494_v45  ;;  %6631 = vmatprep.mubr.f32.mxu1 %v14934_v8 }
 0x137   : > { %15161 = vst [vmem:[#allocation39_spill] sm:$0xff] %v12010_v54  ;;  %15164 = vst [vmem:[#allocation36_spill] sm:$0xff] %v12016_v4  ;;  %v12022_v36 = vsel %vm15166_vm7, 1.0, %v14934_v8  ;;  %vm15168_vm15 = vcmp.eq.s32.totalorder %v15156_v44, %v9494_v45  ;;  %vm15170_vm13 = vcmp.eq.s32.totalorder %v15159_v59, %v9494_v45  ;;  %vm15172_vm7 = vcmp.eq.s32.totalorder %v15162_v32, %v9494_v45  ;;  %v15176_v32 = vld [vmem:[#allocation42_spill] sm:$0xff]  ;;  %v1900_v54 = vpop.f32.mrf.mxu0 }
 0x138   : > { %15167 = vst [vmem:[#allocation37_spill] sm:$0xff] %v12022_v36  ;;  %v12038_v4 = vsel %vm15168_vm15, 1.0, %v14934_v8  ;;  %v12044_v63 = vsel %vm15170_vm13, 1.0, %v14934_v8  ;;  %v12050_v49 = vsel %vm15172_vm7, 1.0, %v14934_v8  ;;  %vm15174_vm6 = vcmp.eq.s32.totalorder %v15165_v33, %v9494_v45  ;;  %v15179_v33 = vld [vmem:[#allocation43_spill] sm:$0xff]  ;;  %8831 = vmatmul.mubr.msk.f32.vlgmr.msra.gmra.mxu0 %vm1827_vm8, %v10910_v60  ;;  %8837 = vmatmul.mubr.msk.f32.vlgmr.msra.gmra.mxu1 %vm1827_vm8, %v10910_v60 }
 0x139   : > { %15169 = vst [vmem:[#allocation161_spill] sm:$0xff] %v12038_v4  ;;  %15171 = vst [vmem:[#allocation162_spill] sm:$0xff] %v12044_v63  ;;  %v12056_v36 = vsel %vm15174_vm6, 1.0, %v14934_v8  ;;  %vm14822_vm15 = vcmp.eq.s32.totalorder %v11598_v0, %v9494_v45  ;;  %vm14833_vm13 = vcmp.eq.s32.totalorder %v11601_v16, %v9494_v45  ;;  %vm15177_vm7 = vcmp.eq.s32.totalorder %v15176_v32, %v9362_v3  ;;  %v15185_v63 = vld [vmem:[#allocation41_spill] sm:$0xff] }
 0x13a   : > { %15173 = vst [vmem:[#allocation163_spill] sm:$0xff] %v12050_v49  ;;  %15175 = vst [vmem:[#allocation164_spill] sm:$0xff] %v12056_v36  ;;  %v12068_v44 = vsel %vm15177_vm7, 1.0, %v14934_v8  ;;  %vm15180_vm6 = vcmp.eq.s32.totalorder %v15179_v33, %v9362_v3  ;;  %v15182_v36 = vld [vmem:[#allocation40_spill] sm:$0xff]  ;;  %vm15186_vm12 = vcmp.eq.s32.totalorder %v15185_v63, %v9362_v3  ;;  %vm14832_vm7 = vcmp.eq.s32.totalorder %v11604_v57, %v9494_v45 }
 0x13b   : > { %15178 = vst [vmem:[#allocation42_spill] sm:$0xff] %v12068_v44  ;;  %v12074_v59 = vsel %vm15180_vm6, 1.0, %v14934_v8  ;;  %vm15183_vm1 = vcmp.eq.s32.totalorder %v15182_v36, %v9362_v3  ;;  %v12086_v4 = vsel %vm15186_vm12, 1.0, %v14934_v8  ;;  %v1977_v44 = vpop.f32.mrf.mxu1  ;;  %vm15190_vm12 = vcmp.eq.s32.totalorder %v15179_v33, %v9494_v45  ;;  %8839 = vmatprep.subr.msk.mxu0 %vm14808_vm11, %v14933_v56  ;;  %8845 = vmatprep.subr.msk.mxu1 %vm14807_vm2, %v14933_v56  ;;  %v15202_v33 = vld [vmem:[#allocation44_spill] sm:$0xff] }
 0x13c   : > { %15181 = vst [vmem:[#allocation43_spill] sm:$0xff] %v12074_v59  ;;  %v12080_v49 = vsel %vm15183_vm1, 1.0, %v14934_v8  ;;  %15187 = vst [vmem:[#allocation41_spill] sm:$0xff] %v12086_v4  ;;  %vm15188_vm1 = vcmp.eq.s32.totalorder %v15176_v32, %v9494_v45  ;;  %v12104_v4 = vsel %vm15190_vm12, 1.0, %v14934_v8  ;;  %vm15192_vm6 = vcmp.eq.s32.totalorder %v15182_v36, %v9494_v45  ;;  %v15196_v36 = vld [vmem:[#allocation46_spill] sm:$0xff]  ;;  %8840 = vmatpush1.msk.msra.mxu0 %vm14810_vm4, %v14933_v56 }
 0x13d   : > { %15184 = vst [vmem:[#allocation40_spill] sm:$0xff] %v12080_v49  ;;  %v12098_v49 = vsel %vm15188_vm1, 1.0, %v14934_v8  ;;  %15191 = vst [vmem:[#allocation166_spill] sm:$0xff] %v12104_v4  ;;  %v12110_v59 = vsel %vm15192_vm6, 1.0, %v14934_v8  ;;  %vm15194_vm14 = vcmp.eq.s32.totalorder %v15185_v63, %v9494_v45  ;;  %v2142_v32 = vmul.f32 %v11098_v20, %v1900_v54  ;;  %v15199_v20 = vld [vmem:[#allocation47_spill] sm:$0xff]  ;;  %8846 = vmatpush1.msk.msra.mxu1 %vm14809_vm5, %v14933_v56  ;;  %v1902_v54 = vpop.f32.mrf.mxu0 }
 0x13e   : > { %15189 = vst [vmem:[#allocation165_spill] sm:$0xff] %v12098_v49  ;;  %15193 = vst [vmem:[#allocation167_spill] sm:$0xff] %v12110_v59  ;;  %v12116_v43 = vsel %vm15194_vm14, 1.0, %v14934_v8  ;;  %v2144_v49 = vmul.f32 %v11104_v21, %v1977_v44  ;;  %vm15197_vm1 = vcmp.eq.s32.totalorder %v15196_v36, %v9362_v3  ;;  %vm15200_vm14 = vcmp.eq.s32.totalorder %v15199_v20, %v9362_v3  ;;  %v1979_v44 = vpop.f32.mrf.mxu1 }
 0x13f   : > { %15195 = vst [vmem:[#allocation168_spill] sm:$0xff] %v12116_v43  ;;  %v12132_v63 = vsel %vm15197_vm1, 1.0, %v14934_v8  ;;  %v12138_v21 = vsel %vm15200_vm14, 1.0, %v14934_v8  ;;  %vm1268_vm12 = vcmp.eq.s32.totalorder %v11571_v19, %v9362_v3  ;;  %vm15203_vm6 = vcmp.eq.s32.totalorder %v15202_v33, %v9362_v3  ;;  %6560 = vmatprep.mubr.f32.mxu0 %v14934_v8  ;;  %6637 = vmatprep.mubr.f32.mxu1 %v14934_v8 }
 0x140   : > { %15198 = vst [vmem:[#allocation46_spill] sm:$0xff] %v12132_v63  ;;  %15201 = vst [vmem:[#allocation47_spill] sm:$0xff] %v12138_v21  ;;  %v12154_v21 = vsel %vm15203_vm6, 1.0, %v14934_v8  ;;  %v15205_v63 = vld [vmem:[#allocation45_spill] sm:$0xff]  ;;  %vm15208_vm14 = vcmp.eq.s32.totalorder %v15196_v36, %v9494_v45  ;;  %vm15210_vm2 = vcmp.eq.s32.totalorder %v15199_v20, %v9494_v45  ;;  %v2145_v55 = vmul.f32 %v11120_v7, %v1979_v44  ;;  %v1906_v7 = vpop.f32.mrf.mxu0  ;;  %v1983_v20 = vpop.f32.mrf.mxu1 }
 0x141   : > { %15204 = vst [vmem:[#allocation44_spill] sm:$0xff] %v12154_v21  ;;  %vm15206_vm1 = vcmp.eq.s32.totalorder %v15205_v63, %v9362_v3  ;;  %v12166_v59 = vsel %vm15208_vm14, 1.0, %v14934_v8  ;;  %v12172_v4 = vsel %vm15210_vm2, 1.0, %v14934_v8  ;;  %v2143_v21 = vmul.f32 %v11114_v29, %v1902_v54  ;;  %8832 = vmatmul.mubr.msk.f32.gmra.mxu0 %vm1827_vm8, %v10954_v26  ;;  %8838 = vmatmul.mubr.msk.f32.gmra.mxu1 %vm1827_vm8, %v10954_v26  ;;  %v15216_v54 = vld [vmem:[#allocation50_spill] sm:$0xff] }
 0x142   : > { %v12160_v43 = vsel %vm15206_vm1, 1.0, %v14934_v8  ;;  %15209 = vst [vmem:[#allocation169_spill] sm:$0xff] %v12166_v59  ;;  %15211 = vst [vmem:[#allocation170_spill] sm:$0xff] %v12172_v4  ;;  %vm14841_vm6 = vcmp.eq.s32.totalorder %v11598_v0, %v9362_v3  ;;  %vm1267_vm1 = vcmp.eq.s32.totalorder %v11601_v16, %v9362_v3  ;;  %vm15212_vm14 = vcmp.eq.s32.totalorder %v15202_v33, %v9494_v45  ;;  %v15224_v4 = vld [vmem:[#allocation49_spill] sm:$0xff] }
 0x143   : > { %15207 = vst [vmem:[#allocation45_spill] sm:$0xff] %v12160_v43  ;;  %v12186_v36 = vsel %vm15212_vm14, 1.0, %v14934_v8  ;;  %vm15214_vm2 = vcmp.eq.s32.totalorder %v15205_v63, %v9494_v45  ;;  %vm1269_vm11 = vcmp.eq.s32.totalorder %v11604_v57, %v9362_v3  ;;  %vm15217_vm14 = vcmp.eq.s32.totalorder %v15216_v54, %v9362_v3  ;;  %v15219_v63 = vld [vmem:[#allocation51_spill] sm:$0xff]  ;;  %8841 = vmatprep.subr.msk.mxu0 %vm14820_vm0, %v14933_v56 }
 0x144   : > { %15213 = vst [vmem:[#allocation171_spill] sm:$0xff] %v12186_v36  ;;  %v12192_v29 = vsel %vm15214_vm2, 1.0, %v14934_v8  ;;  %v12204_v44 = vsel %vm15217_vm14, 1.0, %v14934_v8  ;;  %vm15220_vm2 = vcmp.eq.s32.totalorder %v15219_v63, %v9362_v3  ;;  %vm15225_vm4 = vcmp.eq.s32.totalorder %v15224_v4, %v9362_v3  ;;  %8847 = vmatprep.subr.msk.mxu1 %vm14819_vm10, %v14933_v56  ;;  %8842 = vmatpush1.msk.msra.mxu0 %vm14821_vm3, %v14933_v56 }
 0x145   : > { %15215 = vst [vmem:[#allocation172_spill] sm:$0xff] %v12192_v29  ;;  %15218 = vst [vmem:[#allocation50_spill] sm:$0xff] %v12204_v44  ;;  %v12210_v33 = vsel %vm15220_vm2, 1.0, %v14934_v8  ;;  %v15221_v29 = vld [vmem:[#allocation48_spill] sm:$0xff]  ;;  %v12222_v59 = vsel %vm15225_vm4, 1.0, %v14934_v8  ;;  %v2150_v44 = vmul.f32 %v11126_v10, %v1906_v7  ;;  %v2152_v43 = vmul.f32 %v11132_v9, %v1983_v20  ;;  %v1908_v10 = vpop.f32.mrf.mxu0  ;;  %v1985_v7 = vpop.f32.mrf.mxu1  ;;  %6708 = vmatprep.mubr.f32.mxu0 %v14934_v8 }
 0x146   : > { %vm15222_vm5 = vcmp.eq.s32.totalorder %v15221_v29, %v9362_v3  ;;  %vm15227_vm4 = vcmp.eq.s32.totalorder %v15219_v63, %v9494_v45  ;;  %vm15228_vm14 = vcmp.eq.s32.totalorder %v11568_v13, %v9362_v3  ;;  %vm15229_vm2 = vcmp.eq.s32.totalorder %v15221_v29, %v9494_v45  ;;  %v15233_v63 = vld [vmem:[#allocation54_spill] sm:$0xff]  ;;  %6785 = vmatprep.mubr.f32.mxu1 %v14934_v8 }
 0x147   : > { %v12216_v36 = vsel %vm15222_vm5, 1.0, %v14934_v8  ;;  %vm15226_vm5 = vcmp.eq.s32.totalorder %v15216_v54, %v9494_v45  ;;  %v12244_v9 = vsel %vm15227_vm4, 1.0, %v14934_v8  ;;  %8848 = vmatpush1.msk.msra.mxu1 %vm15228_vm14, %v14933_v56  ;;  %v12258_v20 = vsel %vm15229_vm2, 1.0, %v14934_v8  ;;  %8843 = vmatmul.mubr.msk.f32.vlgmr.msra.gmra.mxu0 %vm1827_vm8, %v10910_v60 }
 0x148   : > { %15223 = vst [vmem:[#allocation51_spill] sm:$0xff] %v12216_v36  ;;  %v12238_v36 = vsel %vm15226_vm5, 1.0, %v14934_v8  ;;  %15230 = vst [vmem:[#allocation48_spill] sm:$0xff] %v12258_v20  ;;  %vm15231_vm5 = vcmp.eq.s32.totalorder %v15224_v4, %v9494_v45  ;;  %vm15234_vm4 = vcmp.eq.s32.totalorder %v15233_v63, %v9362_v3  ;;  %vm15237_vm14 = vcmp.eq.s32.totalorder %v15236_v27, %v9362_v3 }
 0x149   : > { %v12264_v54 = vsel %vm15231_vm5, 1.0, %v14934_v8  ;;  %v12270_v30 = vsel %vm15234_vm4, 1.0, %v14934_v8  ;;  %v12276_v13 = vsel %vm15237_vm14, 1.0, %v14934_v8  ;;  %v2158_v29 = vadd.f32 %v2150_v44, %v2142_v32  ;;  %8849 = vmatmul.mubr.msk.f32.vlgmr.msra.gmra.mxu1 %vm1827_vm8, %v10910_v60  ;;  %8851 = vmatprep.subr.msk.mxu0 %vm14823_vm9, %v14933_v56 }
 0x14a   : > { %15232 = vst [vmem:[#allocation49_spill] sm:$0xff] %v12264_v54  ;;  %15235 = vst [vmem:[#allocation54_spill] sm:$0xff] %v12270_v30  ;;  %v2172_v6 = vadd.f32 %v2152_v43, %v2144_v49  ;;  %v2151_v20 = vmul.f32 %v11152_v1, %v1908_v10  ;;  %v2153_v4 = vmul.f32 %v11158_v24, %v1985_v7  ;;  %v2054_v30 = vpop.f32.mrf.mxu0  ;;  %v2131_v54 = vpop.f32.mrf.mxu1  ;;  %v15239_v24 = vld [vmem:[#allocation52_spill] sm:$0xff]  ;;  %v15242_v49 = vld [vmem:[#allocation53_spill] sm:$0xff]  ;;  %8857 = vmatprep.subr.msk.mxu1 %vm14822_vm15, %v14933_v56 }
 0x14b   : > { %15238 = vst [vmem:[#allocation55_spill] sm:$0xff] %v12276_v13  ;;  %vm14835_vm2 = vcmp.eq.s32.totalorder %v11619_v52, %v9494_v45  ;;  %vm14834_vm5 = vcmp.eq.s32.totalorder %v11644_v47, %v9494_v45  ;;  %vm14836_vm4 = vcmp.eq.s32.totalorder %v11647_v15, %v9494_v45  ;;  %vm15240_vm10 = vcmp.eq.s32.totalorder %v15239_v24, %v9362_v3 }
 0x14c   : > { %v12296_v1 = vsel %vm15240_vm10, 1.0, %v14934_v8  ;;  %vm15243_vm0 = vcmp.eq.s32.totalorder %v15242_v49, %v9362_v3  ;;  %vm15245_vm3 = vcmp.eq.s32.totalorder %v15233_v63, %v9494_v45  ;;  %vm15247_vm14 = vcmp.eq.s32.totalorder %v15236_v27, %v9494_v45  ;;  %8852 = vmatpush1.msk.msra.mxu0 %vm14833_vm13, %v14933_v56  ;;  %v2056_v27 = vpop.f32.mrf.mxu0  ;;  %8858 = vmatpush1.msk.msra.mxu1 %vm14832_vm7, %v14933_v56 }
 0x14d   : > { %15241 = vst [vmem:[#allocation52_spill] sm:$0xff] %v12296_v1  ;;  %v12302_v43 = vsel %vm15243_vm0, 1.0, %v14934_v8  ;;  %v12308_v32 = vsel %vm15245_vm3, 1.0, %v14934_v8  ;;  %v12314_v44 = vsel %vm15247_vm14, 1.0, %v14934_v8  ;;  %v2159_v10 = vrot.slane %v2158_v29, 4  ;;  %6714 = vmatprep.mubr.f32.mxu0 %v14934_v8  ;;  %6791 = vmatprep.mubr.f32.mxu1 %v14934_v8 }
 0x14e   : > { %15244 = vst [vmem:[#allocation53_spill] sm:$0xff] %v12302_v43  ;;  %15246 = vst [vmem:[#allocation173_spill] sm:$0xff] %v12308_v32  ;;  %v2173_v7 = vrot.slane %v2172_v6, 4  ;;  %v2165_v1 = vadd.f32 %v2151_v20, %v2143_v21  ;;  %v2179_v13 = vadd.f32 %v2153_v4, %v2145_v55  ;;  %v2146_v63 = vmul.f32 %v11182_v28, %v2054_v30  ;;  %v2133_v55 = vpop.f32.mrf.mxu1 }
 0x14f   : > { %15248 = vst [vmem:[#allocation174_spill] sm:$0xff] %v12314_v44  ;;  %v2148_v32 = vmul.f32 %v11198_v51, %v2131_v54  ;;  %vm15249_vm0 = vcmp.eq.s32.totalorder %v15239_v24, %v9494_v45  ;;  %vm15251_vm10 = vcmp.eq.s32.totalorder %v15242_v49, %v9494_v45  ;;  %v2160_v30 = vadd.f32 %v2159_v10, %v2158_v29  ;;  %v2060_v29 = vpop.f32.mrf.mxu0  ;;  %v15253_v49 = vld [vmem:[#allocation58_spill] sm:$0xff]  ;;  %v15268_v44 = vld [vmem:[#allocation84_spill] sm:$0xff] }
 0x150   : > { %v12336_v21 = vsel %vm15249_vm0, 1.0, %v14934_v8  ;;  %v12342_v28 = vsel %vm15251_vm10, 1.0, %v14934_v8  ;;  %v2174_v51 = vadd.f32 %v2173_v7, %v2172_v6  ;;  %v2166_v20 = vrot.slane %v2165_v1, 4  ;;  %v2137_v6 = vpop.f32.mrf.mxu1  ;;  %8844 = vmatmul.mubr.msk.f32.gmra.mxu0 %vm1827_vm8, %v10954_v26  ;;  %8850 = vmatmul.mubr.msk.f32.gmra.mxu1 %vm1827_vm8, %v10954_v26 }
 0x151   : > { %15250 = vst [vmem:[#allocation175_spill] sm:$0xff] %v12336_v21  ;;  %15252 = vst [vmem:[#allocation176_spill] sm:$0xff] %v12342_v28  ;;  %v2180_v54 = vrot.slane %v2179_v13, 4  ;;  %vm14837_vm3 = vcmp.eq.s32.totalorder %v11619_v52, %v9362_v3  ;;  %v2147_v4 = vmul.f32 %v11212_v50, %v2056_v27  ;;  %v2149_v24 = vmul.f32 %v11218_v58, %v2133_v55  ;;  %v15256_v50 = vld [vmem:[#allocation59_spill] sm:$0xff] }
 0x152   : > { %vm14838_vm14 = vcmp.eq.s32.totalorder %v11644_v47, %v9362_v3  ;;  %vm15254_vm0 = vcmp.eq.s32.totalorder %v15253_v49, %v9362_v3  ;;  %vm15257_vm10 = vcmp.eq.s32.totalorder %v15256_v50, %v9362_v3  ;;  %v2161_v7 = vrot.slane %v2160_v30, 2  ;;  %8853 = vmatprep.subr.msk.mxu0 %vm1268_vm12, %v14933_v56  ;;  %v15259_v50 = vld [vmem:[#allocation81_spill] sm:$0xff]  ;;  %8859 = vmatprep.subr.msk.mxu1 %vm14841_vm6, %v14933_v56 }
 0x153   : > { %v12362_v10 = vsel %vm15254_vm0, 1.0, %v14934_v8  ;;  %v12368_v58 = vsel %vm15257_vm10, 1.0, %v14934_v8  ;;  %v2175_v27 = vrot.slane %v2174_v51, 2  ;;  %v2167_v55 = vadd.f32 %v2166_v20, %v2165_v1  ;;  %8854 = vmatpush1.msk.msra.mxu0 %vm1267_vm1, %v14933_v56  ;;  %v2139_v1 = vpop.f32.mrf.mxu1  ;;  %v15261_v20 = vld [vmem:[#allocation56_spill] sm:$0xff]  ;;  %8860 = vmatpush1.msk.msra.mxu1 %vm1269_vm11, %v14933_v56 }
 0x154   : > { %15255 = vst [vmem:[#allocation177_spill] sm:$0xff] %v12362_v10  ;;  %15258 = vst [vmem:[#allocation178_spill] sm:$0xff] %v12368_v58  ;;  %v2181_v28 = vadd.f32 %v2180_v54, %v2179_v13  ;;  %vm14840_vm0 = vcmp.eq.s32.totalorder %v11647_v15, %v9362_v3  ;;  %vm14839_vm15 = vcmp.eq.s32.totalorder %v11650_v12, %v9362_v3  ;;  %v15260_v58 = vld [vmem:[#allocation82_spill] sm:$0xff]  ;;  %v2062_v13 = vpop.f32.mrf.mxu0  ;;  %6942 = vmatprep.mubr.f32.mxu0 %v14934_v8 }
 0x155   : > { %v2154_v49 = vmul.f32 %v15259_v50, %v2060_v29  ;;  %v2156_v10 = vmul.f32 %v15260_v58, %v2137_v6  ;;  %vm15262_vm10 = vcmp.eq.s32.totalorder %v15261_v20, %v9362_v3  ;;  %v15264_v29 = vld [vmem:[#allocation57_spill] sm:$0xff]  ;;  %v2162_v50 = vadd.f32 %v2161_v7, %v2160_v30  ;;  %7019 = vmatprep.mubr.f32.mxu1 %v14934_v8  ;;  %v2365_v30 = vpop.f32.mrf.mxu1 }
 0x156   : > { %v12394_v54 = vsel %vm15262_vm10, 1.0, %v14934_v8  ;;  %vm15265_vm9 = vcmp.eq.s32.totalorder %v15264_v29, %v9362_v3  ;;  %v2176_v58 = vadd.f32 %v2175_v27, %v2174_v51  ;;  %v2168_v0 = vrot.slane %v2167_v55, 2  ;;  %v2288_v29 = vpop.f32.mrf.mxu0  ;;  %8855 = vmatmul.mubr.msk.f32.vlgmr.msra.gmra.mxu0 %vm1827_vm8, %v10910_v60  ;;  %8861 = vmatmul.mubr.msk.f32.vlgmr.msra.gmra.mxu1 %vm1827_vm8, %v10910_v60 }
 0x157   : > { %15263 = vst [vmem:[#allocation81_spill] sm:$0xff] %v12394_v54  ;;  %v12400_v6 = vsel %vm15265_vm9, 1.0, %v14934_v8  ;;  %v2182_v19 = vrot.slane %v2181_v28, 2  ;;  %v2186_v16 = vadd.f32 %v2154_v49, %v2146_v63  ;;  %v2200_v20 = vadd.f32 %v2156_v10, %v2148_v32  ;;  %v15267_v54 = vld [vmem:[#allocation83_spill] sm:$0xff]  ;;  %8863 = vmatprep.subr.msk.mxu0 %vm14835_vm2, %v14933_v56  ;;  %8869 = vmatprep.subr.msk.mxu1 %vm14834_vm5, %v14933_v56 }
 0x158   : > { %15266 = vst [vmem:[#allocation82_spill] sm:$0xff] %v12400_v6  ;;  %v2155_v21 = vmul.f32 %v15267_v54, %v2062_v13  ;;  %v2157_v43 = vmul.f32 %v15268_v44, %v2139_v1  ;;  %vm14849_vm9 = vcmp.eq.s32.totalorder %v11668_v61, %v9494_v45  ;;  %v2163_v51 = vrot.slane %v2162_v50, 1  ;;  %v2290_v60 = vpop.f32.mrf.mxu0  ;;  %8864 = vmatpush1.msk.msra.mxu0 %vm14836_vm4, %v14933_v56 }
 0x159   : > { %v2177_v7 = vrot.slane %v2176_v58, 1  ;;  %v2169_v27 = vadd.f32 %v2168_v0, %v2167_v55  ;;  %v2183_v57 = vadd.f32 %v2182_v19, %v2181_v28  ;;  %vm14848_vm10 = vcmp.eq.s32.totalorder %v11672_v31, %v9494_v45  ;;  %v2367_v19 = vpop.f32.mrf.mxu1  ;;  %6948 = vmatprep.mubr.f32.mxu0 %v14934_v8  ;;  %7025 = vmatprep.mubr.f32.mxu1 %v14934_v8 }
 0x15a   : > { %vm14851_vm7 = vcmp.eq.s32.totalorder %v11696_v14, %v9494_v45  ;;  %v2187_v32 = vrot.slane %v2186_v16, 4  ;;  %v2201_v44 = vrot.slane %v2200_v20, 4  ;;  %v2193_v63 = vadd.f32 %v2155_v21, %v2147_v4  ;;  %v2294_v13 = vpop.f32.mrf.mxu0  ;;  %8856 = vmatmul.mubr.msk.f32.gmra.mxu0 %vm1827_vm8, %v10954_v26  ;;  %8862 = vmatmul.mubr.msk.f32.gmra.mxu1 %vm1827_vm8, %v10954_v26 }
 0x15b   : > { %v2207_v49 = vadd.f32 %v2157_v43, %v2149_v24  ;;  %vm14850_vm13 = vcmp.eq.s32.totalorder %v11724_v35, %v9494_v45  ;;  %v12430_v0 = vadd.f32 %v2163_v51, %v2162_v50  ;;  %v12432_v28 = vadd.f32 %v2177_v7, %v2176_v58  ;;  %v2371_v1 = vpop.f32.mrf.mxu1  ;;  %v15270_v58 = vld [vmem:[#allocation86_spill] sm:$0xff]  ;;  %v15271_v7 = vld [vmem:[#allocation88_spill] sm:$0xff]  ;;  %8865 = vmatprep.subr.msk.mxu0 %vm14837_vm3, %v14933_v56 }
 0x15c   : > { %v2170_v43 = vrot.slane %v2169_v27, 1  ;;  %v2184_v21 = vrot.slane %v2183_v57, 1  ;;  %vm15269_vm5 = vcmp.eq.s32.totalorder %v11650_v12, %v9494_v45  ;;  %v2188_v4 = vadd.f32 %v2187_v32, %v2186_v16  ;;  %8866 = vmatpush1.msk.msra.mxu0 %vm14840_vm0, %v14933_v56  ;;  %7096 = vmatprep.mubr.f32.mxu0 %v14934_v8  ;;  %v12528_v12 = vld [vmem:[#allocation5 + $0x8] sm:$0xff] }
 0x15d   : > { %8870 = vmatpush1.msk.msra.mxu1 %vm15269_vm5, %v14933_v56  ;;  %v2202_v24 = vadd.f32 %v2201_v44, %v2200_v20  ;;  %v2194_v10 = vrot.slane %v2193_v63, 4  ;;  %v2208_v55 = vrot.slane %v2207_v49, 4  ;;  %v2530_v51 = vmul.f32 %v15270_v58, %v2288_v29  ;;  %v2373_v29 = vpop.f32.mrf.mxu1  ;;  %7173 = vmatprep.mubr.f32.mxu1 %v14934_v8 }
 0x15e   : > { %v12444_v54 = vadd.f32 %v2170_v43, %v2169_v27  ;;  %v12446_v50 = vadd.f32 %v2184_v21, %v2183_v57  ;;  %v2532_v6 = vmul.f32 %v15271_v7, %v2365_v30  ;;  %vm14857_vm5 = vcmp.eq.s32.totalorder %v11668_v61, %v9362_v3  ;;  %v2296_v57 = vpop.f32.mrf.mxu0  ;;  %v15272_v30 = vld [vmem:[#allocation90_spill] sm:$0xff]  ;;  %8871 = vmatprep.subr.msk.mxu1 %vm14838_vm14, %v14933_v56 }
 0x15f   : > { %v2189_v16 = vrot.slane %v2188_v4, 2  ;;  %v2203_v20 = vrot.slane %v2202_v24, 2  ;;  %v2195_v32 = vadd.f32 %v2194_v10, %v2193_v63  ;;  %v2209_v44 = vadd.f32 %v2208_v55, %v2207_v49  ;;  %8872 = vmatpush1.msk.msra.mxu1 %vm14839_vm15, %v14933_v56  ;;  %v12486_v7 = vld [vmem:[#allocation5] sm:$0xff]  ;;  %8875 = vmatprep.subr.msk.mxu0 %vm14849_vm9, %v14933_v56 }
 0x160   : > { %vm14856_vm2 = vcmp.eq.s32.totalorder %v11672_v31, %v9362_v3  ;;  %vm14874_vm4 = vcmp.eq.s32.totalorder %v11696_v14, %v9362_v3  ;;  %v2531_v27 = vmul.f32 %v15272_v30, %v2290_v60  ;;  %v2533_v63 = vmul.f32 %v11348_v25, %v2367_v19  ;;  %v2442_v25 = vpop.f32.mrf.mxu0  ;;  %8867 = vmatmul.mubr.msk.f32.vlgmr.msra.gmra.mxu0 %vm1827_vm8, %v12486_v7 }
 0x161   : > { %v2538_v49 = vmul.f32 %v11364_v53, %v2294_v13  ;;  %v2540_v26 = vmul.f32 %v11386_v22, %v2371_v1  ;;  %vm14858_vm3 = vcmp.eq.s32.totalorder %v11724_v35, %v9362_v3  ;;  %v2190_v43 = vadd.f32 %v2189_v16, %v2188_v4  ;;  %v2519_v53 = vpop.f32.mrf.mxu1  ;;  %8873 = vmatmul.mubr.msk.f32.vlgmr.msra.gmra.mxu1 %vm1827_vm8, %v12486_v7 }
 0x162   : > { %v2204_v21 = vadd.f32 %v2203_v20, %v2202_v24  ;;  %v2196_v10 = vrot.slane %v2195_v32, 2  ;;  %v2210_v55 = vrot.slane %v2209_v44, 2  ;;  %v2539_v19 = vmul.f32 %v11408_v5, %v2296_v57  ;;  %v2444_v16 = vpop.f32.mrf.mxu0  ;;  %8881 = vmatprep.subr.msk.mxu1 %vm14848_vm10, %v14933_v56  ;;  %8876 = vmatpush1.msk.msra.mxu0 %vm14851_vm7, %v14933_v56 }
 0x163   : > { %v2546_v22 = vadd.f32 %v2538_v49, %v2530_v51  ;;  %v2560_v60 = vadd.f32 %v2540_v26, %v2532_v6  ;;  %v2541_v4 = vmul.f32 %v11426_v18, %v2373_v29  ;;  %v2191_v24 = vrot.slane %v2190_v43, 1  ;;  %v2521_v51 = vpop.f32.mrf.mxu1  ;;  %v15273_v6 = vld [vmem:[#allocation136_spill] sm:$0xff]  ;;  %8882 = vmatpush1.msk.msra.mxu1 %vm14850_vm13, %v14933_v56  ;;  %7102 = vmatprep.mubr.f32.mxu0 %v14934_v8 }
 0x164   : > { %v2205_v13 = vrot.slane %v2204_v21, 1  ;;  %v2197_v1 = vadd.f32 %v2196_v10, %v2195_v32  ;;  %v2211_v58 = vadd.f32 %v2210_v55, %v2209_v44  ;;  %vm14862_vm14 = vcmp.eq.s32.totalorder %v15273_v6, %v9494_v45  ;;  %7179 = vmatprep.mubr.f32.mxu1 %v14934_v8  ;;  %8868 = vmatmul.mubr.msk.f32.gmra.mxu0 %vm1827_vm8, %v12528_v12 }
 0x165   : > { %vm14859_vm15 = vcmp.eq.s32.totalorder %v11748_v23, %v9494_v45  ;;  %v2547_v5 = vrot.slane %v2546_v22, 4  ;;  %v2561_v18 = vrot.slane %v2560_v60, 4  ;;  %v2553_v20 = vadd.f32 %v2539_v19, %v2531_v27  ;;  %v2448_v27 = vpop.f32.mrf.mxu0  ;;  %v15274_v19 = vld [vmem:[#allocation95_spill] sm:$0xff]  ;;  %8874 = vmatmul.mubr.msk.f32.gmra.mxu1 %vm1827_vm8, %v12528_v12  ;;  %8877 = vmatprep.subr.msk.mxu0 %vm14857_vm5, %v14933_v56 }
 0x166   : > { %v2567_v32 = vadd.f32 %v2541_v4, %v2533_v63  ;;  %vm14864_vm0 = vcmp.eq.s32.totalorder %v11752_v48, %v9494_v45  ;;  %vm14863_vm6 = vcmp.eq.s32.totalorder %v11756_v46, %v9494_v45  ;;  %v12504_v44 = vadd.f32 %v2191_v24, %v2190_v43  ;;  %v2525_v63 = vpop.f32.mrf.mxu1  ;;  %v15275_v24 = vld [vmem:[#allocation96_spill] sm:$0xff]  ;;  %8883 = vmatprep.subr.msk.mxu1 %vm14856_vm2, %v14933_v56 }
 0x167   : > { %v12506_v57 = vadd.f32 %v2205_v13, %v2204_v21  ;;  %v2198_v29 = vrot.slane %v2197_v1, 1  ;;  %v2212_v30 = vrot.slane %v2211_v58, 1  ;;  %v2548_v49 = vadd.f32 %v2547_v5, %v2546_v22  ;;  %v2450_v22 = vpop.f32.mrf.mxu0  ;;  %8878 = vmatpush1.msk.msra.mxu0 %vm14874_vm4, %v14933_v56  ;;  %8884 = vmatpush1.msk.msra.mxu1 %vm14858_vm3, %v14933_v56 }
 0x168   : > { %v2562_v26 = vadd.f32 %v2561_v18, %v2560_v60  ;;  %v2554_v43 = vrot.slane %v2553_v20, 4  ;;  %v2568_v10 = vrot.slane %v2567_v32, 4  ;;  %v2534_v4 = vmul.f32 %v15274_v19, %v2442_v25  ;;  %v2527_v60 = vpop.f32.mrf.mxu1  ;;  %v15276_v25 = vld [vmem:[#allocation97_spill] sm:$0xff]  ;;  %7330 = vmatprep.mubr.f32.mxu0 %v14934_v8  ;;  %7407 = vmatprep.mubr.f32.mxu1 %v14934_v8 }
 0x169   : > { %v12521_v21 = vadd.f32 %v2198_v29, %v2197_v1  ;;  %v12523_v55 = vadd.f32 %v2212_v30, %v2211_v58  ;;  %v2536_v13 = vmul.f32 %v15275_v24, %v2519_v53  ;;  %v2549_v5 = vrot.slane %v2548_v49, 2  ;;  %v15277_v1 = vld [vmem:[#allocation98_spill] sm:$0xff]  ;;  %v15279_v29 = vld [vmem:[#allocation100_spill] sm:$0xff]  ;;  %8879 = vmatmul.mubr.msk.f32.vlgmr.msra.gmra.mxu0 %vm1827_vm8, %v12486_v7  ;;  %8885 = vmatmul.mubr.msk.f32.vlgmr.msra.gmra.mxu1 %vm1827_vm8, %v12486_v7 }
 0x16a   : > { %v2563_v18 = vrot.slane %v2562_v26, 2  ;;  %v2555_v47 = vadd.f32 %v2554_v43, %v2553_v20  ;;  %v2569_v52 = vadd.f32 %v2568_v10, %v2567_v32  ;;  %vm14871_vm10 = vcmp.eq.s32.totalorder %v15273_v6, %v9362_v3  ;;  %v15278_v20 = vld [vmem:[#allocation99_spill] sm:$0xff]  ;;  %v12546_v43 = vpop.f32.mrf.mxu0  ;;  %v12548_v10 = vpop.f32.mrf.mxu1  ;;  %8887 = vmatprep.subr.msk.mxu0 %vm14862_vm14, %v14933_v56  ;;  %8893 = vmatprep.subr.msk.mxu1 %vm14859_vm15, %v14933_v56 }
 0x16b   : > { %vm14865_vm9 = vcmp.eq.s32.totalorder %v11748_v23, %v9362_v3  ;;  %v2535_v53 = vmul.f32 %v15276_v25, %v2444_v16  ;;  %v2537_v58 = vmul.f32 %v15277_v1, %v2521_v51  ;;  %v2542_v32 = vmul.f32 %v15278_v20, %v2448_v27  ;;  %8888 = vmatpush1.msk.msra.mxu0 %vm14864_vm0, %v14933_v56 }
 0x16c   : > { %v2544_v30 = vmul.f32 %v15279_v29, %v2525_v63  ;;  %vm14873_vm13 = vcmp.eq.s32.totalorder %v11752_v48, %v9362_v3  ;;  %v2550_v19 = vadd.f32 %v2549_v5, %v2548_v49  ;;  %v2564_v16 = vadd.f32 %v2563_v18, %v2562_v26  ;;  %v15280_v49 = vld [vmem:[#allocation103_spill] sm:$0xff]  ;;  %v12568_v25 = vpop.f32.mrf.mxu0  ;;  %v12570_v1 = vpop.f32.mrf.mxu1  ;;  %8894 = vmatpush1.msk.msra.mxu1 %vm14863_vm6, %v14933_v56 }
 0x16d   : > { %v2556_v24 = vrot.slane %v2555_v47, 2  ;;  %v2570_v51 = vrot.slane %v2569_v52, 2  ;;  %vm14872_vm7 = vcmp.eq.s32.totalorder %v11756_v46, %v9362_v3  ;;  %v2574_v27 = vadd.f32 %v2542_v32, %v2534_v4  ;;  %v15281_v5 = vld [vmem:[#allocation107_spill] sm:$0xff]  ;;  %7336 = vmatprep.mubr.f32.mxu0 %v14934_v8  ;;  %7413 = vmatprep.mubr.f32.mxu1 %v14934_v8 }
 0x16e   : > { %v2588_v63 = vadd.f32 %v2544_v30, %v2536_v13  ;;  %v2543_v26 = vmul.f32 %v15280_v49, %v2450_v22  ;;  %v2545_v18 = vmul.f32 %v15281_v5, %v2527_v60  ;;  %v2551_v20 = vrot.slane %v2550_v19, 1  ;;  %v2682_v22 = vpop.f32.mrf.mxu0  ;;  %v2759_v60 = vpop.f32.mrf.mxu1  ;;  %8880 = vmatmul.mubr.msk.f32.gmra.mxu0 %vm1827_vm8, %v12528_v12  ;;  %8886 = vmatmul.mubr.msk.f32.gmra.mxu1 %vm1827_vm8, %v12528_v12 }
 0x16f   : > { %v2565_v29 = vrot.slane %v2564_v16, 1  ;;  %v2557_v31 = vadd.f32 %v2556_v24, %v2555_v47  ;;  %v2571_v61 = vadd.f32 %v2570_v51, %v2569_v52  ;;  %v2575_v4 = vrot.slane %v2574_v27, 4  ;;  %8889 = vmatprep.subr.msk.mxu0 %vm14871_vm10, %v14933_v56  ;;  %8895 = vmatprep.subr.msk.mxu1 %vm14865_vm9, %v14933_v56 }
 0x170   : > { %v2589_v13 = vrot.slane %v2588_v63, 4  ;;  %v2581_v32 = vadd.f32 %v2543_v26, %v2535_v53  ;;  %v2595_v30 = vadd.f32 %v2545_v18, %v2537_v58  ;;  %vm14876_vm2 = vcmp.eq.s32.totalorder %v11773_v17, %v9494_v45  ;;  %v2761_v26 = vpop.f32.mrf.mxu1  ;;  %8890 = vmatpush1.msk.msra.mxu0 %vm14873_vm13, %v14933_v56  ;;  %8896 = vmatpush1.msk.msra.mxu1 %vm14872_vm7, %v14933_v56 }
 0x171   : > { %vm14875_vm5 = vcmp.eq.s32.totalorder %v11776_v62, %v9494_v45  ;;  %v2552_v52 = vadd.f32 %v2551_v20, %v2550_v19  ;;  %v2566_v47 = vadd.f32 %v2565_v29, %v2564_v16  ;;  %v2558_v24 = vrot.slane %v2557_v31, 1  ;;  %v2684_v16 = vpop.f32.mrf.mxu0  ;;  %7484 = vmatprep.mubr.f32.mxu0 %v14934_v8  ;;  %7561 = vmatprep.mubr.f32.mxu1 %v14934_v8 }
 0x172   : > { %v2572_v51 = vrot.slane %v2571_v61, 1  ;;  %vm14878_vm3 = vcmp.eq.s32.totalorder %v11803_v34, %v9494_v45  ;;  %v2576_v53 = vadd.f32 %v2575_v4, %v2574_v27  ;;  %v2590_v58 = vadd.f32 %v2589_v13, %v2588_v63  ;;  %8891 = vmatmul.mubr.msk.f32.vlgmr.msra.gmra.mxu0 %vm1827_vm8, %v12486_v7  ;;  %8897 = vmatmul.mubr.msk.f32.vlgmr.msra.gmra.mxu1 %vm1827_vm8, %v12486_v7 }
 0x173   : > { %v2582_v49 = vrot.slane %v2581_v32, 4  ;;  %v2596_v19 = vrot.slane %v2595_v30, 4  ;;  %vm14877_vm15 = vcmp.eq.s32.totalorder %v11806_v38, %v9494_v45  ;;  %v12603_v27 = vadd.f32 %v2552_v52, %v12430_v0  ;;  %v12612_v35 = vpop.f32.mrf.mxu0  ;;  %v12614_v0 = vpop.f32.mrf.mxu1  ;;  %8899 = vmatprep.subr.msk.mxu0 %vm14876_vm2, %v14933_v56  ;;  %8905 = vmatprep.subr.msk.mxu1 %vm14875_vm5, %v14933_v56 }
 0x174   : > { %v12606_v63 = vadd.f32 %v2566_v47, %v12432_v28  ;;  %v2559_v5 = vadd.f32 %v2558_v24, %v2557_v31  ;;  %v2573_v18 = vadd.f32 %v2572_v51, %v2571_v61  ;;  %v2577_v20 = vrot.slane %v2576_v53, 2  ;;  %v15282_v61 = vld [vmem:[#allocation110_spill] sm:$0xff]  ;;  %8900 = vmatpush1.msk.msra.mxu0 %vm14878_vm3, %v14933_v56  ;;  %8906 = vmatpush1.msk.msra.mxu1 %vm14877_vm15, %v14933_v56 }
 0x175   : > { %v2591_v29 = vrot.slane %v2590_v58, 2  ;;  %v2583_v4 = vadd.f32 %v2582_v49, %v2581_v32  ;;  %v2597_v13 = vadd.f32 %v2596_v19, %v2595_v30  ;;  %v2918_v52 = vmul.f32 %v15282_v61, %v12546_v43  ;;  %v15283_v32 = vld [vmem:[#allocation111_spill] sm:$0xff]  ;;  %v12640_v43 = vpop.f32.mrf.mxu1  ;;  %7490 = vmatprep.mubr.f32.mxu0 %v14934_v8  ;;  %7567 = vmatprep.mubr.f32.mxu1 %v14934_v8 }
 0x176   : > { %v12617_v28 = vadd.f32 %v2559_v5, %v12444_v54  ;;  %v12620_v31 = vadd.f32 %v2573_v18, %v12446_v50  ;;  %v2920_v30 = vmul.f32 %v15283_v32, %v12548_v10  ;;  %vm1300_vm14 = vcmp.eq.s32.totalorder %v11773_v17, %v9362_v3  ;;  %v12638_v50 = vpop.f32.mrf.mxu0  ;;  %v15284_v10 = vld [vmem:[#allocation114_spill] sm:$0xff]  ;;  %v15286_v19 = vld [vmem:[#allocation119_spill] sm:$0xff]  ;;  %v15287_v18 = vld [vmem:[#allocation121_spill] sm:$0xff]  ;;  %8892 = vmatmul.mubr.msk.f32.gmra.mxu0 %vm1827_vm8, %v12528_v12 }
 0x177   : > { %v2578_v47 = vadd.f32 %v2577_v20, %v2576_v53  ;;  %v2592_v24 = vadd.f32 %v2591_v29, %v2590_v58  ;;  %v2584_v51 = vrot.slane %v2583_v4, 2  ;;  %v2598_v54 = vrot.slane %v2597_v13, 2  ;;  %v15285_v58 = vld [vmem:[#allocation115_spill] sm:$0xff]  ;;  %8898 = vmatmul.mubr.msk.f32.gmra.mxu1 %vm1827_vm8, %v12528_v12  ;;  %8901 = vmatprep.subr.msk.mxu0 %vm1300_vm14, %v14933_v56 }
 0x178   : > { %vm1302_vm6 = vcmp.eq.s32.totalorder %v11776_v62, %v9362_v3  ;;  %vm1299_vm0 = vcmp.eq.s32.totalorder %v11803_v34, %v9362_v3  ;;  %v2919_v53 = vmul.f32 %v15284_v10, %v12568_v25  ;;  %v2921_v49 = vmul.f32 %v15285_v58, %v12570_v1  ;;  %v2836_v25 = vpop.f32.mrf.mxu0  ;;  %v2913_v1 = vpop.f32.mrf.mxu1  ;;  %v15288_v10 = vld [vmem:[#allocation122_spill] sm:$0xff]  ;;  %7718 = vmatprep.mubr.f32.mxu0 %v14934_v8 }
 0x179   : > { %v2926_v5 = vmul.f32 %v15286_v19, %v2682_v22  ;;  %v2928_v20 = vmul.f32 %v15287_v18, %v2759_v60  ;;  %vm1301_vm9 = vcmp.eq.s32.totalorder %v11806_v38, %v9362_v3  ;;  %v2579_v29 = vrot.slane %v2578_v47, 1  ;;  %v15289_v19 = vld [vmem:[#allocation123_spill] sm:$0xff]  ;;  %8907 = vmatprep.subr.msk.mxu1 %vm1302_vm6, %v14933_v56  ;;  %8902 = vmatpush1.msk.msra.mxu0 %vm1299_vm0, %v14933_v56 }
 0x17a   : > { %v2593_v61 = vrot.slane %v2592_v24, 1  ;;  %v2585_v32 = vadd.f32 %v2584_v51, %v2583_v4  ;;  %v2599_v23 = vadd.f32 %v2598_v54, %v2597_v13  ;;  %v2927_v58 = vmul.f32 %v15288_v10, %v2684_v16  ;;  %v2838_v54 = vpop.f32.mrf.mxu0  ;;  %v2915_v46 = vpop.f32.mrf.mxu1  ;;  %8908 = vmatpush1.msk.msra.mxu1 %vm1301_vm9, %v14933_v56  ;;  %7795 = vmatprep.mubr.f32.mxu1 %v14934_v8 }
 0x17b   : > { %v2934_v22 = vadd.f32 %v2926_v5, %v2918_v52  ;;  %v2948_v60 = vadd.f32 %v2928_v20, %v2920_v30  ;;  %v2929_v18 = vmul.f32 %v15289_v19, %v2761_v26  ;;  %v2580_v6 = vadd.f32 %v2579_v29, %v2578_v47  ;;  %8903 = vmatmul.mubr.msk.f32.vlgmr.msra.gmra.mxu0 %vm1827_vm8, %v12486_v7 }
 0x17c   : > { %v2594_v4 = vadd.f32 %v2593_v61, %v2592_v24  ;;  %v2586_v13 = vrot.slane %v2585_v32, 1  ;;  %v2600_v51 = vrot.slane %v2599_v23, 1  ;;  %vm14906_vm10 = vcmp.eq.s32.totalorder %v11809_v11, %v9494_v45  ;;  %v12696_v5 = vpop.f32.mrf.mxu0  ;;  %v12698_v20 = vpop.f32.mrf.mxu1  ;;  %8909 = vmatmul.mubr.msk.f32.vlgmr.msra.gmra.mxu1 %vm1827_vm8, %v12486_v7  ;;  %7724 = vmatprep.mubr.f32.mxu0 %v14934_v8 }
 0x17d   : > { %vm14905_vm7 = vcmp.eq.s32.totalorder %v11824_v39, %v9494_v45  ;;  %v2935_v16 = vrot.slane %v2934_v22, 4  ;;  %v2949_v26 = vrot.slane %v2948_v60, 4  ;;  %v2941_v52 = vadd.f32 %v2927_v58, %v2919_v53  ;;  %8911 = vmatprep.subr.msk.mxu0 %vm14906_vm10, %v14933_v56  ;;  %7801 = vmatprep.mubr.f32.mxu1 %v14934_v8 }
 0x17e   : > { %v2955_v30 = vadd.f32 %v2929_v18, %v2921_v49  ;;  %vm1311_vm13 = vcmp.eq.s32.totalorder %v11849_v42, %v9494_v45  ;;  %vm14907_vm4 = vcmp.eq.s32.totalorder %v11852_v41, %v9494_v45  ;;  %v12687_v47 = vadd.f32 %v2580_v6, %v12504_v44  ;;  %v15290_v44 = vld [vmem:[#allocation127_spill] sm:$0xff]  ;;  %v12718_v19 = vpop.f32.mrf.mxu1  ;;  %8917 = vmatprep.subr.msk.mxu1 %vm14905_vm7, %v14933_v56 }
 0x17f   : > { %v12690_v24 = vadd.f32 %v2594_v4, %v12506_v57  ;;  %v2587_v53 = vadd.f32 %v2586_v13, %v2585_v32  ;;  %v2601_v49 = vadd.f32 %v2600_v51, %v2599_v23  ;;  %v2936_v29 = vadd.f32 %v2935_v16, %v2934_v22  ;;  %v15291_v32 = vld [vmem:[#allocation130_spill] sm:$0xff]  ;;  %8912 = vmatpush1.msk.msra.mxu0 %vm1311_vm13, %v14933_v56 }
 0x180   : > { %v2950_v61 = vadd.f32 %v2949_v26, %v2948_v60  ;;  %v2942_v10 = vrot.slane %v2941_v52, 4  ;;  %v2956_v58 = vrot.slane %v2955_v30, 4  ;;  %v2922_v57 = vmul.f32 %v15290_v44, %v12612_v35  ;;  %v12716_v60 = vpop.f32.mrf.mxu0  ;;  %v15292_v35 = vld [vmem:[#allocation132_spill] sm:$0xff]  ;;  %v15294_v16 = vld [vmem:[#allocation134_spill] sm:$0xff]  ;;  %8918 = vmatpush1.msk.msra.mxu1 %vm14907_vm4, %v14933_v56  ;;  %8904 = vmatmul.mubr.msk.f32.gmra.mxu0 %vm1827_vm8, %v12528_v12 }
 0x181   : > { %v12706_v23 = vadd.f32 %v2587_v53, %v12521_v21  ;;  %v12709_v6 = vadd.f32 %v2601_v49, %v12523_v55  ;;  %v2924_v22 = vmul.f32 %v15291_v32, %v12614_v0  ;;  %v2937_v18 = vrot.slane %v2936_v29, 2  ;;  %v15293_v0 = vld [vmem:[#allocation133_spill] sm:$0xff]  ;;  %v12740_v49 = vpop.f32.mrf.mxu1  ;;  %v15297_v44 = vld [vmem:[#allocation142_spill] sm:$0xff]  ;;  %8910 = vmatmul.mubr.msk.f32.gmra.mxu1 %vm1827_vm8, %v12528_v12  ;;  %7872 = vmatprep.mubr.f32.mxu0 %v14934_v8 }
 0x182   : > { %v2951_v4 = vrot.slane %v2950_v61, 2  ;;  %v2943_v13 = vadd.f32 %v2942_v10, %v2941_v52  ;;  %v2957_v21 = vadd.f32 %v2956_v58, %v2955_v30  ;;  %vm1304_vm5 = vcmp.eq.s32.totalorder %v11809_v11, %v9362_v3  ;;  %v15295_v52 = vld [vmem:[#allocation137_spill] sm:$0xff]  ;;  %v12738_v53 = vpop.f32.mrf.mxu0  ;;  %7949 = vmatprep.mubr.f32.mxu1 %v14934_v8 }
 0x183   : > { %vm1306_vm2 = vcmp.eq.s32.totalorder %v11824_v39, %v9362_v3  ;;  %v2923_v55 = vmul.f32 %v15292_v35, %v12638_v50  ;;  %v2925_v51 = vmul.f32 %v15293_v0, %v12640_v43  ;;  %v2930_v26 = vmul.f32 %v15294_v16, %v2836_v25  ;;  %8913 = vmatprep.subr.msk.mxu0 %vm1304_vm5, %v14933_v56 }
 0x184   : > { %v2932_v30 = vmul.f32 %v15295_v52, %v2913_v1  ;;  %vm1303_vm15 = vcmp.eq.s32.totalorder %v11849_v42, %v9362_v3  ;;  %v2938_v50 = vadd.f32 %v2937_v18, %v2936_v29  ;;  %v2952_v10 = vadd.f32 %v2951_v4, %v2950_v61  ;;  %v15296_v29 = vld [vmem:[#allocation138_spill] sm:$0xff]  ;;  %v12760_v18 = vpop.f32.mrf.mxu0  ;;  %v12762_v4 = vpop.f32.mrf.mxu1  ;;  %8919 = vmatprep.subr.msk.mxu1 %vm1306_vm2, %v14933_v56 }
 0x185   : > { %v2944_v58 = vrot.slane %v2943_v13, 2  ;;  %v2958_v43 = vrot.slane %v2957_v21, 2  ;;  %vm1305_vm3 = vcmp.eq.s32.totalorder %v11852_v41, %v9362_v3  ;;  %v2962_v25 = vadd.f32 %v2930_v26, %v2922_v57  ;;  %8914 = vmatpush1.msk.msra.mxu0 %vm1303_vm15, %v14933_v56 }
 0x186   : > { %v2976_v1 = vadd.f32 %v2932_v30, %v2924_v22  ;;  %v2931_v61 = vmul.f32 %v15296_v29, %v2838_v54  ;;  %v2933_v32 = vmul.f32 %v15297_v44, %v2915_v46  ;;  %v2939_v35 = vrot.slane %v2938_v50, 1  ;;  %v12770_v46 = vpop.f32.mrf.mxu0  ;;  %v12772_v54 = vpop.f32.mrf.mxu1  ;;  %8920 = vmatpush1.msk.msra.mxu1 %vm1305_vm3, %v14933_v56  ;;  %8915 = vmatmul.mubr.msk.f32.vlgmr.msra.gmra.mxu0 %vm1827_vm8, %v12486_v7 }
 0x187   : > { %v2953_v0 = vrot.slane %v2952_v10, 1  ;;  %v2945_v16 = vadd.f32 %v2944_v58, %v2943_v13  ;;  %v2959_v52 = vadd.f32 %v2958_v43, %v2957_v21  ;;  %v2963_v57 = vrot.slane %v2962_v25, 4  ;;  %8921 = vmatmul.mubr.msk.f32.vlgmr.msra.gmra.mxu1 %vm1827_vm8, %v12486_v7  ;;  %7878 = vmatprep.mubr.f32.mxu0 %v14934_v8 }
 0x188   : > { %v2977_v22 = vrot.slane %v2976_v1, 4  ;;  %v2969_v26 = vadd.f32 %v2931_v61, %v2923_v55  ;;  %v2983_v30 = vadd.f32 %v2933_v32, %v2925_v51  ;;  %v2940_v13 = vadd.f32 %v2939_v35, %v2938_v50  ;;  %v12790_v50 = vpop.f32.mrf.mxu0  ;;  %7955 = vmatprep.mubr.f32.mxu1 %v14934_v8 }
 0x189   : > { %v2954_v21 = vadd.f32 %v2953_v0, %v2952_v10  ;;  %v2946_v58 = vrot.slane %v2945_v16, 1  ;;  %v2960_v43 = vrot.slane %v2959_v52, 1  ;;  %v2964_v55 = vadd.f32 %v2963_v57, %v2962_v25  ;;  %v12792_v10 = vpop.f32.mrf.mxu1 }
 0x18a   : > { %v2978_v51 = vadd.f32 %v2977_v22, %v2976_v1  ;;  %v2970_v29 = vrot.slane %v2969_v26, 4  ;;  %v2984_v61 = vrot.slane %v2983_v30, 4  ;;  %v12795_v44 = vadd.f32 %v2940_v13, %v12603_v27  ;;  %v12804_v62 = vpop.f32.mrf.mxu0  ;;  %8916 = vmatmul.mubr.msk.f32.gmra.mxu0 %vm1827_vm8, %v12528_v12 }
 0x18b   : > { %v12798_v25 = vadd.f32 %v2954_v21, %v12606_v63  ;;  %v2947_v1 = vadd.f32 %v2946_v58, %v2945_v16  ;;  %v2961_v32 = vadd.f32 %v2960_v43, %v2959_v52  ;;  %v2965_v35 = vrot.slane %v2964_v55, 2  ;;  %v12806_v27 = vpop.f32.mrf.mxu1  ;;  %8922 = vmatmul.mubr.msk.f32.gmra.mxu1 %vm1827_vm8, %v12528_v12 }
 0x18c   : > { %v2979_v0 = vrot.slane %v2978_v51, 2  ;;  %v2971_v57 = vadd.f32 %v2970_v29, %v2969_v26  ;;  %v2985_v22 = vadd.f32 %v2984_v61, %v2983_v30  ;;  %v3306_v52 = vmul.f32 %v11782_v37, %v12696_v5  ;;  %v15298_v26 = vld [vmem:[#allocation27_spill] sm:$0xff]  ;;  %v12828_v37 = vpop.f32.mrf.mxu0  ;;  %v15301_v29 = vld [vmem:[#allocation149_spill] sm:$0xff] }
 0x18d   : > { %v12809_v63 = vadd.f32 %v2947_v1, %v12617_v28  ;;  %v12812_v16 = vadd.f32 %v2961_v32, %v12620_v31  ;;  %v3308_v30 = vmul.f32 %v15298_v26, %v12698_v20  ;;  %v2966_v13 = vadd.f32 %v2965_v35, %v2964_v55  ;;  %v12830_v28 = vpop.f32.mrf.mxu1  ;;  %v15299_v31 = vld [vmem:[#allocation25_spill] sm:$0xff]  ;;  %v15300_v20 = vld [vmem:[#allocation26_spill] sm:$0xff] }
 0x18e   : > { %v2980_v21 = vadd.f32 %v2979_v0, %v2978_v51  ;;  %v2972_v58 = vrot.slane %v2971_v57, 2  ;;  %v2986_v43 = vrot.slane %v2985_v22, 2  ;;  %v3307_v5 = vmul.f32 %v15299_v31, %v12716_v60  ;;  %v15303_v31 = vld [vmem:[#allocation153_spill] sm:$0xff] }
 0x18f   : > { %v3309_v55 = vmul.f32 %v15300_v20, %v12718_v19  ;;  %v3314_v51 = vmul.f32 %v11836_v2, %v12738_v53  ;;  %v3316_v61 = vmul.f32 %v15301_v29, %v12740_v49  ;;  %v2967_v1 = vrot.slane %v2966_v13, 1  ;;  %v12849_v2 = vpop.f32.mrf.mxu0  ;;  %v12851_v60 = vpop.f32.mrf.mxu1  ;;  %v15302_v49 = vld [vmem:[#allocation152_spill] sm:$0xff] }
 0x190   : > { %v2981_v32 = vrot.slane %v2980_v21, 1  ;;  %v2973_v35 = vadd.f32 %v2972_v58, %v2971_v57  ;;  %v2987_v0 = vadd.f32 %v2986_v43, %v2985_v22  ;;  %v3315_v26 = vmul.f32 %v15302_v49, %v12760_v18 }
 0x191   : > { %v3322_v19 = vadd.f32 %v3314_v51, %v3306_v52  ;;  %v3336_v53 = vadd.f32 %v3316_v61, %v3308_v30  ;;  %v3317_v57 = vmul.f32 %v15303_v31, %v12762_v4  ;;  %v2968_v22 = vadd.f32 %v2967_v1, %v2966_v13  ;;  %v12862_v52 = vpop.f32.mrf.mxu0  ;;  %v12864_v30 = vpop.f32.mrf.mxu1 }
 0x192   : > { %v2982_v58 = vadd.f32 %v2981_v32, %v2980_v21  ;;  %v2974_v43 = vrot.slane %v2973_v35, 1  ;;  %v2988_v56 = vrot.slane %v2987_v0, 1  ;;  %v3329_v51 = vadd.f32 %v3315_v26, %v3307_v5 }
 0x193   : > { %v3323_v18 = vrot.slane %v3322_v19, 4  ;;  %v3337_v20 = vrot.slane %v3336_v53, 4  ;;  %v3343_v4 = vadd.f32 %v3317_v57, %v3309_v55  ;;  %v12869_v13 = vadd.f32 %v2968_v22, %v12687_v47  ;;  %v12874_v61 = vpop.f32.mrf.mxu0  ;;  %v12876_v1 = vpop.f32.mrf.mxu1  ;;  %v15304_v47 = vld [vmem:[#allocation30_spill] sm:$0xff] }
 0x194   : > { %v12872_v21 = vadd.f32 %v2982_v58, %v12690_v24  ;;  %v2975_v29 = vadd.f32 %v2974_v43, %v2973_v35  ;;  %v2989_v7 = vadd.f32 %v2988_v56, %v2987_v0  ;;  %v3330_v5 = vrot.slane %v3329_v51, 4  ;;  %v15305_v35 = vld [vmem:[#allocation31_spill] sm:$0xff]  ;;  %v15307_v43 = vld [vmem:[#allocation29_spill] sm:$0xff]  ;;  %v15308_v56 = vld [vmem:[#allocation154_spill] sm:$0xff] }
 0x195   : > { %v3324_v32 = vadd.f32 %v3323_v18, %v3322_v19  ;;  %v3338_v49 = vadd.f32 %v3337_v20, %v3336_v53  ;;  %v3344_v55 = vrot.slane %v3343_v4, 4  ;;  %v3310_v24 = vmul.f32 %v15304_v47, %v12770_v46  ;;  %v12890_v57 = vpop.f32.mrf.mxu0  ;;  %v12892_v19 = vpop.f32.mrf.mxu1  ;;  %v15309_v20 = vld [vmem:[#allocation155_spill] sm:$0xff] }
 0x196   : > { %v12879_v26 = vadd.f32 %v2975_v29, %v12706_v23  ;;  %v12882_v31 = vadd.f32 %v2989_v7, %v12709_v6  ;;  %v3312_v0 = vmul.f32 %v15305_v35, %v12772_v54  ;;  %v3331_v23 = vadd.f32 %v3330_v5, %v3329_v51  ;;  %v15306_v6 = vld [vmem:[#allocation28_spill] sm:$0xff] }
 0x197   : > { %v3325_v53 = vrot.slane %v3324_v32, 2  ;;  %v3339_v22 = vrot.slane %v3338_v49, 2  ;;  %v3345_v58 = vadd.f32 %v3344_v55, %v3343_v4  ;;  %v3311_v46 = vmul.f32 %v15306_v6, %v12790_v50  ;;  %v12904_v7 = vpop.f32.mrf.mxu0  ;;  %v12906_v47 = vpop.f32.mrf.mxu1  ;;  %v15310_v50 = vld [vmem:[#allocation156_spill] sm:$0xff] }
 0x198   : > { %v3313_v54 = vmul.f32 %v15307_v43, %v12792_v10  ;;  %v3318_v18 = vmul.f32 %v15308_v56, %v12804_v62  ;;  %v3320_v29 = vmul.f32 %v15309_v20, %v12806_v27  ;;  %v3332_v5 = vrot.slane %v3331_v23, 2  ;;  %v15311_v10 = vld [vmem:[#allocation157_spill] sm:$0xff] }
 0x199   : > { %v3326_v51 = vadd.f32 %v3325_v53, %v3324_v32  ;;  %v3340_v4 = vadd.f32 %v3339_v22, %v3338_v49  ;;  %v3346_v12 = vrot.slane %v3345_v58, 2  ;;  %v3319_v6 = vmul.f32 %v15310_v50, %v12828_v37  ;;  %v12912_v62 = vpop.f32.mrf.mxu0  ;;  %v12914_v56 = vpop.f32.mrf.mxu1 }
 0x19a   : > { %v3350_v55 = vadd.f32 %v3318_v18, %v3310_v24  ;;  %v3364_v35 = vadd.f32 %v3320_v29, %v3312_v0  ;;  %v3321_v43 = vmul.f32 %v15311_v10, %v12830_v28  ;;  %v3333_v39 = vadd.f32 %v3332_v5, %v3331_v23 }
 0x19b   : > { %v3327_v27 = vrot.slane %v3326_v51, 1  ;;  %v3341_v20 = vrot.slane %v3340_v4, 1  ;;  %v3347_v11 = vadd.f32 %v3346_v12, %v3345_v58  ;;  %v3357_v53 = vadd.f32 %v3319_v6, %v3311_v46  ;;  %v12916_v24 = vpop.f32.mrf.mxu0  ;;  %v12918_v0 = vpop.f32.mrf.mxu1 }
 0x19c   : > { %v3351_v32 = vrot.slane %v3350_v55, 4  ;;  %v3365_v49 = vrot.slane %v3364_v35, 4  ;;  %v3371_v22 = vadd.f32 %v3321_v43, %v3313_v54  ;;  %v3334_v29 = vrot.slane %v3333_v39, 1 }
 0x19d   : > { %v3328_v37 = vadd.f32 %v3327_v27, %v3326_v51  ;;  %v3342_v18 = vadd.f32 %v3341_v20, %v3340_v4  ;;  %v3348_v28 = vrot.slane %v3347_v11, 1  ;;  %v3358_v41 = vrot.slane %v3357_v53, 4  ;;  %v12920_v17 = vpop.f32.mrf.mxu0  ;;  %v12922_v23 = vpop.f32.mrf.mxu1 }
 0x19e   : > { %v3352_v50 = vadd.f32 %v3351_v32, %v3350_v55  ;;  %v3366_v10 = vadd.f32 %v3365_v49, %v3364_v35  ;;  %v3372_v42 = vrot.slane %v3371_v22, 4  ;;  %v3335_v54 = vadd.f32 %v3334_v29, %v3333_v39  ;;  %v15313_v39 = vld [vmem:[#allocation35_spill] sm:$0xff] }
 0x19f   : > { %v12925_v58 = vadd.f32 %v3328_v37, %v12795_v44  ;;  %v12928_v46 = vadd.f32 %v3342_v18, %v12798_v25  ;;  %v3349_v5 = vadd.f32 %v3348_v28, %v3347_v11  ;;  %v3359_v12 = vadd.f32 %v3358_v41, %v3357_v53  ;;  %v12930_v55 = vpop.f32.mrf.mxu0  ;;  %v12932_v35 = vpop.f32.mrf.mxu1  ;;  %v15312_v44 = vld [vmem:[#allocation34_spill] sm:$0xff] }
 0x1a0   : > { %v3353_v51 = vrot.slane %v3352_v50, 2  ;;  %v3367_v4 = vrot.slane %v3366_v10, 2  ;;  %v3373_v6 = vadd.f32 %v3372_v42, %v3371_v22  ;;  %v12935_v43 = vadd.f32 %v3335_v54, %v12809_v63  ;;  %v15314_v63 = vld [vmem:[#allocation32_spill] sm:$0xff]  ;;  %v15316_v18 = vld [vmem:[#allocation158_spill] sm:$0xff] }
 0x1a1   : > { %v12938_v27 = vadd.f32 %v3349_v5, %v12812_v16  ;;  %v3694_v25 = vmul.f32 %v15312_v44, %v12849_v2  ;;  %v3696_v11 = vmul.f32 %v15313_v39, %v12851_v60  ;;  %v3360_v41 = vrot.slane %v3359_v12, 2  ;;  %v12944_v49 = vpop.f32.mrf.mxu0  ;;  %v12946_v53 = vpop.f32.mrf.mxu1  ;;  %v15315_v16 = vld [vmem:[#allocation33_spill] sm:$0xff] }
 0x1a2   : > { %v3354_v20 = vadd.f32 %v3353_v51, %v3352_v50  ;;  %v3368_v32 = vadd.f32 %v3367_v4, %v3366_v10  ;;  %v3374_v42 = vrot.slane %v3373_v6, 2  ;;  %v3695_v22 = vmul.f32 %v15314_v63, %v12862_v52  ;;  %v15317_v52 = vld [vmem:[#allocation159_spill] sm:$0xff] }
 0x1a3   : > { %v3697_v37 = vmul.f32 %v15315_v16, %v12864_v30  ;;  %v3702_v2 = vmul.f32 %v11972_v40, %v12874_v61  ;;  %v3704_v60 = vmul.f32 %v15316_v18, %v12876_v1  ;;  %v3361_v50 = vadd.f32 %v3360_v41, %v3359_v12  ;;  %v12956_v54 = vpop.f32.mrf.mxu0  ;;  %v12958_v5 = vpop.f32.mrf.mxu1  ;;  %v15318_v30 = vld [vmem:[#allocation160_spill] sm:$0xff] }
 0x1a4   : > { %v3355_v29 = vrot.slane %v3354_v20, 1  ;;  %v3369_v28 = vrot.slane %v3368_v32, 1  ;;  %v3375_v10 = vadd.f32 %v3374_v42, %v3373_v6  ;;  %v3703_v44 = vmul.f32 %v15317_v52, %v12890_v57 }
 0x1a5   : > { %v3710_v51 = vadd.f32 %v3702_v2, %v3694_v25  ;;  %v3724_v4 = vadd.f32 %v3704_v60, %v3696_v11  ;;  %v3705_v39 = vmul.f32 %v15318_v30, %v12892_v19  ;;  %v3362_v63 = vrot.slane %v3361_v50, 1  ;;  %v12964_v16 = vpop.f32.mrf.mxu0  ;;  %v12966_v12 = vpop.f32.mrf.mxu1 }
 0x1a6   : > { %v3356_v40 = vadd.f32 %v3355_v29, %v3354_v20  ;;  %v3370_v61 = vadd.f32 %v3369_v28, %v3368_v32  ;;  %v3376_v1 = vrot.slane %v3375_v10, 1  ;;  %v3717_v42 = vadd.f32 %v3703_v44, %v3695_v22 }
 0x1a7   : > { %v3711_v6 = vrot.slane %v3710_v51, 4  ;;  %v3725_v41 = vrot.slane %v3724_v4, 4  ;;  %v3731_v18 = vadd.f32 %v3705_v39, %v3697_v37  ;;  %v3363_v11 = vadd.f32 %v3362_v63, %v3361_v50  ;;  %v12974_v20 = vpop.f32.mrf.mxu0  ;;  %v12976_v32 = vpop.f32.mrf.mxu1  ;;  %v15320_v37 = vld [vmem:[#allocation39_spill] sm:$0xff]  ;;  %v15323_v63 = vld [vmem:[#allocation161_spill] sm:$0xff] }
 0x1a8   : > { %v12969_v25 = vadd.f32 %v3356_v40, %v12869_v13  ;;  %v12972_v57 = vadd.f32 %v3370_v61, %v12872_v21  ;;  %v3377_v19 = vadd.f32 %v3376_v1, %v3375_v10  ;;  %v3718_v29 = vrot.slane %v3717_v42, 4  ;;  %v15319_v13 = vld [vmem:[#allocation38_spill] sm:$0xff] }
 0x1a9   : > { %v3712_v2 = vadd.f32 %v3711_v6, %v3710_v51  ;;  %v3726_v60 = vadd.f32 %v3725_v41, %v3724_v4  ;;  %v3732_v28 = vrot.slane %v3731_v18, 4  ;;  %v12979_v52 = vadd.f32 %v3363_v11, %v12879_v26  ;;  %v12988_v10 = vpop.f32.mrf.mxu0  ;;  %v12990_v44 = vpop.f32.mrf.mxu1  ;;  %v15321_v26 = vld [vmem:[#allocation36_spill] sm:$0xff]  ;;  %v15324_v1 = vld [vmem:[#allocation162_spill] sm:$0xff] }
 0x1aa   : > { %v12982_v22 = vadd.f32 %v3377_v19, %v12882_v31  ;;  %v3698_v21 = vmul.f32 %v15319_v13, %v12904_v7  ;;  %v3700_v50 = vmul.f32 %v15320_v37, %v12906_v47  ;;  %v3719_v30 = vadd.f32 %v3718_v29, %v3717_v42  ;;  %v15322_v31 = vld [vmem:[#allocation37_spill] sm:$0xff] }
 0x1ab   : > { %v3713_v51 = vrot.slane %v3712_v2, 2  ;;  %v3727_v4 = vrot.slane %v3726_v60, 2  ;;  %v3733_v39 = vadd.f32 %v3732_v28, %v3731_v18  ;;  %v3699_v40 = vmul.f32 %v15321_v26, %v12912_v62  ;;  %v13000_v6 = vpop.f32.mrf.mxu0  ;;  %v13002_v41 = vpop.f32.mrf.mxu1  ;;  %v15325_v62 = vld [vmem:[#allocation163_spill] sm:$0xff] }
 0x1ac   : > { %v3701_v61 = vmul.f32 %v15322_v31, %v12914_v56  ;;  %v3706_v7 = vmul.f32 %v15323_v63, %v12916_v24  ;;  %v3708_v47 = vmul.f32 %v15324_v1, %v12918_v0  ;;  %v3720_v42 = vrot.slane %v3719_v30, 2  ;;  %v15326_v56 = vld [vmem:[#allocation164_spill] sm:$0xff] }
 0x1ad   : > { %v3714_v11 = vadd.f32 %v3713_v51, %v3712_v2  ;;  %v3728_v19 = vadd.f32 %v3727_v4, %v3726_v60  ;;  %v3734_v18 = vrot.slane %v3733_v39, 2  ;;  %v3707_v13 = vmul.f32 %v15325_v62, %v12920_v17  ;;  %v13008_v24 = vpop.f32.mrf.mxu0  ;;  %v13010_v26 = vpop.f32.mrf.mxu1 }
 0x1ae   : > { %v3738_v29 = vadd.f32 %v3706_v7, %v3698_v21  ;;  %v3752_v28 = vadd.f32 %v3708_v47, %v3700_v50  ;;  %v3709_v37 = vmul.f32 %v15326_v56, %v12922_v23  ;;  %v3721_v63 = vadd.f32 %v3720_v42, %v3719_v30 }
 0x1af   : > { %v3715_v0 = vrot.slane %v3714_v11, 1  ;;  %v3729_v31 = vrot.slane %v3728_v19, 1  ;;  %v3735_v1 = vadd.f32 %v3734_v18, %v3733_v39  ;;  %v3745_v51 = vadd.f32 %v3707_v13, %v3699_v40  ;;  %v13012_v21 = vpop.f32.mrf.mxu0  ;;  %v13014_v50 = vpop.f32.mrf.mxu1 }
 0x1b0   : > { %v3739_v2 = vrot.slane %v3738_v29, 4  ;;  %v3753_v60 = vrot.slane %v3752_v28, 4  ;;  %v3759_v4 = vadd.f32 %v3709_v37, %v3701_v61  ;;  %v3722_v47 = vrot.slane %v3721_v63, 1 }
 0x1b1   : > { %v3716_v17 = vadd.f32 %v3715_v0, %v3714_v11  ;;  %v3730_v7 = vadd.f32 %v3729_v31, %v3728_v19  ;;  %v3736_v23 = vrot.slane %v3735_v1, 1  ;;  %v3746_v38 = vrot.slane %v3745_v51, 4  ;;  %v13016_v48 = vpop.f32.mrf.mxu0  ;;  %v13018_v30 = vpop.f32.mrf.mxu1  ;;  %v15328_v31 = vld [vmem:[#allocation43_spill] sm:$0xff] }
 0x1b2   : > { %v3740_v62 = vadd.f32 %v3739_v2, %v3738_v29  ;;  %v3754_v56 = vadd.f32 %v3753_v60, %v3752_v28  ;;  %v3760_v34 = vrot.slane %v3759_v4, 4  ;;  %v3723_v61 = vadd.f32 %v3722_v47, %v3721_v63  ;;  %v15332_v47 = vld [vmem:[#allocation166_spill] sm:$0xff] }
 0x1b3   : > { %v13021_v39 = vadd.f32 %v3716_v17, %v12925_v58  ;;  %v13024_v40 = vadd.f32 %v3730_v7, %v12928_v46  ;;  %v3737_v42 = vadd.f32 %v3736_v23, %v3735_v1  ;;  %v3747_v18 = vadd.f32 %v3746_v38, %v3745_v51  ;;  %v13026_v29 = vpop.f32.mrf.mxu0  ;;  %v13028_v28 = vpop.f32.mrf.mxu1  ;;  %v15327_v58 = vld [vmem:[#allocation42_spill] sm:$0xff]  ;;  %v15331_v7 = vld [vmem:[#allocation165_spill] sm:$0xff] }
 0x1b4   : > { %v3741_v11 = vrot.slane %v3740_v62, 2  ;;  %v3755_v19 = vrot.slane %v3754_v56, 2  ;;  %v3761_v13 = vadd.f32 %v3760_v34, %v3759_v4  ;;  %v13031_v37 = vadd.f32 %v3723_v61, %v12935_v43  ;;  %v15329_v43 = vld [vmem:[#allocation40_spill] sm:$0xff] }
 0x1b5   : > { %v13034_v0 = vadd.f32 %v3737_v42, %v12938_v27  ;;  %v4082_v46 = vmul.f32 %v15327_v58, %v12930_v55  ;;  %v4084_v63 = vmul.f32 %v15328_v31, %v12932_v35  ;;  %v3748_v38 = vrot.slane %v3747_v18, 2  ;;  %v13040_v60 = vpop.f32.mrf.mxu0  ;;  %v13042_v51 = vpop.f32.mrf.mxu1  ;;  %v15330_v27 = vld [vmem:[#allocation41_spill] sm:$0xff] }
 0x1b6   : > { %v3742_v1 = vadd.f32 %v3741_v11, %v3740_v62  ;;  %v3756_v2 = vadd.f32 %v3755_v19, %v3754_v56  ;;  %v3762_v34 = vrot.slane %v3761_v13, 2  ;;  %v4083_v4 = vmul.f32 %v15329_v43, %v12944_v49  ;;  %v15333_v49 = vld [vmem:[#allocation167_spill] sm:$0xff] }
 0x1b7   : > { %v4085_v17 = vmul.f32 %v15330_v27, %v12946_v53  ;;  %v4090_v55 = vmul.f32 %v15331_v7, %v12956_v54  ;;  %v4092_v35 = vmul.f32 %v15332_v47, %v12958_v5  ;;  %v3749_v56 = vadd.f32 %v3748_v38, %v3747_v18  ;;  %v13052_v42 = vpop.f32.mrf.mxu0  ;;  %v13054_v11 = vpop.f32.mrf.mxu1  ;;  %v15334_v53 = vld [vmem:[#allocation168_spill] sm:$0xff] }
 0x1b8   : > { %v3743_v23 = vrot.slane %v3742_v1, 1  ;;  %v3757_v62 = vrot.slane %v3756_v2, 1  ;;  %v3763_v61 = vadd.f32 %v3762_v34, %v3761_v13  ;;  %v4091_v31 = vmul.f32 %v15333_v49, %v12964_v16 }
 0x1b9   : > { %v4098_v19 = vadd.f32 %v4090_v55, %v4082_v46  ;;  %v4112_v58 = vadd.f32 %v4092_v35, %v4084_v63  ;;  %v4093_v43 = vmul.f32 %v15334_v53, %v12966_v12  ;;  %v3750_v7 = vrot.slane %v3749_v56, 1  ;;  %v13060_v47 = vpop.f32.mrf.mxu0  ;;  %v13062_v18 = vpop.f32.mrf.mxu1 }
 0x1ba   : > { %v3744_v54 = vadd.f32 %v3743_v23, %v3742_v1  ;;  %v3758_v27 = vadd.f32 %v3757_v62, %v3756_v2  ;;  %v3764_v5 = vrot.slane %v3763_v61, 1  ;;  %v4105_v34 = vadd.f32 %v4091_v31, %v4083_v4 }
 0x1bb   : > { %v4099_v13 = vrot.slane %v4098_v19, 4  ;;  %v4113_v38 = vrot.slane %v4112_v58, 4  ;;  %v4119_v14 = vadd.f32 %v4093_v43, %v4085_v17  ;;  %v3751_v63 = vadd.f32 %v3750_v7, %v3749_v56  ;;  %v13070_v1 = vpop.f32.mrf.mxu0  ;;  %v13072_v2 = vpop.f32.mrf.mxu1  ;;  %v15336_v17 = vld [vmem:[#allocation47_spill] sm:$0xff]  ;;  %v15339_v7 = vld [vmem:[#allocation169_spill] sm:$0xff] }
 0x1bc   : > { %v13065_v46 = vadd.f32 %v3744_v54, %v12969_v25  ;;  %v13068_v16 = vadd.f32 %v3758_v27, %v12972_v57  ;;  %v3765_v12 = vadd.f32 %v3764_v5, %v3763_v61  ;;  %v4106_v23 = vrot.slane %v4105_v34, 4  ;;  %v15335_v25 = vld [vmem:[#allocation46_spill] sm:$0xff] }
 0x1bd   : > { %v4100_v55 = vadd.f32 %v4099_v13, %v4098_v19  ;;  %v4114_v35 = vadd.f32 %v4113_v38, %v4112_v58  ;;  %v4120_v62 = vrot.slane %v4119_v14, 4  ;;  %v13075_v49 = vadd.f32 %v3751_v63, %v12979_v52  ;;  %v13084_v61 = vpop.f32.mrf.mxu0  ;;  %v13086_v31 = vpop.f32.mrf.mxu1  ;;  %v15337_v52 = vld [vmem:[#allocation44_spill] sm:$0xff]  ;;  %v15340_v5 = vld [vmem:[#allocation170_spill] sm:$0xff] }
 0x1be   : > { %v13078_v4 = vadd.f32 %v3765_v12, %v12982_v22  ;;  %v4086_v57 = vmul.f32 %v15335_v25, %v12974_v20  ;;  %v4088_v56 = vmul.f32 %v15336_v17, %v12976_v32  ;;  %v4107_v53 = vadd.f32 %v4106_v23, %v4105_v34  ;;  %v15338_v22 = vld [vmem:[#allocation45_spill] sm:$0xff] }
 0x1bf   : > { %v4101_v19 = vrot.slane %v4100_v55, 2  ;;  %v4115_v58 = vrot.slane %v4114_v35, 2  ;;  %v4121_v43 = vadd.f32 %v4120_v62, %v4119_v14  ;;  %v4087_v54 = vmul.f32 %v15337_v52, %v12988_v10  ;;  %v13096_v13 = vpop.f32.mrf.mxu0  ;;  %v13098_v38 = vpop.f32.mrf.mxu1  ;;  %v15341_v10 = vld [vmem:[#allocation171_spill] sm:$0xff] }
 0x1c0   : > { %v4089_v27 = vmul.f32 %v15338_v22, %v12990_v44  ;;  %v4094_v20 = vmul.f32 %v15339_v7, %v13000_v6  ;;  %v4096_v32 = vmul.f32 %v15340_v5, %v13002_v41  ;;  %v4108_v34 = vrot.slane %v4107_v53, 2  ;;  %v15342_v44 = vld [vmem:[#allocation172_spill] sm:$0xff] }
 0x1c1   : > { %v4102_v63 = vadd.f32 %v4101_v19, %v4100_v55  ;;  %v4116_v12 = vadd.f32 %v4115_v58, %v4114_v35  ;;  %v4122_v14 = vrot.slane %v4121_v43, 2  ;;  %v4095_v25 = vmul.f32 %v15341_v10, %v13008_v24  ;;  %v13104_v6 = vpop.f32.mrf.mxu0  ;;  %v13106_v52 = vpop.f32.mrf.mxu1 }
 0x1c2   : > { %v4126_v23 = vadd.f32 %v4094_v20, %v4086_v57  ;;  %v4140_v62 = vadd.f32 %v4096_v32, %v4088_v56  ;;  %v4097_v17 = vmul.f32 %v15342_v44, %v13010_v26  ;;  %v4109_v7 = vadd.f32 %v4108_v34, %v4107_v53 }
 0x1c3   : > { %v4103_v41 = vrot.slane %v4102_v63, 1  ;;  %v4117_v22 = vrot.slane %v4116_v12, 1  ;;  %v4123_v5 = vadd.f32 %v4122_v14, %v4121_v43  ;;  %v4133_v19 = vadd.f32 %v4095_v25, %v4087_v54  ;;  %v13108_v57 = vpop.f32.mrf.mxu0  ;;  %v13110_v56 = vpop.f32.mrf.mxu1 }
 0x1c4   : > { %v4127_v55 = vrot.slane %v4126_v23, 4  ;;  %v4141_v35 = vrot.slane %v4140_v62, 4  ;;  %v4147_v58 = vadd.f32 %v4097_v17, %v4089_v27  ;;  %v4110_v32 = vrot.slane %v4109_v7, 1 }
 0x1c5   : > { %v4104_v24 = vadd.f32 %v4103_v41, %v4102_v63  ;;  %v4118_v20 = vadd.f32 %v4117_v22, %v4116_v12  ;;  %v4124_v26 = vrot.slane %v4123_v5, 1  ;;  %v4134_v15 = vrot.slane %v4133_v19, 4  ;;  %v13112_v45 = vpop.f32.mrf.mxu0  ;;  %v13114_v53 = vpop.f32.mrf.mxu1 }
 0x1c6   : > { %v4128_v10 = vadd.f32 %v4127_v55, %v4126_v23  ;;  %v4142_v44 = vadd.f32 %v4141_v35, %v4140_v62  ;;  %v4148_v3 = vrot.slane %v4147_v58, 4  ;;  %v4111_v27 = vadd.f32 %v4110_v32, %v4109_v7 }
 0x1c7   : > { %v13117_v43 = vadd.f32 %v4104_v24, %v13021_v39  ;;  %v13120_v54 = vadd.f32 %v4118_v20, %v13024_v40  ;;  %v4125_v34 = vadd.f32 %v4124_v26, %v4123_v5  ;;  %v4135_v14 = vadd.f32 %v4134_v15, %v4133_v19  ;;  %v13122_v23 = vpop.f32.mrf.mxu0  ;;  %v13124_v62 = vpop.f32.mrf.mxu1  ;;  %v15343_v39 = vld [vmem:[#allocation50_spill] sm:$0xff] }
 0x1c8   : > { %v4129_v63 = vrot.slane %v4128_v10, 2  ;;  %v4143_v12 = vrot.slane %v4142_v44, 2  ;;  %v4149_v25 = vadd.f32 %v4148_v3, %v4147_v58  ;;  %v13127_v17 = vadd.f32 %v4111_v27, %v13031_v37  ;;  %v15344_v37 = vld [vmem:[#allocation51_spill] sm:$0xff] }
 0x1c9   : > { %v13130_v41 = vadd.f32 %v4125_v34, %v13034_v0  ;;  %v4470_v40 = vmul.f32 %v15343_v39, %v13012_v21  ;;  %v4472_v22 = vmul.f32 %v12210_v33, %v13014_v50  ;;  %v4136_v15 = vrot.slane %v4135_v14, 2  ;;  %v13136_v55 = vpop.f32.mrf.mxu0  ;;  %v13138_v35 = vpop.f32.mrf.mxu1 }
 0x1ca   : > { %v4130_v7 = vadd.f32 %v4129_v63, %v4128_v10  ;;  %v4144_v5 = vadd.f32 %v4143_v12, %v4142_v44  ;;  %v4150_v3 = vrot.slane %v4149_v25, 2  ;;  %v4471_v19 = vmul.f32 %v15344_v37, %v13016_v48  ;;  %v15345_v48 = vld [vmem:[#allocation48_spill] sm:$0xff] }
 0x1cb   : > { %v4473_v0 = vmul.f32 %v12222_v59, %v13018_v30  ;;  %v4478_v21 = vmul.f32 %v12238_v36, %v13026_v29  ;;  %v4480_v33 = vmul.f32 %v12244_v9, %v13028_v28  ;;  %v4137_v24 = vadd.f32 %v4136_v15, %v4135_v14  ;;  %v13148_v32 = vpop.f32.mrf.mxu0  ;;  %v13150_v26 = vpop.f32.mrf.mxu1  ;;  %v15346_v59 = vld [vmem:[#allocation49_spill] sm:$0xff] }
 0x1cc   : > { %v4131_v50 = vrot.slane %v4130_v7, 1  ;;  %v4145_v58 = vrot.slane %v4144_v5, 1  ;;  %v4151_v20 = vadd.f32 %v4150_v3, %v4149_v25  ;;  %v4479_v27 = vmul.f32 %v15345_v48, %v13040_v60 }
 0x1cd   : > { %v4486_v10 = vadd.f32 %v4478_v21, %v4470_v40  ;;  %v4500_v44 = vadd.f32 %v4480_v33, %v4472_v22  ;;  %v4481_v30 = vmul.f32 %v15346_v59, %v13042_v51  ;;  %v4138_v34 = vrot.slane %v4137_v24, 1  ;;  %v13156_v28 = vpop.f32.mrf.mxu0  ;;  %v13158_v63 = vpop.f32.mrf.mxu1 }
 0x1ce   : > { %v4132_v36 = vadd.f32 %v4131_v50, %v4130_v7  ;;  %v4146_v29 = vadd.f32 %v4145_v58, %v4144_v5  ;;  %v4152_v9 = vrot.slane %v4151_v20, 1  ;;  %v4493_v25 = vadd.f32 %v4479_v27, %v4471_v19 }
 0x1cf   : > { %v4487_v12 = vrot.slane %v4486_v10, 4  ;;  %v4501_v14 = vrot.slane %v4500_v44, 4  ;;  %v4507_v39 = vadd.f32 %v4481_v30, %v4473_v0  ;;  %v4139_v22 = vadd.f32 %v4138_v34, %v4137_v24  ;;  %v13166_v7 = vpop.f32.mrf.mxu0  ;;  %v13168_v5 = vpop.f32.mrf.mxu1  ;;  %v15348_v0 = vld [vmem:[#allocation55_spill] sm:$0xff]  ;;  %v15351_v30 = vld [vmem:[#allocation173_spill] sm:$0xff] }
 0x1d0   : > { %v13161_v40 = vadd.f32 %v4132_v36, %v13065_v46  ;;  %v13164_v60 = vadd.f32 %v4146_v29, %v13068_v16  ;;  %v4153_v51 = vadd.f32 %v4152_v9, %v4151_v20  ;;  %v4494_v37 = vrot.slane %v4493_v25, 4  ;;  %v15347_v46 = vld [vmem:[#allocation54_spill] sm:$0xff] }
 0x1d1   : > { %v4488_v15 = vadd.f32 %v4487_v12, %v4486_v10  ;;  %v4502_v3 = vadd.f32 %v4501_v14, %v4500_v44  ;;  %v4508_v21 = vrot.slane %v4507_v39, 4  ;;  %v13171_v33 = vadd.f32 %v4139_v22, %v13075_v49  ;;  %v13180_v58 = vpop.f32.mrf.mxu0  ;;  %v13182_v24 = vpop.f32.mrf.mxu1  ;;  %v15349_v49 = vld [vmem:[#allocation52_spill] sm:$0xff]  ;;  %v15352_v36 = vld [vmem:[#allocation174_spill] sm:$0xff] }
 0x1d2   : > { %v13174_v19 = vadd.f32 %v4153_v51, %v13078_v4  ;;  %v4474_v16 = vmul.f32 %v15347_v46, %v13052_v42  ;;  %v4476_v50 = vmul.f32 %v15348_v0, %v13054_v11  ;;  %v4495_v44 = vadd.f32 %v4494_v37, %v4493_v25  ;;  %v15350_v4 = vld [vmem:[#allocation53_spill] sm:$0xff] }
 0x1d3   : > { %v4489_v20 = vrot.slane %v4488_v15, 2  ;;  %v4503_v10 = vrot.slane %v4502_v3, 2  ;;  %v4509_v48 = vadd.f32 %v4508_v21, %v4507_v39  ;;  %v4475_v27 = vmul.f32 %v15349_v49, %v13060_v47  ;;  %v13192_v29 = vpop.f32.mrf.mxu0  ;;  %v13194_v34 = vpop.f32.mrf.mxu1  ;;  %v15353_v47 = vld [vmem:[#allocation175_spill] sm:$0xff] }
 0x1d4   : > { %v4477_v59 = vmul.f32 %v15350_v4, %v13062_v18  ;;  %v4482_v42 = vmul.f32 %v15351_v30, %v13070_v1  ;;  %v4484_v11 = vmul.f32 %v15352_v36, %v13072_v2  ;;  %v4496_v14 = vrot.slane %v4495_v44, 2  ;;  %v15354_v18 = vld [vmem:[#allocation176_spill] sm:$0xff] }
 0x1d5   : > { %v4490_v9 = vadd.f32 %v4489_v20, %v4488_v15  ;;  %v4504_v12 = vadd.f32 %v4503_v10, %v4502_v3  ;;  %v4510_v25 = vrot.slane %v4509_v48, 2  ;;  %v4483_v51 = vmul.f32 %v15353_v47, %v13084_v61  ;;  %v13200_v1 = vpop.f32.mrf.mxu0  ;;  %v13202_v21 = vpop.f32.mrf.mxu1 }
 0x1d6   : > { %v4514_v39 = vadd.f32 %v4482_v42, %v4474_v16  ;;  %v4528_v22 = vadd.f32 %v4484_v11, %v4476_v50  ;;  %v4485_v37 = vmul.f32 %v15354_v18, %v13086_v31  ;;  %v4497_v0 = vadd.f32 %v4496_v14, %v4495_v44 }
 0x1d7   : > { %v4491_v2 = vrot.slane %v4490_v9, 1  ;;  %v4505_v46 = vrot.slane %v4504_v12, 1  ;;  %v4511_v49 = vadd.f32 %v4510_v25, %v4509_v48  ;;  %v4521_v20 = vadd.f32 %v4483_v51, %v4475_v27  ;;  %v13204_v16 = vpop.f32.mrf.mxu0  ;;  %v13206_v50 = vpop.f32.mrf.mxu1 }
 0x1d8   : > { %v4515_v15 = vrot.slane %v4514_v39, 4  ;;  %v4529_v3 = vrot.slane %v4528_v22, 4  ;;  %v4535_v10 = vadd.f32 %v4485_v37, %v4477_v59  ;;  %v4498_v30 = vrot.slane %v4497_v0, 1 }
 0x1d9   : > { %v4492_v61 = vadd.f32 %v4491_v2, %v4490_v9  ;;  %v4506_v4 = vadd.f32 %v4505_v46, %v4504_v12  ;;  %v4512_v31 = vrot.slane %v4511_v49, 1  ;;  %v4522_v11 = vrot.slane %v4521_v20, 4  ;;  %v13208_v18 = vpop.f32.mrf.mxu0  ;;  %v13210_v44 = vpop.f32.mrf.mxu1  ;;  %v15356_v46 = vld [vmem:[#allocation178_spill] sm:$0xff] }
 0x1da   : > { %v4516_v42 = vadd.f32 %v4515_v15, %v4514_v39  ;;  %v4530_v36 = vadd.f32 %v4529_v3, %v4528_v22  ;;  %v4536_v47 = vrot.slane %v4535_v10, 4  ;;  %v4499_v59 = vadd.f32 %v4498_v30, %v4497_v0 }
 0x1db   : > { %v13213_v48 = vadd.f32 %v4492_v61, %v13117_v43  ;;  %v13216_v27 = vadd.f32 %v4506_v4, %v13120_v54  ;;  %v4513_v14 = vadd.f32 %v4512_v31, %v4511_v49  ;;  %v4523_v25 = vadd.f32 %v4522_v11, %v4521_v20  ;;  %v13218_v39 = vpop.f32.mrf.mxu0  ;;  %v13220_v22 = vpop.f32.mrf.mxu1  ;;  %v15355_v43 = vld [vmem:[#allocation177_spill] sm:$0xff]  ;;  %v15359_v31 = vld [vmem:[#allocation58_spill] sm:$0xff] }
 0x1dc   : > { %v4517_v9 = vrot.slane %v4516_v42, 2  ;;  %v4531_v12 = vrot.slane %v4530_v36, 2  ;;  %v4537_v51 = vadd.f32 %v4536_v47, %v4535_v10  ;;  %v13223_v37 = vadd.f32 %v4499_v59, %v13127_v17  ;;  %v15357_v17 = vld [vmem:[#allocation81_spill] sm:$0xff] }
 0x1dd   : > { %v13226_v2 = vadd.f32 %v4513_v14, %v13130_v41  ;;  %v4858_v54 = vmul.f32 %v15355_v43, %v13096_v13  ;;  %v4860_v0 = vmul.f32 %v15356_v46, %v13098_v38  ;;  %v4524_v3 = vrot.slane %v4523_v25, 2  ;;  %v13232_v10 = vpop.f32.mrf.mxu0  ;;  %v13234_v61 = vpop.f32.mrf.mxu1  ;;  %v15358_v41 = vld [vmem:[#allocation82_spill] sm:$0xff]  ;;  %v15360_v13 = vld [vmem:[#allocation16_spill] sm:$0xff]  ;;  %v15362_v38 = vld [vmem:[#allocation59_spill] sm:$0xff] }
 0x1de   : > { %v4518_v49 = vadd.f32 %v4517_v9, %v4516_v42  ;;  %v4532_v15 = vadd.f32 %v4531_v12, %v4530_v36  ;;  %v4538_v20 = vrot.slane %v4537_v51, 2  ;;  %v4859_v4 = vmul.f32 %v15357_v17, %v13104_v6  ;;  %v15364_v43 = vld [vmem:[#allocation56_spill] sm:$0xff]  ;;  %v15366_v17 = vld [vmem:[#allocation57_spill] sm:$0xff] }
 0x1df   : > { %v4861_v30 = vmul.f32 %v15358_v41, %v13106_v52  ;;  %vm15361_vm8 = vcmp.eq.s32.totalorder %v15359_v31, %v15360_v13  ;;  %vm15363_vm7 = vcmp.eq.s32.totalorder %v15362_v38, %v15360_v13  ;;  %v4525_v59 = vadd.f32 %v4524_v3, %v4523_v25  ;;  %v13248_v9 = vpop.f32.mrf.mxu0  ;;  %v13250_v6 = vpop.f32.mrf.mxu1 }
 0x1e0   : > { %v8419_v11 = vsel %vm15361_vm8, 1.0, %v14934_v8  ;;  %v8421_v42 = vsel %vm15363_vm7, 1.0, %v14934_v8  ;;  %v4519_v36 = vrot.slane %v4518_v49, 1  ;;  %v4533_v47 = vrot.slane %v4532_v15, 1 }
 0x1e1   : > { %v4539_v14 = vadd.f32 %v4538_v20, %v4537_v51  ;;  %v4866_v52 = vmul.f32 %v8419_v11, %v13108_v57  ;;  %v4868_v12 = vmul.f32 %v8421_v42, %v13110_v56  ;;  %vm15365_vm8 = vcmp.eq.s32.totalorder %v15364_v43, %v15360_v13  ;;  %v13262_v31 = vpop.f32.mrf.mxu0  ;;  %v13264_v38 = vpop.f32.mrf.mxu1 }
 0x1e2   : > { %v8420_v46 = vsel %vm15365_vm8, 1.0, %v14934_v8  ;;  %vm15367_vm7 = vcmp.eq.s32.totalorder %v15366_v17, %v15360_v13  ;;  %v4520_v25 = vadd.f32 %v4519_v36, %v4518_v49  ;;  %v4534_v51 = vadd.f32 %v4533_v47, %v4532_v15  ;;  %15368 = vst [vmem:[#allocation83_spill] sm:$0xff] %v13262_v31  ;;  %15369 = vst [vmem:[#allocation84_spill] sm:$0xff] %v13264_v38 }
 0x1e3   : > { %v8422_v41 = vsel %vm15367_vm7, 1.0, %v14934_v8  ;;  %v4526_v3 = vrot.slane %v4525_v59, 1  ;;  %v4540_v20 = vrot.slane %v4539_v14, 1  ;;  %v4874_v57 = vadd.f32 %v4866_v52, %v4858_v54  ;;  %v13274_v36 = vpop.f32.mrf.mxu0  ;;  %v13276_v47 = vpop.f32.mrf.mxu1 }
 0x1e4   : > { %v4888_v56 = vadd.f32 %v4868_v12, %v4860_v0  ;;  %v4867_v11 = vmul.f32 %v8420_v46, %v13112_v45  ;;  %v4869_v42 = vmul.f32 %v8422_v41, %v13114_v53  ;;  %v13269_v43 = vadd.f32 %v4520_v25, %v13161_v40  ;;  %15370 = vst [vmem:[#allocation86_spill] sm:$0xff] %v13276_v47  ;;  %v15371_v40 = vld [vmem:[#allocation62_spill] sm:$0xff] }
 0x1e5   : > { %v13272_v17 = vadd.f32 %v4534_v51, %v13164_v60  ;;  %v4527_v49 = vadd.f32 %v4526_v3, %v4525_v59  ;;  %v4541_v15 = vadd.f32 %v4540_v20, %v4539_v14  ;;  %v4875_v31 = vrot.slane %v4874_v57, 4  ;;  %v15372_v60 = vld [vmem:[#allocation14_spill] sm:$0xff]  ;;  %v15374_v14 = vld [vmem:[#allocation63_spill] sm:$0xff]  ;;  %v13292_v12 = vpop.f32.mrf.mxu0  ;;  %v15378_v51 = vld [vmem:[#allocation60_spill] sm:$0xff] }
 0x1e6   : > { %v4889_v38 = vrot.slane %v4888_v56, 4  ;;  %v4881_v54 = vadd.f32 %v4867_v11, %v4859_v4  ;;  %v4895_v0 = vadd.f32 %v4869_v42, %v4861_v30  ;;  %vm15373_vm8 = vcmp.eq.s32.totalorder %v15371_v40, %v15372_v60  ;;  %15376 = vst [vmem:[#allocation88_spill] sm:$0xff] %v13292_v12  ;;  %v13294_v4 = vpop.f32.mrf.mxu1  ;;  %v15380_v20 = vld [vmem:[#allocation61_spill] sm:$0xff] }
 0x1e7   : > { %v13279_v45 = vadd.f32 %v4527_v49, %v13171_v33  ;;  %v13282_v53 = vadd.f32 %v4541_v15, %v13174_v19  ;;  %v8415_v59 = vsel %vm15373_vm8, 1.0, %v14934_v8  ;;  %vm15375_vm7 = vcmp.eq.s32.totalorder %v15374_v14, %v15372_v60  ;;  %15377 = vst [vmem:[#allocation90_spill] sm:$0xff] %v13294_v4  ;;  %v13306_v42 = vpop.f32.mrf.mxu0 }
 0x1e8   : > { %v8417_v52 = vsel %vm15375_vm7, 1.0, %v14934_v8  ;;  %v4876_v30 = vadd.f32 %v4875_v31, %v4874_v57  ;;  %v4890_v33 = vadd.f32 %v4889_v38, %v4888_v56  ;;  %v4882_v46 = vrot.slane %v4881_v54, 4  ;;  %15382 = vst [vmem:[#allocation95_spill] sm:$0xff] %v13306_v42  ;;  %v13308_v31 = vpop.f32.mrf.mxu1 }
 0x1e9   : > { %v4896_v41 = vrot.slane %v4895_v0, 4  ;;  %v4862_v19 = vmul.f32 %v8415_v59, %v13122_v23  ;;  %v4864_v25 = vmul.f32 %v8417_v52, %v13124_v62  ;;  %vm15379_vm8 = vcmp.eq.s32.totalorder %v15378_v51, %v15372_v60  ;;  %15383 = vst [vmem:[#allocation96_spill] sm:$0xff] %v13308_v31  ;;  %v13320_v52 = vpop.f32.mrf.mxu0 }
 0x1ea   : > { %v8416_v3 = vsel %vm15379_vm8, 1.0, %v14934_v8  ;;  %vm15381_vm7 = vcmp.eq.s32.totalorder %v15380_v20, %v15372_v60  ;;  %v4877_v38 = vrot.slane %v4876_v30, 2  ;;  %v4891_v57 = vrot.slane %v4890_v33, 2  ;;  %15386 = vst [vmem:[#allocation97_spill] sm:$0xff] %v13320_v52  ;;  %v13322_v31 = vpop.f32.mrf.mxu1 }
 0x1eb   : > { %v8418_v11 = vsel %vm15381_vm7, 1.0, %v14934_v8  ;;  %v4883_v56 = vadd.f32 %v4882_v46, %v4881_v54  ;;  %v4897_v23 = vadd.f32 %v4896_v41, %v4895_v0  ;;  %v4863_v62 = vmul.f32 %v8416_v3, %v13136_v55  ;;  %15387 = vst [vmem:[#allocation98_spill] sm:$0xff] %v13322_v31  ;;  %v13334_v3 = vpop.f32.mrf.mxu0 }
 0x1ec   : > { %v4865_v49 = vmul.f32 %v8418_v11, %v13138_v35  ;;  %vm15384_vm8 = vcmp.eq.s32.totalorder %v15371_v40, %v15360_v13  ;;  %vm15385_vm7 = vcmp.eq.s32.totalorder %v15374_v14, %v15360_v13  ;;  %v4878_v54 = vadd.f32 %v4877_v38, %v4876_v30  ;;  %15390 = vst [vmem:[#allocation99_spill] sm:$0xff] %v13334_v3  ;;  %v13336_v30 = vpop.f32.mrf.mxu1 }
 0x1ed   : > { %v8423_v15 = vsel %vm15384_vm8, 1.0, %v14934_v8  ;;  %v8425_v59 = vsel %vm15385_vm7, 1.0, %v14934_v8  ;;  %v4892_v0 = vadd.f32 %v4891_v57, %v4890_v33  ;;  %v4884_v46 = vrot.slane %v4883_v56, 2  ;;  %15391 = vst [vmem:[#allocation100_spill] sm:$0xff] %v13336_v30 }
 0x1ee   : > { %v4898_v55 = vrot.slane %v4897_v23, 2  ;;  %v4870_v35 = vmul.f32 %v8423_v15, %v13148_v32  ;;  %v4872_v41 = vmul.f32 %v8425_v59, %v13150_v26  ;;  %vm15388_vm8 = vcmp.eq.s32.totalorder %v15378_v51, %v15360_v13  ;;  %v13340_v59 = vpop.f32.mrf.mxu0  ;;  %v13342_v31 = vpop.f32.mrf.mxu1 }
 0x1ef   : > { %v8424_v40 = vsel %vm15388_vm8, 1.0, %v14934_v8  ;;  %vm15389_vm7 = vcmp.eq.s32.totalorder %v15380_v20, %v15360_v13  ;;  %v4879_v33 = vrot.slane %v4878_v54, 1  ;;  %v4893_v11 = vrot.slane %v4892_v0, 1 }
 0x1f0   : > { %v8426_v14 = vsel %vm15389_vm7, 1.0, %v14934_v8  ;;  %v4885_v38 = vadd.f32 %v4884_v46, %v4883_v56  ;;  %v4899_v32 = vadd.f32 %v4898_v55, %v4897_v23  ;;  %v4902_v57 = vadd.f32 %v4870_v35, %v4862_v19  ;;  %v13344_v56 = vpop.f32.mrf.mxu0  ;;  %v13346_v19 = vpop.f32.mrf.mxu1 }
 0x1f1   : > { %v4916_v26 = vadd.f32 %v4872_v41, %v4864_v25  ;;  %v4871_v15 = vmul.f32 %v8424_v40, %v13156_v28  ;;  %v4873_v51 = vmul.f32 %v8426_v14, %v13158_v63  ;;  %v4880_v20 = vadd.f32 %v4879_v33, %v4878_v54 }
 0x1f2   : > { %v4894_v52 = vadd.f32 %v4893_v11, %v4892_v0  ;;  %v4886_v42 = vrot.slane %v4885_v38, 1  ;;  %v4900_v3 = vrot.slane %v4899_v32, 1  ;;  %v4903_v4 = vrot.slane %v4902_v57, 4  ;;  %v15398_v11 = vld [vmem:[#allocation65_spill] sm:$0xff] }
 0x1f3   : > { %v4917_v30 = vrot.slane %v4916_v26, 4  ;;  %v4909_v12 = vadd.f32 %v4871_v15, %v4863_v62  ;;  %v4923_v47 = vadd.f32 %v4873_v51, %v4865_v49  ;;  %v13349_v28 = vadd.f32 %v4880_v20, %v13213_v48  ;;  %v15392_v49 = vld [vmem:[#allocation66_spill] sm:$0xff] }
 0x1f4   : > { %v13352_v63 = vadd.f32 %v4894_v52, %v13216_v27  ;;  %v4887_v25 = vadd.f32 %v4886_v42, %v4885_v38  ;;  %v4901_v23 = vadd.f32 %v4900_v3, %v4899_v32  ;;  %v4904_v54 = vadd.f32 %v4903_v4, %v4902_v57  ;;  %v15394_v27 = vld [vmem:[#allocation67_spill] sm:$0xff]  ;;  %v13368_v4 = vpop.f32.mrf.mxu0  ;;  %v13370_v52 = vpop.f32.mrf.mxu1 }
 0x1f5   : > { %v4918_v0 = vadd.f32 %v4917_v30, %v4916_v26  ;;  %v4910_v46 = vrot.slane %v4909_v12, 4  ;;  %v4924_v55 = vrot.slane %v4923_v47, 4  ;;  %vm15393_vm8 = vcmp.eq.s32.totalorder %v15392_v49, %v15372_v60  ;;  %v15396_v30 = vld [vmem:[#allocation64_spill] sm:$0xff] }
 0x1f6   : > { %v13355_v35 = vadd.f32 %v4887_v25, %v13223_v37  ;;  %v13358_v62 = vadd.f32 %v4901_v23, %v13226_v2  ;;  %v8427_v48 = vsel %vm15393_vm8, 1.0, %v14934_v8  ;;  %vm15395_vm7 = vcmp.eq.s32.totalorder %v15394_v27, %v15372_v60  ;;  %v13392_v51 = vpop.f32.mrf.mxu0  ;;  %v13394_v20 = vpop.f32.mrf.mxu1 }
 0x1f7   : > { %v8429_v42 = vsel %vm15395_vm7, 1.0, %v14934_v8  ;;  %v4905_v41 = vrot.slane %v4904_v54, 2  ;;  %v4919_v37 = vrot.slane %v4918_v0, 2  ;;  %v4911_v40 = vadd.f32 %v4910_v46, %v4909_v12 }
 0x1f8   : > { %v4925_v14 = vadd.f32 %v4924_v55, %v4923_v47  ;;  %v5246_v2 = vmul.f32 %v8427_v48, %v13166_v7  ;;  %v5248_v3 = vmul.f32 %v8429_v42, %v13168_v5  ;;  %vm15397_vm8 = vcmp.eq.s32.totalorder %v15396_v30, %v15372_v60 }
 0x1f9   : > { %v8428_v33 = vsel %vm15397_vm8, 1.0, %v14934_v8  ;;  %vm15399_vm7 = vcmp.eq.s32.totalorder %v15398_v11, %v15372_v60  ;;  %v4906_v32 = vadd.f32 %v4905_v41, %v4904_v54  ;;  %v4920_v57 = vadd.f32 %v4919_v37, %v4918_v0 }
 0x1fa   : > { %v8430_v38 = vsel %vm15399_vm7, 1.0, %v14934_v8  ;;  %v4912_v26 = vrot.slane %v4911_v40, 2  ;;  %v4926_v15 = vrot.slane %v4925_v14, 2  ;;  %v5247_v47 = vmul.f32 %v8428_v33, %v13180_v58 }
 0x1fb   : > { %v5249_v7 = vmul.f32 %v8430_v38, %v13182_v24  ;;  %vm15400_vm10 = vcmp.eq.s32.totalorder %v15392_v49, %v15360_v13  ;;  %vm15401_vm8 = vcmp.eq.s32.totalorder %v15394_v27, %v15360_v13  ;;  %v4907_v25 = vrot.slane %v4906_v32, 1 }
 0x1fc   : > { %v8435_v5 = vsel %vm15400_vm10, 1.0, %v14934_v8  ;;  %v8437_v12 = vsel %vm15401_vm8, 1.0, %v14934_v8  ;;  %v4921_v23 = vrot.slane %v4920_v57, 1  ;;  %v4913_v54 = vadd.f32 %v4912_v26, %v4911_v40  ;;  %v13408_v40 = vpop.f32.mrf.mxu0  ;;  %v15404_v26 = vld [vmem:[#allocation70_spill] sm:$0xff] }
 0x1fd   : > { %v4927_v58 = vadd.f32 %v4926_v15, %v4925_v14  ;;  %v5254_v24 = vmul.f32 %v8435_v5, %v13192_v29  ;;  %v5256_v0 = vmul.f32 %v8437_v12, %v13194_v34  ;;  %vm15402_vm10 = vcmp.eq.s32.totalorder %v15396_v30, %v15360_v13  ;;  %v13410_v14 = vpop.f32.mrf.mxu1 }
 0x1fe   : > { %v8436_v46 = vsel %vm15402_vm10, 1.0, %v14934_v8  ;;  %vm15403_vm7 = vcmp.eq.s32.totalorder %v15398_v11, %v15360_v13  ;;  %v4908_v49 = vadd.f32 %v4907_v25, %v4906_v32  ;;  %v4922_v48 = vadd.f32 %v4921_v23, %v4920_v57  ;;  %v13432_v25 = vpop.f32.mrf.mxu0 }
 0x1ff   : > { %v8438_v55 = vsel %vm15403_vm7, 1.0, %v14934_v8  ;;  %v4914_v27 = vrot.slane %v4913_v54, 1  ;;  %v4928_v42 = vrot.slane %v4927_v58, 1  ;;  %v5262_v41 = vadd.f32 %v5254_v24, %v5246_v2  ;;  %v15410_v24 = vld [vmem:[#allocation69_spill] sm:$0xff] }
 0x200   : > { %v5276_v37 = vadd.f32 %v5256_v0, %v5248_v3  ;;  %v5255_v29 = vmul.f32 %v8436_v46, %v13200_v1  ;;  %v5257_v34 = vmul.f32 %v8438_v55, %v13202_v21  ;;  %v13413_v30 = vadd.f32 %v4908_v49, %v13269_v43 }
 0x201   : > { %v13416_v33 = vadd.f32 %v4922_v48, %v13272_v17  ;;  %v4915_v11 = vadd.f32 %v4914_v27, %v4913_v54  ;;  %v4929_v38 = vadd.f32 %v4928_v42, %v4927_v58  ;;  %v5263_v32 = vrot.slane %v5262_v41, 4  ;;  %v15406_v17 = vld [vmem:[#allocation71_spill] sm:$0xff]  ;;  %v15408_v54 = vld [vmem:[#allocation68_spill] sm:$0xff] }
 0x202   : > { %v5277_v57 = vrot.slane %v5276_v37, 4  ;;  %v5269_v2 = vadd.f32 %v5255_v29, %v5247_v47  ;;  %v5283_v3 = vadd.f32 %v5257_v34, %v5249_v7  ;;  %vm15405_vm8 = vcmp.eq.s32.totalorder %v15404_v26, %v15372_v60 }
 0x203   : > { %v13419_v1 = vadd.f32 %v4915_v11, %v13279_v45  ;;  %v13422_v21 = vadd.f32 %v4929_v38, %v13282_v53  ;;  %v8431_v43 = vsel %vm15405_vm8, 1.0, %v14934_v8  ;;  %vm15407_vm10 = vcmp.eq.s32.totalorder %v15406_v17, %v15372_v60  ;;  %v13434_v45 = vpop.f32.mrf.mxu1  ;;  %v13456_v11 = vpop.f32.mrf.mxu0 }
 0x204   : > { %v8433_v15 = vsel %vm15407_vm10, 1.0, %v14934_v8  ;;  %v5264_v5 = vadd.f32 %v5263_v32, %v5262_v41  ;;  %v5278_v12 = vadd.f32 %v5277_v57, %v5276_v37  ;;  %v5270_v47 = vrot.slane %v5269_v2, 4 }
 0x205   : > { %v5284_v7 = vrot.slane %v5283_v3, 4  ;;  %v5250_v53 = vmul.f32 %v8431_v43, %v13204_v16  ;;  %v5252_v23 = vmul.f32 %v8433_v15, %v13206_v50  ;;  %vm15409_vm7 = vcmp.eq.s32.totalorder %v15408_v54, %v15372_v60  ;;  %v13458_v38 = vpop.f32.mrf.mxu1 }
 0x206   : > { %v8432_v58 = vsel %vm15409_vm7, 1.0, %v14934_v8  ;;  %vm15411_vm8 = vcmp.eq.s32.totalorder %v15410_v24, %v15372_v60  ;;  %v5265_v46 = vrot.slane %v5264_v5, 2  ;;  %v5279_v55 = vrot.slane %v5278_v12, 2 }
 0x207   : > { %v8434_v0 = vsel %vm15411_vm8, 1.0, %v14934_v8  ;;  %v5271_v49 = vadd.f32 %v5270_v47, %v5269_v2  ;;  %v5285_v48 = vadd.f32 %v5284_v7, %v5283_v3  ;;  %v5251_v27 = vmul.f32 %v8432_v58, %v13208_v18  ;;  %v13474_v58 = vpop.f32.mrf.mxu1 }
 0x208   : > { %v5253_v16 = vmul.f32 %v8434_v0, %v13210_v44  ;;  %vm15412_vm10 = vcmp.eq.s32.totalorder %v15404_v26, %v15360_v13  ;;  %vm15413_vm7 = vcmp.eq.s32.totalorder %v15406_v17, %v15360_v13  ;;  %v5266_v41 = vadd.f32 %v5265_v46, %v5264_v5 }
 0x209   : > { %v8439_v50 = vsel %vm15412_vm10, 1.0, %v14934_v8  ;;  %v8441_v42 = vsel %vm15413_vm7, 1.0, %v14934_v8  ;;  %v5280_v37 = vadd.f32 %v5279_v55, %v5278_v12  ;;  %v5272_v29 = vrot.slane %v5271_v49, 2 }
 0x20a   : > { %v5286_v34 = vrot.slane %v5285_v48, 2  ;;  %v5258_v18 = vmul.f32 %v8439_v50, %v13218_v39  ;;  %v5260_v44 = vmul.f32 %v8441_v42, %v13220_v22  ;;  %vm15414_vm8 = vcmp.eq.s32.totalorder %v15408_v54, %v15360_v13  ;;  %v13472_v54 = vpop.f32.mrf.mxu0 }
 0x20b   : > { %v8440_v32 = vsel %vm15414_vm8, 1.0, %v14934_v8  ;;  %vm15415_vm10 = vcmp.eq.s32.totalorder %v15410_v24, %v15360_v13  ;;  %v5267_v2 = vrot.slane %v5266_v41, 1  ;;  %v5281_v3 = vrot.slane %v5280_v37, 1 }
 0x20c   : > { %v8442_v57 = vsel %vm15415_vm10, 1.0, %v14934_v8  ;;  %v5273_v26 = vadd.f32 %v5272_v29, %v5271_v49  ;;  %v5287_v43 = vadd.f32 %v5286_v34, %v5285_v48  ;;  %v5290_v17 = vadd.f32 %v5258_v18, %v5250_v53  ;;  %v13496_v29 = vpop.f32.mrf.mxu0  ;;  %v13498_v34 = vpop.f32.mrf.mxu1 }
 0x20d   : > { %v5304_v15 = vadd.f32 %v5260_v44, %v5252_v23  ;;  %v5259_v39 = vmul.f32 %v8440_v32, %v13232_v10  ;;  %v5261_v22 = vmul.f32 %v8442_v57, %v13234_v61  ;;  %v5268_v5 = vadd.f32 %v5267_v2, %v5266_v41  ;;  %v15420_v2 = vld [vmem:[#allocation72_spill] sm:$0xff] }
 0x20e   : > { %v5282_v12 = vadd.f32 %v5281_v3, %v5280_v37  ;;  %v5274_v47 = vrot.slane %v5273_v26, 1  ;;  %v5288_v7 = vrot.slane %v5287_v43, 1  ;;  %v5291_v24 = vrot.slane %v5290_v17, 4 }
 0x20f   : > { %v5305_v0 = vrot.slane %v5304_v15, 4  ;;  %v5297_v46 = vadd.f32 %v5259_v39, %v5251_v27  ;;  %v5311_v55 = vadd.f32 %v5261_v22, %v5253_v16  ;;  %v13477_v49 = vadd.f32 %v5268_v5, %v13349_v28  ;;  %v15416_v27 = vld [vmem:[#allocation74_spill] sm:$0xff]  ;;  %v15424_v5 = vld [vmem:[#allocation83_spill] sm:$0xff] }
 0x210   : > { %v13480_v53 = vadd.f32 %v5282_v12, %v13352_v63  ;;  %v5275_v10 = vadd.f32 %v5274_v47, %v5273_v26  ;;  %v5289_v61 = vadd.f32 %v5288_v7, %v5287_v43  ;;  %v5292_v23 = vadd.f32 %v5291_v24, %v5290_v17  ;;  %v15418_v63 = vld [vmem:[#allocation75_spill] sm:$0xff]  ;;  %v15422_v26 = vld [vmem:[#allocation73_spill] sm:$0xff]  ;;  %v15425_v47 = vld [vmem:[#allocation84_spill] sm:$0xff]  ;;  %v13520_v24 = vpop.f32.mrf.mxu0 }
 0x211   : > { %v5306_v48 = vadd.f32 %v5305_v0, %v5304_v15  ;;  %v5298_v50 = vrot.slane %v5297_v46, 4  ;;  %v5312_v42 = vrot.slane %v5311_v55, 4  ;;  %vm15417_vm7 = vcmp.eq.s32.totalorder %v15416_v27, %v15372_v60  ;;  %v13522_v0 = vpop.f32.mrf.mxu1 }
 0x212   : > { %v13483_v41 = vadd.f32 %v5275_v10, %v13355_v35  ;;  %v13486_v37 = vadd.f32 %v5289_v61, %v13358_v62  ;;  %v8443_v28 = vsel %vm15417_vm7, 1.0, %v14934_v8  ;;  %vm15419_vm8 = vcmp.eq.s32.totalorder %v15418_v63, %v15372_v60 }
 0x213   : > { %v8445_v16 = vsel %vm15419_vm8, 1.0, %v14934_v8  ;;  %v5293_v18 = vrot.slane %v5292_v23, 2  ;;  %v5307_v35 = vrot.slane %v5306_v48, 2  ;;  %v5299_v44 = vadd.f32 %v5298_v50, %v5297_v46 }
 0x214   : > { %v5313_v32 = vadd.f32 %v5312_v42, %v5311_v55  ;;  %v5634_v62 = vmul.f32 %v8443_v28, %v13248_v9  ;;  %v5636_v57 = vmul.f32 %v8445_v16, %v13250_v6  ;;  %vm15421_vm10 = vcmp.eq.s32.totalorder %v15420_v2, %v15372_v60 }
 0x215   : > { %v8444_v3 = vsel %vm15421_vm10, 1.0, %v14934_v8  ;;  %vm15423_vm7 = vcmp.eq.s32.totalorder %v15422_v26, %v15372_v60  ;;  %v5294_v17 = vadd.f32 %v5293_v18, %v5292_v23  ;;  %v5308_v15 = vadd.f32 %v5307_v35, %v5306_v48  ;;  %v15428_v48 = vld [vmem:[#allocation86_spill] sm:$0xff] }
 0x216   : > { %v8446_v43 = vsel %vm15423_vm7, 1.0, %v14934_v8  ;;  %v5300_v39 = vrot.slane %v5299_v44, 2  ;;  %v5314_v22 = vrot.slane %v5313_v32, 2  ;;  %v5635_v12 = vmul.f32 %v8444_v3, %v15424_v5  ;;  %v15432_v3 = vld [vmem:[#allocation90_spill] sm:$0xff] }
 0x217   : > { %v5637_v9 = vmul.f32 %v8446_v43, %v15425_v47  ;;  %vm15426_vm8 = vcmp.eq.s32.totalorder %v15416_v27, %v15360_v13  ;;  %vm15427_vm10 = vcmp.eq.s32.totalorder %v15418_v63, %v15360_v13  ;;  %v5295_v46 = vrot.slane %v5294_v17, 1 }
 0x218   : > { %v8451_v6 = vsel %vm15426_vm8, 1.0, %v14934_v8  ;;  %v8453_v7 = vsel %vm15427_vm10, 1.0, %v14934_v8  ;;  %v5309_v55 = vrot.slane %v5308_v15, 1  ;;  %v5301_v10 = vadd.f32 %v5300_v39, %v5299_v44  ;;  %v13536_v39 = vpop.f32.mrf.mxu0 }
 0x219   : > { %v5315_v61 = vadd.f32 %v5314_v22, %v5313_v32  ;;  %v5642_v23 = vmul.f32 %v8451_v6, %v13274_v36  ;;  %v5644_v50 = vmul.f32 %v8453_v7, %v15428_v48  ;;  %vm15429_vm7 = vcmp.eq.s32.totalorder %v15420_v2, %v15360_v13  ;;  %v15431_v32 = vld [vmem:[#allocation88_spill] sm:$0xff]  ;;  %v13538_v22 = vpop.f32.mrf.mxu1 }
 0x21a   : > { %v8452_v42 = vsel %vm15429_vm7, 1.0, %v14934_v8  ;;  %vm15430_vm8 = vcmp.eq.s32.totalorder %v15422_v26, %v15360_v13  ;;  %v5296_v28 = vadd.f32 %v5295_v46, %v5294_v17  ;;  %v5310_v63 = vadd.f32 %v5309_v55, %v5308_v15  ;;  %15433 = vst [vmem:[#allocation103_spill] sm:$0xff] %v13538_v22  ;;  %v15434_v46 = vld [vmem:[#allocation78_spill] sm:$0xff] }
 0x21b   : > { %v8454_v27 = vsel %vm15430_vm8, 1.0, %v14934_v8  ;;  %v5302_v16 = vrot.slane %v5301_v10, 1  ;;  %v5316_v18 = vrot.slane %v5315_v61, 1  ;;  %v5650_v35 = vadd.f32 %v5642_v23, %v5634_v62  ;;  %v13560_v23 = vpop.f32.mrf.mxu0 }
 0x21c   : > { %v5664_v44 = vadd.f32 %v5644_v50, %v5636_v57  ;;  %v5643_v36 = vmul.f32 %v8452_v42, %v15431_v32  ;;  %v5645_v43 = vmul.f32 %v8454_v27, %v15432_v3  ;;  %v13541_v2 = vadd.f32 %v5296_v28, %v13413_v30  ;;  %15438 = vst [vmem:[#allocation107_spill] sm:$0xff] %v13560_v23  ;;  %v15441_v50 = vld [vmem:[#allocation96_spill] sm:$0xff] }
 0x21d   : > { %v13544_v26 = vadd.f32 %v5310_v63, %v13416_v33  ;;  %v5303_v17 = vadd.f32 %v5302_v16, %v5301_v10  ;;  %v5317_v15 = vadd.f32 %v5316_v18, %v5315_v61  ;;  %v5651_v5 = vrot.slane %v5650_v35, 4  ;;  %v15436_v33 = vld [vmem:[#allocation79_spill] sm:$0xff]  ;;  %v15442_v27 = vld [vmem:[#allocation76_spill] sm:$0xff]  ;;  %v15444_v63 = vld [vmem:[#allocation77_spill] sm:$0xff] }
 0x21e   : > { %v5665_v47 = vrot.slane %v5664_v44, 4  ;;  %v5657_v62 = vadd.f32 %v5643_v36, %v5635_v12  ;;  %v5671_v57 = vadd.f32 %v5645_v43, %v5637_v9  ;;  %vm15435_vm10 = vcmp.eq.s32.totalorder %v15434_v46, %v15372_v60  ;;  %v15446_v36 = vld [vmem:[#allocation97_spill] sm:$0xff]  ;;  %v15447_v43 = vld [vmem:[#allocation98_spill] sm:$0xff] }
 0x21f   : > { %v13547_v6 = vadd.f32 %v5303_v17, %v13419_v1  ;;  %v13550_v7 = vadd.f32 %v5317_v15, %v13422_v21  ;;  %v8447_v30 = vsel %vm15435_vm10, 1.0, %v14934_v8  ;;  %vm15437_vm7 = vcmp.eq.s32.totalorder %v15436_v33, %v15372_v60  ;;  %v13562_v1 = vpop.f32.mrf.mxu1  ;;  %v15440_v21 = vld [vmem:[#allocation95_spill] sm:$0xff] }
 0x220   : > { %v8449_v55 = vsel %vm15437_vm7, 1.0, %v14934_v8  ;;  %v5652_v10 = vadd.f32 %v5651_v5, %v5650_v35  ;;  %v5666_v61 = vadd.f32 %v5665_v47, %v5664_v44  ;;  %v5658_v12 = vrot.slane %v5657_v62, 4  ;;  %15439 = vst [vmem:[#allocation110_spill] sm:$0xff] %v13562_v1 }
 0x221   : > { %v5672_v9 = vrot.slane %v5671_v57, 4  ;;  %v5638_v48 = vmul.f32 %v8447_v30, %v15440_v21  ;;  %v5640_v42 = vmul.f32 %v8449_v55, %v15441_v50  ;;  %vm15443_vm8 = vcmp.eq.s32.totalorder %v15442_v27, %v15372_v60  ;;  %v15453_v50 = vld [vmem:[#allocation100_spill] sm:$0xff] }
 0x222   : > { %v8448_v28 = vsel %vm15443_vm8, 1.0, %v14934_v8  ;;  %vm15445_vm10 = vcmp.eq.s32.totalorder %v15444_v63, %v15372_v60  ;;  %v5653_v18 = vrot.slane %v5652_v10, 2  ;;  %v5667_v35 = vrot.slane %v5666_v61, 2 }
 0x223   : > { %v8450_v16 = vsel %vm15445_vm10, 1.0, %v14934_v8  ;;  %v5659_v44 = vadd.f32 %v5658_v12, %v5657_v62  ;;  %v5673_v32 = vadd.f32 %v5672_v9, %v5671_v57  ;;  %v5639_v3 = vmul.f32 %v8448_v28, %v15446_v36  ;;  %v13584_v62 = vpop.f32.mrf.mxu0  ;;  %v13586_v57 = vpop.f32.mrf.mxu1  ;;  %v15452_v12 = vld [vmem:[#allocation99_spill] sm:$0xff] }
 0x224   : > { %v5641_v17 = vmul.f32 %v8450_v16, %v15447_v43  ;;  %vm15448_vm7 = vcmp.eq.s32.totalorder %v15434_v46, %v15360_v13  ;;  %vm15449_vm8 = vcmp.eq.s32.totalorder %v15436_v33, %v15360_v13  ;;  %v5654_v47 = vadd.f32 %v5653_v18, %v5652_v10  ;;  %15450 = vst [vmem:[#allocation111_spill] sm:$0xff] %v13584_v62 }
 0x225   : > { %v8455_v15 = vsel %vm15448_vm7, 1.0, %v14934_v8  ;;  %v8457_v5 = vsel %vm15449_vm8, 1.0, %v14934_v8  ;;  %v5668_v30 = vadd.f32 %v5667_v35, %v5666_v61  ;;  %v5660_v55 = vrot.slane %v5659_v44, 2  ;;  %15451 = vst [vmem:[#allocation114_spill] sm:$0xff] %v13586_v57  ;;  %v13600_v57 = vpop.f32.mrf.mxu0  ;;  %v13602_v62 = vpop.f32.mrf.mxu1 }
 0x226   : > { %v5674_v21 = vrot.slane %v5673_v32, 2  ;;  %v5646_v9 = vmul.f32 %v8455_v15, %v15452_v12  ;;  %v5648_v28 = vmul.f32 %v8457_v5, %v15453_v50  ;;  %vm15454_vm10 = vcmp.eq.s32.totalorder %v15442_v27, %v15360_v13 }
 0x227   : > { %v8456_v46 = vsel %vm15454_vm10, 1.0, %v14934_v8  ;;  %vm15455_vm7 = vcmp.eq.s32.totalorder %v15444_v63, %v15360_v13  ;;  %v5655_v10 = vrot.slane %v5654_v47, 1  ;;  %v5669_v61 = vrot.slane %v5668_v30, 1 }
 0x228   : > { %v8458_v33 = vsel %vm15455_vm7, 1.0, %v14934_v8  ;;  %v5661_v16 = vadd.f32 %v5660_v55, %v5659_v44  ;;  %v5675_v18 = vadd.f32 %v5674_v21, %v5673_v32  ;;  %v5678_v35 = vadd.f32 %v5646_v9, %v5638_v48  ;;  %v13624_v9 = vpop.f32.mrf.mxu0 }
 0x229   : > { %v5692_v36 = vadd.f32 %v5648_v28, %v5640_v42  ;;  %v5647_v43 = vmul.f32 %v8456_v46, %v13340_v59  ;;  %v5649_v15 = vmul.f32 %v8458_v33, %v13342_v31  ;;  %v5656_v5 = vadd.f32 %v5655_v10, %v5654_v47 }
 0x22a   : > { %v5670_v12 = vadd.f32 %v5669_v61, %v5668_v30  ;;  %v5662_v50 = vrot.slane %v5661_v16, 1  ;;  %v5676_v27 = vrot.slane %v5675_v18, 1  ;;  %v5679_v63 = vrot.slane %v5678_v35, 4  ;;  %v15460_v61 = vld [vmem:[#allocation80_spill] sm:$0xff] }
 0x22b   : > { %v5693_v1 = vrot.slane %v5692_v36, 4  ;;  %v5685_v23 = vadd.f32 %v5647_v43, %v5639_v3  ;;  %v5699_v22 = vadd.f32 %v5649_v15, %v5641_v17  ;;  %v13605_v44 = vadd.f32 %v5656_v5, %v13477_v49  ;;  %v15456_v3 = vld [vmem:[#allocation87_spill] sm:$0xff] }
 0x22c   : > { %v13608_v48 = vadd.f32 %v5670_v12, %v13480_v53  ;;  %v5663_v59 = vadd.f32 %v5662_v50, %v5661_v16  ;;  %v5677_v31 = vadd.f32 %v5676_v27, %v5675_v18  ;;  %v5680_v42 = vadd.f32 %v5679_v63, %v5678_v35  ;;  %v15458_v53 = vld [vmem:[#allocation89_spill] sm:$0xff]  ;;  %v13648_v12 = vpop.f32.mrf.mxu0 }
 0x22d   : > { %v5694_v32 = vadd.f32 %v5693_v1, %v5692_v36  ;;  %v5686_v47 = vrot.slane %v5685_v23, 4  ;;  %v5700_v30 = vrot.slane %v5699_v22, 4  ;;  %vm15457_vm8 = vcmp.eq.s32.totalorder %v15456_v3, %v15372_v60  ;;  %v13626_v1 = vpop.f32.mrf.mxu1  ;;  %v15462_v18 = vld [vmem:[#allocation85_spill] sm:$0xff] }
 0x22e   : > { %v13611_v55 = vadd.f32 %v5663_v59, %v13483_v41  ;;  %v13614_v21 = vadd.f32 %v5677_v31, %v13486_v37  ;;  %v8459_v49 = vsel %vm15457_vm8, 1.0, %v14934_v8  ;;  %vm15459_vm10 = vcmp.eq.s32.totalorder %v15458_v53, %v15372_v60 }
 0x22f   : > { %v8461_v17 = vsel %vm15459_vm10, 1.0, %v14934_v8  ;;  %v5681_v28 = vrot.slane %v5680_v42, 2  ;;  %v5695_v41 = vrot.slane %v5694_v32, 2  ;;  %v5687_v46 = vadd.f32 %v5686_v47, %v5685_v23  ;;  %v13650_v50 = vpop.f32.mrf.mxu1 }
 0x230   : > { %v5701_v33 = vadd.f32 %v5700_v30, %v5699_v22  ;;  %v6022_v37 = vmul.f32 %v8459_v49, %v13344_v56  ;;  %v6024_v10 = vmul.f32 %v8461_v17, %v13346_v19  ;;  %vm15461_vm7 = vcmp.eq.s32.totalorder %v15460_v61, %v15372_v60 }
 0x231   : > { %v8460_v16 = vsel %vm15461_vm7, 1.0, %v14934_v8  ;;  %vm15463_vm8 = vcmp.eq.s32.totalorder %v15462_v18, %v15372_v60  ;;  %v5682_v36 = vadd.f32 %v5681_v28, %v5680_v42  ;;  %v5696_v43 = vadd.f32 %v5695_v41, %v5694_v32  ;;  %v13664_v28 = vpop.f32.mrf.mxu0  ;;  %v13666_v41 = vpop.f32.mrf.mxu1 }
 0x232   : > { %v8462_v35 = vsel %vm15463_vm8, 1.0, %v14934_v8  ;;  %v5688_v15 = vrot.slane %v5687_v46, 2  ;;  %v5702_v5 = vrot.slane %v5701_v33, 2  ;;  %v6023_v22 = vmul.f32 %v8460_v16, %v13368_v4 }
 0x233   : > { %v6025_v56 = vmul.f32 %v8462_v35, %v13370_v52  ;;  %vm15464_vm10 = vcmp.eq.s32.totalorder %v15456_v3, %v15360_v13  ;;  %vm15465_vm7 = vcmp.eq.s32.totalorder %v15458_v53, %v15360_v13  ;;  %v5683_v27 = vrot.slane %v5682_v36, 1 }
 0x234   : > { %v8467_v19 = vsel %vm15464_vm10, 1.0, %v14934_v8  ;;  %v8469_v23 = vsel %vm15465_vm7, 1.0, %v14934_v8  ;;  %v5697_v63 = vrot.slane %v5696_v43, 1  ;;  %v5689_v59 = vadd.f32 %v5688_v15, %v5687_v46 }
 0x235   : > { %v5703_v4 = vadd.f32 %v5702_v5, %v5701_v33  ;;  %v6030_v52 = vmul.f32 %v8467_v19, %v13392_v51  ;;  %v6032_v31 = vmul.f32 %v8469_v23, %v13394_v20  ;;  %vm15466_vm8 = vcmp.eq.s32.totalorder %v15460_v61, %v15360_v13  ;;  %v13688_v19 = vpop.f32.mrf.mxu0 }
 0x236   : > { %v8468_v42 = vsel %vm15466_vm8, 1.0, %v14934_v8  ;;  %vm15467_vm10 = vcmp.eq.s32.totalorder %v15462_v18, %v15360_v13  ;;  %v5684_v47 = vadd.f32 %v5683_v27, %v5682_v36  ;;  %v5698_v30 = vadd.f32 %v5697_v63, %v5696_v43  ;;  %v15468_v36 = vld [vmem:[#allocation93_spill] sm:$0xff]  ;;  %v15472_v27 = vld [vmem:[#allocation91_spill] sm:$0xff] }
 0x237   : > { %v8470_v32 = vsel %vm15467_vm10, 1.0, %v14934_v8  ;;  %v5690_v3 = vrot.slane %v5689_v59, 1  ;;  %v5704_v49 = vrot.slane %v5703_v4, 1  ;;  %v6038_v53 = vadd.f32 %v6030_v52, %v6022_v37 }
 0x238   : > { %v6052_v17 = vadd.f32 %v6032_v31, %v6024_v10  ;;  %v6031_v51 = vmul.f32 %v8468_v42, %v13408_v40  ;;  %v6033_v20 = vmul.f32 %v8470_v32, %v13410_v14  ;;  %v13669_v46 = vadd.f32 %v5684_v47, %v13541_v2 }
 0x239   : > { %v13672_v33 = vadd.f32 %v5698_v30, %v13544_v26  ;;  %v5691_v61 = vadd.f32 %v5690_v3, %v5689_v59  ;;  %v5705_v16 = vadd.f32 %v5704_v49, %v5703_v4  ;;  %v6039_v18 = vrot.slane %v6038_v53, 4  ;;  %v15470_v26 = vld [vmem:[#allocation94_spill] sm:$0xff]  ;;  %v15474_v59 = vld [vmem:[#allocation92_spill] sm:$0xff] }
 0x23a   : > { %v6053_v35 = vrot.slane %v6052_v17, 4  ;;  %v6045_v37 = vadd.f32 %v6031_v51, %v6023_v22  ;;  %v6059_v10 = vadd.f32 %v6033_v20, %v6025_v56  ;;  %vm15469_vm7 = vcmp.eq.s32.totalorder %v15468_v36, %v15372_v60  ;;  %v13712_v51 = vpop.f32.mrf.mxu0 }
 0x23b   : > { %v13675_v40 = vadd.f32 %v5691_v61, %v13547_v6  ;;  %v13678_v14 = vadd.f32 %v5705_v16, %v13550_v7  ;;  %v8463_v2 = vsel %vm15469_vm7, 1.0, %v14934_v8  ;;  %vm15471_vm8 = vcmp.eq.s32.totalorder %v15470_v26, %v15372_v60  ;;  %v13690_v6 = vpop.f32.mrf.mxu1 }
 0x23c   : > { %v8465_v43 = vsel %vm15471_vm8, 1.0, %v14934_v8  ;;  %v6040_v15 = vadd.f32 %v6039_v18, %v6038_v53  ;;  %v6054_v5 = vadd.f32 %v6053_v35, %v6052_v17  ;;  %v6046_v22 = vrot.slane %v6045_v37, 4 }
 0x23d   : > { %v6060_v56 = vrot.slane %v6059_v10, 4  ;;  %v6026_v7 = vmul.f32 %v8463_v2, %v13432_v25  ;;  %v6028_v23 = vmul.f32 %v8465_v43, %v13434_v45  ;;  %vm15473_vm10 = vcmp.eq.s32.totalorder %v15472_v27, %v15372_v60  ;;  %v13714_v20 = vpop.f32.mrf.mxu1 }
 0x23e   : > { %v8464_v63 = vsel %vm15473_vm10, 1.0, %v14934_v8  ;;  %vm15475_vm7 = vcmp.eq.s32.totalorder %v15474_v59, %v15372_v60  ;;  %v6041_v52 = vrot.slane %v6040_v15, 2  ;;  %v6055_v31 = vrot.slane %v6054_v5, 2 }
 0x23f   : > { %v8466_v4 = vsel %vm15475_vm7, 1.0, %v14934_v8  ;;  %v6047_v42 = vadd.f32 %v6046_v22, %v6045_v37  ;;  %v6061_v32 = vadd.f32 %v6060_v56, %v6059_v10  ;;  %v6027_v47 = vmul.f32 %v8464_v63, %v13456_v11  ;;  %v13728_v22 = vpop.f32.mrf.mxu0  ;;  %v13730_v56 = vpop.f32.mrf.mxu1 }
 0x240   : > { %v6029_v25 = vmul.f32 %v8466_v4, %v13458_v38  ;;  %vm15476_vm8 = vcmp.eq.s32.totalorder %v15468_v36, %v15360_v13  ;;  %vm15477_vm10 = vcmp.eq.s32.totalorder %v15470_v26, %v15360_v13  ;;  %v6042_v3 = vadd.f32 %v6041_v52, %v6040_v15 }
 0x241   : > { %v8471_v45 = vsel %vm15476_vm8, 1.0, %v14934_v8  ;;  %v8473_v30 = vsel %vm15477_vm10, 1.0, %v14934_v8  ;;  %v6056_v49 = vadd.f32 %v6055_v31, %v6054_v5  ;;  %v6048_v53 = vrot.slane %v6047_v42, 2 }
 0x242   : > { %v6062_v17 = vrot.slane %v6061_v32, 2  ;;  %v6034_v11 = vmul.f32 %v8471_v45, %v13472_v54  ;;  %v6036_v38 = vmul.f32 %v8473_v30, %v13474_v58  ;;  %vm15478_vm7 = vcmp.eq.s32.totalorder %v15472_v27, %v15360_v13 }
 0x243   : > { %v8472_v61 = vsel %vm15478_vm7, 1.0, %v14934_v8  ;;  %vm15479_vm8 = vcmp.eq.s32.totalorder %v15474_v59, %v15360_v13  ;;  %v6043_v18 = vrot.slane %v6042_v3, 1  ;;  %v6057_v35 = vrot.slane %v6056_v49, 1 }
 0x244   : > { %v8474_v16 = vsel %vm15479_vm8, 1.0, %v14934_v8  ;;  %v6049_v37 = vadd.f32 %v6048_v53, %v6047_v42  ;;  %v6063_v10 = vadd.f32 %v6062_v17, %v6061_v32  ;;  %v6066_v36 = vadd.f32 %v6034_v11, %v6026_v7 }
 0x245   : > { %v6080_v2 = vadd.f32 %v6036_v38, %v6028_v23  ;;  %v6035_v54 = vmul.f32 %v8472_v61, %v13496_v29  ;;  %v6037_v58 = vmul.f32 %v8474_v16, %v13498_v34  ;;  %v6044_v26 = vadd.f32 %v6043_v18, %v6042_v3  ;;  %v13752_v3 = vpop.f32.mrf.mxu0  ;;  %v15484_v61 = vld [vmem:[#allocation101_spill] sm:$0xff]  ;;  %v15486_v18 = vld [vmem:[#allocation102_spill] sm:$0xff] }
 0x246   : > { %v6058_v43 = vadd.f32 %v6057_v35, %v6056_v49  ;;  %v6050_v15 = vrot.slane %v6049_v37, 1  ;;  %v6064_v5 = vrot.slane %v6063_v10, 1  ;;  %v6067_v27 = vrot.slane %v6066_v36, 4  ;;  %v13754_v49 = vpop.f32.mrf.mxu1 }
 0x247   : > { %v6081_v63 = vrot.slane %v6080_v2, 4  ;;  %v6073_v59 = vadd.f32 %v6035_v54, %v6027_v47  ;;  %v6087_v4 = vadd.f32 %v6037_v58, %v6029_v25  ;;  %v13733_v52 = vadd.f32 %v6044_v26, %v13605_v44  ;;  %v15480_v47 = vld [vmem:[#allocation104_spill] sm:$0xff]  ;;  %v15488_v58 = vld [vmem:[#allocation103_spill] sm:$0xff] }
 0x248   : > { %v13736_v7 = vadd.f32 %v6058_v43, %v13608_v48  ;;  %v6051_v29 = vadd.f32 %v6050_v15, %v6049_v37  ;;  %v6065_v34 = vadd.f32 %v6064_v5, %v6063_v10  ;;  %v6068_v23 = vadd.f32 %v6067_v27, %v6066_v36  ;;  %v15482_v48 = vld [vmem:[#allocation105_spill] sm:$0xff]  ;;  %v13776_v43 = vpop.f32.mrf.mxu0  ;;  %v13778_v15 = vpop.f32.mrf.mxu1 }
 0x249   : > { %v6082_v31 = vadd.f32 %v6081_v63, %v6080_v2  ;;  %v6074_v42 = vrot.slane %v6073_v59, 4  ;;  %v6088_v32 = vrot.slane %v6087_v4, 4  ;;  %vm15481_vm10 = vcmp.eq.s32.totalorder %v15480_v47, %v15372_v60 }
 0x24a   : > { %v13739_v45 = vadd.f32 %v6051_v29, %v13611_v55  ;;  %v13742_v30 = vadd.f32 %v6065_v34, %v13614_v21  ;;  %v8475_v44 = vsel %vm15481_vm10, 1.0, %v14934_v8  ;;  %vm15483_vm7 = vcmp.eq.s32.totalorder %v15482_v48, %v15372_v60  ;;  %v15492_v29 = vld [vmem:[#allocation110_spill] sm:$0xff] }
 0x24b   : > { %v8477_v25 = vsel %vm15483_vm7, 1.0, %v14934_v8  ;;  %v6069_v53 = vrot.slane %v6068_v23, 2  ;;  %v6083_v55 = vrot.slane %v6082_v31, 2  ;;  %v6075_v17 = vadd.f32 %v6074_v42, %v6073_v59  ;;  %v15491_v59 = vld [vmem:[#allocation107_spill] sm:$0xff] }
 0x24c   : > { %v6089_v11 = vadd.f32 %v6088_v32, %v6087_v4  ;;  %v6410_v21 = vmul.f32 %v8475_v44, %v13520_v24  ;;  %v6412_v38 = vmul.f32 %v8477_v25, %v13522_v0  ;;  %vm15485_vm8 = vcmp.eq.s32.totalorder %v15484_v61, %v15372_v60 }
 0x24d   : > { %v8476_v16 = vsel %vm15485_vm8, 1.0, %v14934_v8  ;;  %vm15487_vm10 = vcmp.eq.s32.totalorder %v15486_v18, %v15372_v60  ;;  %v6070_v37 = vadd.f32 %v6069_v53, %v6068_v23  ;;  %v6084_v10 = vadd.f32 %v6083_v55, %v6082_v31  ;;  %v15495_v53 = vld [vmem:[#allocation111_spill] sm:$0xff] }
 0x24e   : > { %v8478_v35 = vsel %vm15487_vm10, 1.0, %v14934_v8  ;;  %v6076_v36 = vrot.slane %v6075_v17, 2  ;;  %v6090_v2 = vrot.slane %v6089_v11, 2  ;;  %v6411_v54 = vmul.f32 %v8476_v16, %v13536_v39  ;;  %v13792_v16 = vpop.f32.mrf.mxu0 }
 0x24f   : > { %v6413_v24 = vmul.f32 %v8478_v35, %v15488_v58  ;;  %vm15489_vm7 = vcmp.eq.s32.totalorder %v15480_v47, %v15360_v13  ;;  %vm15490_vm8 = vcmp.eq.s32.totalorder %v15482_v48, %v15360_v13  ;;  %v6071_v5 = vrot.slane %v6070_v37, 1 }
 0x250   : > { %v8483_v0 = vsel %vm15489_vm7, 1.0, %v14934_v8  ;;  %v8485_v26 = vsel %vm15490_vm8, 1.0, %v14934_v8  ;;  %v6085_v27 = vrot.slane %v6084_v10, 1  ;;  %v6077_v63 = vadd.f32 %v6076_v36, %v6075_v17  ;;  %v15496_v17 = vld [vmem:[#allocation114_spill] sm:$0xff] }
 0x251   : > { %v6091_v39 = vadd.f32 %v6090_v2, %v6089_v11  ;;  %v6418_v4 = vmul.f32 %v8483_v0, %v15491_v59  ;;  %v6420_v34 = vmul.f32 %v8485_v26, %v15492_v29  ;;  %vm15493_vm10 = vcmp.eq.s32.totalorder %v15484_v61, %v15360_v13  ;;  %v13794_v61 = vpop.f32.mrf.mxu1  ;;  %v13817_v26 = vpop.f32.mrf.mxu0 }
 0x252   : > { %v8484_v23 = vsel %vm15493_vm10, 1.0, %v14934_v8  ;;  %vm15494_vm7 = vcmp.eq.s32.totalorder %v15486_v18, %v15360_v13  ;;  %v6072_v42 = vadd.f32 %v6071_v5, %v6070_v37  ;;  %v6086_v32 = vadd.f32 %v6085_v27, %v6084_v10  ;;  %v15497_v27 = vld [vmem:[#allocation109_spill] sm:$0xff] }
 0x253   : > { %v8486_v31 = vsel %vm15494_vm7, 1.0, %v14934_v8  ;;  %v6078_v47 = vrot.slane %v6077_v63, 1  ;;  %v6092_v44 = vrot.slane %v6091_v39, 1  ;;  %v6426_v48 = vadd.f32 %v6418_v4, %v6410_v21  ;;  %v13819_v5 = vpop.f32.mrf.mxu1 }
 0x254   : > { %v6440_v25 = vadd.f32 %v6420_v34, %v6412_v38  ;;  %v6419_v55 = vmul.f32 %v8484_v23, %v15495_v53  ;;  %v6421_v11 = vmul.f32 %v8486_v31, %v15496_v17  ;;  %v13797_v35 = vadd.f32 %v6072_v42, %v13669_v46 }
 0x255   : > { %v13800_v18 = vadd.f32 %v6086_v32, %v13672_v33  ;;  %v6079_v37 = vadd.f32 %v6078_v47, %v6077_v63  ;;  %v6093_v10 = vadd.f32 %v6092_v44, %v6091_v39  ;;  %v6427_v21 = vrot.slane %v6426_v48, 4 }
 0x256   : > { %v6441_v36 = vrot.slane %v6440_v25, 4  ;;  %v6433_v38 = vadd.f32 %v6419_v55, %v6411_v54  ;;  %v6447_v2 = vadd.f32 %v6421_v11, %v6413_v24  ;;  %vm15498_vm8 = vcmp.eq.s32.totalorder %v15497_v27, %v15372_v60 }
 0x257   : > { %v13810_v46 = vadd.f32 %v6079_v37, %v13675_v40  ;;  %v13813_v33 = vadd.f32 %v6093_v10, %v13678_v14  ;;  %v6428_v58 = vadd.f32 %v6427_v21, %v6426_v48  ;;  %v8479_v40 = vsel %vm15498_vm8, 1.0, %v14934_v8  ;;  %v15499_v14 = vld [vmem:[#allocation112_spill] sm:$0xff] }
 0x258   : > { %v6442_v54 = vadd.f32 %v6441_v36, %v6440_v25  ;;  %v6434_v24 = vrot.slane %v6433_v38, 4  ;;  %v6448_v0 = vrot.slane %v6447_v2, 4  ;;  %vm15500_vm10 = vcmp.eq.s32.totalorder %v15499_v14, %v15372_v60 }
 0x259   : > { %v8481_v63 = vsel %vm15500_vm10, 1.0, %v14934_v8 }
 0x25a   : > { %9103 = shalt.err (!%p9100_p10)
}
 0x25b   : > { %s9104_s19 = scalar_lea.hbm %s13806_s29, 2048  ;;  %s9108_s5 = scalar_lea.hbm %s14451_s2, 4096 }
 0x25c   : > { %p9105_p5 = scmp.ne.s32.totalorder %s13806_s29, %s9104_s19  ;;  %p9109_p4 = scmp.lt.s32.totalorder %s13806_s29, %s14451_s2 }
 0x25d   : > { %p9110_p0 = scmp.lt.s32.totalorder %s9108_s5, %s9104_s19 }
 0x25e   : > { %p9106_p11 = pnand %p9105_p5, %p15501_p13 }
 0x25f   : > { %p9111_p1 = por %p9110_p0, %p9109_p4 }
 0x260   : > { %p9107_p6 = pneg %p9106_p11 }
 0x262   : > { %p9112_p12 = pnand %p9111_p1, %p9107_p6 }
 0x264   : > { %9115 = shalt.err (!%p9112_p12)
}
 0x265   : > { %s9201_s23 = smov 512   ;;  %s9202_s26 = smov 1024   ;;  %v6429_v39 = vrot.slane %v6428_v58, 2  ;;  %v6443_v59 = vrot.slane %v6442_v54, 2  ;;  %v15502_v4 = vld [vmem:[#allocation106_spill] sm:$0xff]  ;;  %v15504_v34 = vld [vmem:[#allocation108_spill] sm:$0xff]  ;;  %vm15506_vm10 = vcmp.eq.s32.totalorder %v15497_v27, %v15360_v13  ;;  %vm15507_vm4 = vcmp.eq.s32.totalorder %v15499_v14, %v15360_v13  ;;  %v13870_v25 = vpop.f32.mrf.mxu0  ;;  %v13872_v53 = vpop.f32.mrf.mxu1 }
 0x266   : > { %s9203_s9 = smov 32   ;;  %vm15503_vm7 = vcmp.eq.s32.totalorder %v15502_v4, %v15372_v60  ;;  %vm15505_vm8 = vcmp.eq.s32.totalorder %v15504_v34, %v15372_v60  ;;  %v8487_v31 = vsel %vm15506_vm10, 1.0, %v14934_v8  ;;  %v8489_v42 = vsel %vm15507_vm4, 1.0, %v14934_v8  ;;  %s8266_s20 = sshll.u32 %s9347_s4, 3 }
 0x267   : > { %8941 = dma.vmem_to_hbm [thread:$0]  (%p15501_p13), %s13815_s22, 2048, %s13806_s29, %s8108_s8, %s9201_s23, %s9202_s26, %s9203_s9   ;;  %v8480_v29 = vsel %vm15503_vm7, 1.0, %v14934_v8  ;;  %v8482_v23 = vsel %vm15505_vm8, 1.0, %v14934_v8  ;;  %v6435_v32 = vadd.f32 %v6434_v24, %v6433_v38  ;;  %v6449_v47 = vadd.f32 %v6448_v0, %v6447_v2  ;;  %v13888_v2 = vpop.f32.mrf.mxu0  ;;  %v13890_v24 = vpop.f32.mrf.mxu1 }
 0x268   : > { %v6414_v44 = vmul.f32 %v8479_v40, %v13600_v57  ;;  %v6416_v48 = vmul.f32 %v8481_v63, %v13602_v62  ;;  %v6422_v55 = vmul.f32 %v8487_v31, %v13648_v12  ;;  %v6424_v17 = vmul.f32 %v8489_v42, %v13650_v50  ;;  %s214_s29 = scalar_lea.vmem [#allocation8], %s8266_s20  ;;  %s8934_s22 = sshll.u32 %s9246_s16, 7 }
 0x269   : > { %vm15508_vm7 = vcmp.eq.s32.totalorder %v15502_v4, %v15360_v13  ;;  %vm15509_vm4 = vcmp.eq.s32.totalorder %v15504_v34, %v15360_v13  ;;  %v6430_v37 = vadd.f32 %v6429_v39, %v6428_v58  ;;  %v6444_v62 = vadd.f32 %v6443_v59, %v6442_v54  ;;  %v13902_v31 = vpop.f32.mrf.mxu1  ;;  %s8143_s8 = sshll.u32 %s214_s29, 4  ;;  %s8141_s11 = scalar_lea.hbm %s14452_s3, %s8934_s22  ;;  %s8144_s8 = int_to_ptr.vmem [resolvable:$true] %s8143_s8 }
 0x26a   : > { %v8488_v11 = vsel %vm15508_vm7, 1.0, %v14934_v8  ;;  %v8490_v57 = vsel %vm15509_vm4, 1.0, %v14934_v8  ;;  %v6415_v10 = vmul.f32 %v8480_v29, %v13624_v9  ;;  %v6417_v21 = vmul.f32 %v8482_v23, %v13626_v1  ;;  %v15511_v29 = vld [vmem:[#allocation118_spill] sm:$0xff]  ;;  %v13900_v23 = vpop.f32.mrf.mxu0  ;;  %s8113_s17 = scalar_lea.sflag [#allocation9], %s9347_s4  ;;  %s9116_s19 = scalar_lea.vmem %s8144_s8, 128 }
 0x26b   : > { %v6454_v36 = vadd.f32 %v6422_v55, %v6414_v44  ;;  %v6468_v12 = vadd.f32 %v6424_v17, %v6416_v48  ;;  %v6423_v50 = vmul.f32 %v8488_v11, %v13664_v28  ;;  %v6425_v38 = vmul.f32 %v8490_v57, %v13666_v41  ;;  %v15510_v28 = vld [vmem:[#allocation117_spill] sm:$0xff]  ;;  %p9117_p2 = scmp.ne.s32.totalorder %s8144_s8, %s9116_s19  ;;  %s9204_s27 = smov [#allocation8]  }
 0x26c   : > { %v6431_v58 = vrot.slane %v6430_v37, 1  ;;  %v6445_v54 = vrot.slane %v6444_v62, 1  ;;  %v6436_v63 = vrot.slane %v6435_v32, 2  ;;  %v6450_v9 = vrot.slane %v6449_v47, 2  ;;  %s9120_s16 = sshll.u32 %s9204_s27, 4  ;;  %s9121_s16 = int_to_ptr.vmem [resolvable:$false] %s9120_s16 }
 0x26d   : > { %v6455_v0 = vrot.slane %v6454_v36, 4  ;;  %v6469_v27 = vrot.slane %v6468_v12, 4  ;;  %v6461_v40 = vadd.f32 %v6423_v50, %v6415_v10  ;;  %v6475_v14 = vadd.f32 %v6425_v38, %v6417_v21  ;;  %v15512_v38 = vld [vmem:[#allocation113_spill] sm:$0xff]  ;;  %p9118_p3 = pnand %p9117_p2, %p15501_p13  ;;  %s9122_s28 = scalar_lea.vmem %s9121_s16, 256 }
 0x26e   : > { %v8491_v41 = vsel %vm1267_vm1, 1.0, %v14934_v8  ;;  %v8493_v34 = vsel %vm1269_vm11, 1.0, %v14934_v8  ;;  %v13904_v17 = vadd.f32 %v6431_v58, %v6430_v37  ;;  %v13906_v11 = vadd.f32 %v6445_v54, %v6444_v62  ;;  %v15513_v37 = vld [vmem:[#allocation116_spill] sm:$0xff]  ;;  %p9123_p8 = scmp.lt.s32.totalorder %s8144_s8, %s9121_s16  ;;  %p9124_p9 = scmp.lt.s32.totalorder %s9122_s28, %s9116_s19 }
 0x26f   : > { %v6456_v39 = vadd.f32 %v6455_v0, %v6454_v36  ;;  %v6470_v1 = vadd.f32 %v6469_v27, %v6468_v12  ;;  %v6462_v59 = vrot.slane %v6461_v40, 4  ;;  %v6476_v4 = vrot.slane %v6475_v14, 4  ;;  %p9119_p7 = pneg %p9118_p3 }
 0x270   : > { %v13908_v57 = vadd.f32 %v6436_v63, %v6435_v32  ;;  %v13910_v10 = vadd.f32 %v6450_v9, %v6449_v47  ;;  %v6798_v12 = vmul.f32 %v8491_v41, %v13688_v19  ;;  %v6800_v50 = vmul.f32 %v8493_v34, %v13690_v6  ;;  %v13930_v6 = vpop.f32.mrf.mxu0  ;;  %v13932_v47 = vpop.f32.mrf.mxu1  ;;  %p9125_p10 = por %p9124_p9, %p9123_p8 }
 0x271   : > { %v6457_v42 = vrot.slane %v6456_v39, 2  ;;  %v6471_v44 = vrot.slane %v6470_v1, 2  ;;  %v6463_v48 = vadd.f32 %v6462_v59, %v6461_v40  ;;  %v6477_v55 = vadd.f32 %v6476_v4, %v6475_v14 }
 0x272   : > { %v8492_v0 = vsel %vm1268_vm12, 1.0, %v14934_v8  ;;  %vm15514_vm11 = vcmp.eq.s32.totalorder %v15513_v37, %v15372_v60  ;;  %vm15515_vm1 = vcmp.eq.s32.totalorder %v15510_v28, %v15360_v13  ;;  %vm15516_vm8 = vcmp.eq.s32.totalorder %v15511_v29, %v15360_v13  ;;  %v13948_v34 = vpop.f32.mrf.mxu0  ;;  %p9126_p5 = pnand %p9125_p10, %p9119_p7 }
 0x273   : > { %v6458_v21 = vadd.f32 %v6457_v42, %v6456_v39  ;;  %v6472_v36 = vadd.f32 %v6471_v44, %v6470_v1  ;;  %v8494_v62 = vsel %vm15514_vm11, 1.0, %v14934_v8  ;;  %v8499_v32 = vsel %vm15515_vm1, 1.0, %v14934_v8  ;;  %v13950_v42 = vpop.f32.mrf.mxu1 }
 0x274   : > { %v8501_v19 = vsel %vm15516_vm8, 1.0, %v14934_v8  ;;  %v6464_v14 = vrot.slane %v6463_v48, 2  ;;  %v6478_v58 = vrot.slane %v6477_v55, 2  ;;  %v6806_v54 = vmul.f32 %v8499_v32, %v13728_v22 }
 0x275   : > { %v6459_v27 = vrot.slane %v6458_v21, 1  ;;  %v6473_v40 = vrot.slane %v6472_v36, 1  ;;  %v6808_v63 = vmul.f32 %v8501_v19, %v13730_v56  ;;  %vm15517_vm12 = vcmp.eq.s32.totalorder %v15512_v38, %v15360_v13  ;;  %v13968_v19 = vpop.f32.mrf.mxu0 }
 0x276   : > { %v8500_v9 = vsel %vm15517_vm12, 1.0, %v14934_v8  ;;  %vm15518_vm10 = vcmp.eq.s32.totalorder %v15513_v37, %v15360_v13  ;;  %v6799_v4 = vmul.f32 %v8492_v0, %v13712_v51  ;;  %v6801_v28 = vmul.f32 %v8494_v62, %v13714_v20  ;;  %v15520_v0 = vld [vmem:[#allocation125_spill] sm:$0xff] }
 0x277   : > { %v8502_v39 = vsel %vm15518_vm10, 1.0, %v14934_v8  ;;  %v6460_v1 = vadd.f32 %v6459_v27, %v6458_v21  ;;  %v6474_v59 = vadd.f32 %v6473_v40, %v6472_v36  ;;  %v6814_v41 = vadd.f32 %v6806_v54, %v6798_v12  ;;  %v13970_v27 = vpop.f32.mrf.mxu1 }
 0x278   : > { %v6828_v22 = vadd.f32 %v6808_v63, %v6800_v50  ;;  %v6807_v56 = vmul.f32 %v8500_v9, %v13752_v3  ;;  %v6809_v29 = vmul.f32 %v8502_v39, %v13754_v49  ;;  %v6465_v36 = vadd.f32 %v6464_v14, %v6463_v48  ;;  %v15526_v63 = vld [vmem:[#allocation124_spill] sm:$0xff] }
 0x279   : > { %v13953_v44 = vadd.f32 %v6460_v1, %v13797_v35  ;;  %v13956_v21 = vadd.f32 %v6474_v59, %v13800_v18  ;;  %v6479_v51 = vadd.f32 %v6478_v58, %v6477_v55  ;;  %v6815_v38 = vrot.slane %v6814_v41, 4  ;;  %v15522_v35 = vld [vmem:[#allocation126_spill] sm:$0xff]  ;;  %v15524_v58 = vld [vmem:[#allocation120_spill] sm:$0xff] }
 0x27a   : > { %v6829_v20 = vrot.slane %v6828_v22, 4  ;;  %v6821_v12 = vadd.f32 %v6807_v56, %v6799_v4  ;;  %v6835_v50 = vadd.f32 %v6809_v29, %v6801_v28  ;;  %v6438_v3 = vrot.slane %v13908_v57, 1 }
 0x27b   : > { %15519 = vst [vmem:[#allocation115_spill] sm:$0xff] %v13956_v21  ;;  %v6452_v49 = vrot.slane %v13910_v10, 1  ;;  %vm15521_vm7 = vcmp.eq.s32.totalorder %v15520_v0, %v15372_v60  ;;  %vm15523_vm4 = vcmp.eq.s32.totalorder %v15522_v35, %v15372_v60  ;;  %v6816_v48 = vadd.f32 %v6815_v38, %v6814_v41 }
 0x27c   : > { %v8495_v37 = vsel %vm15521_vm7, 1.0, %v14934_v8  ;;  %v8497_v18 = vsel %vm15523_vm4, 1.0, %v14934_v8  ;;  %v6830_v55 = vadd.f32 %v6829_v20, %v6828_v22  ;;  %v6822_v62 = vrot.slane %v6821_v12, 4 }
 0x27d   : > { %v6836_v32 = vrot.slane %v6835_v50, 4  ;;  %v6466_v40 = vrot.slane %v6465_v36, 1  ;;  %v6480_v14 = vrot.slane %v6479_v51, 1  ;;  %vm15525_vm11 = vcmp.eq.s32.totalorder %v15524_v58, %v15372_v60 }
 0x27e   : > { %v8496_v54 = vsel %vm15525_vm11, 1.0, %v14934_v8  ;;  %vm15527_vm1 = vcmp.eq.s32.totalorder %v15526_v63, %v15372_v60  ;;  %v6817_v39 = vrot.slane %v6816_v48, 2  ;;  %v6831_v1 = vrot.slane %v6830_v55, 2 }
 0x27f   : > { %v8498_v9 = vsel %vm15527_vm1, 1.0, %v14934_v8  ;;  %v6823_v59 = vadd.f32 %v6822_v62, %v6821_v12  ;;  %v6837_v4 = vadd.f32 %v6836_v32, %v6835_v50  ;;  %v6802_v28 = vmul.f32 %v8495_v37, %v13776_v43  ;;  %v13992_v50 = vpop.f32.mrf.mxu0  ;;  %v13994_v43 = vpop.f32.mrf.mxu1 }
 0x280   : > { %v6804_v41 = vmul.f32 %v8497_v18, %v13778_v15  ;;  %vm15528_vm8 = vcmp.eq.s32.totalorder %v15520_v0, %v15360_v13  ;;  %vm15529_vm12 = vcmp.eq.s32.totalorder %v15522_v35, %v15360_v13  ;;  %v6818_v29 = vadd.f32 %v6817_v39, %v6816_v48 }
 0x281   : > { %v8503_v22 = vsel %vm15528_vm8, 1.0, %v14934_v8  ;;  %v8505_v56 = vsel %vm15529_vm12, 1.0, %v14934_v8  ;;  %v6832_v38 = vadd.f32 %v6831_v1, %v6830_v55  ;;  %v6803_v20 = vmul.f32 %v8496_v54, %v13792_v16  ;;  %v14010_v39 = vpop.f32.mrf.mxu0 }
 0x282   : > { %v6805_v12 = vmul.f32 %v8498_v9, %v13794_v61  ;;  %v6810_v15 = vmul.f32 %v8503_v22, %v13817_v26  ;;  %v6812_v0 = vmul.f32 %v8505_v56, %v13819_v5  ;;  %vm15530_vm10 = vcmp.eq.s32.totalorder %v15524_v58, %v15360_v13 }
 0x283   : > { %v8504_v37 = vsel %vm15530_vm10, 1.0, %v14934_v8  ;;  %vm15531_vm7 = vcmp.eq.s32.totalorder %v15526_v63, %v15360_v13  ;;  %v6819_v35 = vrot.slane %v6818_v29, 1  ;;  %v6833_v61 = vrot.slane %v6832_v38, 1  ;;  %v14012_v63 = vpop.f32.mrf.mxu1 }
 0x284   : > { %v8506_v16 = vsel %vm15531_vm7, 1.0, %v14934_v8  ;;  %v6824_v18 = vrot.slane %v6823_v59, 2  ;;  %v6838_v48 = vrot.slane %v6837_v4, 2  ;;  %v6842_v55 = vadd.f32 %v6810_v15, %v6802_v28 }
 0x285   : > { %v6856_v62 = vadd.f32 %v6812_v0, %v6804_v41  ;;  %v6811_v26 = vmul.f32 %v8504_v37, %v13870_v25  ;;  %v6813_v5 = vmul.f32 %v8506_v16, %v13872_v53  ;;  %v6439_v32 = vadd.f32 %v6438_v3, %v13908_v57  ;;  %v15538_v16 = vld [vmem:[#allocation129_spill] sm:$0xff] }
 0x286   : > { %v6453_v58 = vadd.f32 %v6452_v49, %v13910_v10  ;;  %v6467_v54 = vadd.f32 %v6466_v40, %v6465_v36  ;;  %v6481_v9 = vadd.f32 %v6480_v14, %v6479_v51  ;;  %v6843_v1 = vrot.slane %v6842_v55, 4  ;;  %v14024_v49 = vpop.f32.mrf.mxu0  ;;  %v14026_v40 = vpop.f32.mrf.mxu1 }
 0x287   : > { %v6857_v22 = vrot.slane %v6856_v62, 4  ;;  %v6849_v56 = vadd.f32 %v6811_v26, %v6803_v20  ;;  %v6863_v21 = vadd.f32 %v6813_v5, %v6805_v12  ;;  %v6820_v28 = vadd.f32 %v6819_v35, %v6818_v29 }
 0x288   : > { %v6834_v41 = vadd.f32 %v6833_v61, %v6832_v38  ;;  %v6825_v15 = vadd.f32 %v6824_v18, %v6823_v59  ;;  %v6839_v25 = vadd.f32 %v6838_v48, %v6837_v4  ;;  %v6844_v0 = vadd.f32 %v6843_v1, %v6842_v55  ;;  %v14062_v48 = vpop.f32.mrf.mxu0  ;;  %v14064_v55 = vpop.f32.mrf.mxu1 }
 0x289   : > { %v6858_v53 = vadd.f32 %v6857_v22, %v6856_v62  ;;  %v6850_v37 = vrot.slane %v6849_v56, 4  ;;  %v6864_v57 = vrot.slane %v6863_v21, 4  ;;  %v6482_v10 = vadd.f32 %v13904_v17, %v13733_v52 }
 0x28a   : > { %v6484_v36 = vadd.f32 %v13906_v11, %v13736_v7  ;;  %v14019_v51 = vadd.f32 %v6439_v32, %v13739_v45  ;;  %v14022_v3 = vadd.f32 %v6453_v58, %v13742_v30  ;;  %v14029_v14 = vadd.f32 %v6467_v54, %v13810_v46  ;;  %v15532_v45 = vld [vmem:[#allocation131_spill] sm:$0xff] }
 0x28b   : > { %v14032_v59 = vadd.f32 %v6481_v9, %v13813_v33  ;;  %v6851_v52 = vadd.f32 %v6850_v37, %v6849_v56  ;;  %v6865_v17 = vadd.f32 %v6864_v57, %v6863_v21  ;;  %v6826_v4 = vrot.slane %v6825_v15, 1  ;;  %v15534_v11 = vld [vmem:[#allocation135_spill] sm:$0xff]  ;;  %v15536_v21 = vld [vmem:[#allocation128_spill] sm:$0xff]  ;;  %v14082_v37 = vpop.f32.mrf.mxu0  ;;  %v14084_v57 = vpop.f32.mrf.mxu1 }
 0x28c   : > { %v6840_v7 = vrot.slane %v6839_v25, 1  ;;  %vm15533_vm4 = vcmp.eq.s32.totalorder %v15532_v45, %v15372_v60  ;;  %vm15535_vm11 = vcmp.eq.s32.totalorder %v15534_v11, %v15372_v60  ;;  %v14042_v38 = vadd.f32 %v6820_v28, %v6482_v10 }
 0x28d   : > { %v8507_v30 = vsel %vm15533_vm4, 1.0, %v14934_v8  ;;  %v8509_v29 = vsel %vm15535_vm11, 1.0, %v14934_v8  ;;  %v14044_v46 = vadd.f32 %v6834_v41, %v6484_v36  ;;  %v6845_v33 = vrot.slane %v6844_v0, 2 }
 0x28e   : > { %v6859_v20 = vrot.slane %v6858_v53, 2  ;;  %vm15537_vm1 = vcmp.eq.s32.totalorder %v15536_v21, %v15372_v60  ;;  %vm15539_vm8 = vcmp.eq.s32.totalorder %v15538_v16, %v15372_v60  ;;  %vm15540_vm12 = vcmp.eq.s32.totalorder %v15532_v45, %v15360_v13 }
 0x28f   : > { %v8508_v12 = vsel %vm15537_vm1, 1.0, %v14934_v8  ;;  %v8510_v35 = vsel %vm15539_vm8, 1.0, %v14934_v8  ;;  %v8515_v61 = vsel %vm15540_vm12, 1.0, %v14934_v8  ;;  %vm15541_vm10 = vcmp.eq.s32.totalorder %v15534_v11, %v15360_v13 }
 0x290   : > { %v8517_v18 = vsel %vm15541_vm10, 1.0, %v14934_v8  ;;  %v6852_v62 = vrot.slane %v6851_v52, 2  ;;  %v6866_v26 = vrot.slane %v6865_v17, 2  ;;  %v7186_v5 = vmul.f32 %v8507_v30, %v13888_v2 }
 0x291   : > { %v7188_v32 = vmul.f32 %v8509_v29, %v13890_v24  ;;  %v7194_v58 = vmul.f32 %v8515_v61, %v13930_v6  ;;  %v7196_v54 = vmul.f32 %v8517_v18, %v13932_v47  ;;  %vm15542_vm7 = vcmp.eq.s32.totalorder %v15536_v21, %v15360_v13  ;;  %v15550_v61 = vld [vmem:[#allocation139_spill] sm:$0xff] }
 0x292   : > { %v8516_v9 = vsel %vm15542_vm7, 1.0, %v14934_v8  ;;  %vm15543_vm4 = vcmp.eq.s32.totalorder %v15538_v16, %v15360_v13  ;;  %v6846_v22 = vadd.f32 %v6845_v33, %v6844_v0  ;;  %v6860_v56 = vadd.f32 %v6859_v20, %v6858_v53  ;;  %v15546_v33 = vld [vmem:[#allocation141_spill] sm:$0xff]  ;;  %v14100_v20 = vpop.f32.mrf.mxu1  ;;  %v15548_v16 = vld [vmem:[#allocation136_spill] sm:$0xff] }
 0x293   : > { %v8518_v1 = vsel %vm15543_vm4, 1.0, %v14934_v8  ;;  %v7187_v2 = vmul.f32 %v8508_v12, %v13900_v23  ;;  %v7189_v24 = vmul.f32 %v8510_v35, %v13902_v31  ;;  %v7202_v28 = vadd.f32 %v7194_v58, %v7186_v5 }
 0x294   : > { %v7216_v6 = vadd.f32 %v7196_v54, %v7188_v32  ;;  %v7195_v47 = vmul.f32 %v8516_v9, %v13948_v34  ;;  %v7197_v41 = vmul.f32 %v8518_v1, %v13950_v42  ;;  %v14086_v10 = vadd.f32 %v6826_v4, %v6825_v15  ;;  %v15544_v34 = vld [vmem:[#allocation140_spill] sm:$0xff] }
 0x295   : > { %v14088_v36 = vadd.f32 %v6840_v7, %v6839_v25  ;;  %v6853_v0 = vadd.f32 %v6852_v62, %v6851_v52  ;;  %v6867_v53 = vadd.f32 %v6866_v26, %v6865_v17  ;;  %v7203_v45 = vrot.slane %v7202_v28, 4  ;;  %v14098_v7 = vpop.f32.mrf.mxu0 }
 0x296   : > { %v7217_v23 = vrot.slane %v7216_v6, 4  ;;  %v7209_v30 = vadd.f32 %v7195_v47, %v7187_v2  ;;  %v7223_v31 = vadd.f32 %v7197_v41, %v7189_v24  ;;  %v6847_v11 = vrot.slane %v6846_v22, 1 }
 0x297   : > { %v6861_v29 = vrot.slane %v6860_v56, 1  ;;  %vm15545_vm11 = vcmp.eq.s32.totalorder %v15544_v34, %v15372_v60  ;;  %vm15547_vm1 = vcmp.eq.s32.totalorder %v15546_v33, %v15372_v60  ;;  %v7204_v25 = vadd.f32 %v7203_v45, %v7202_v28  ;;  %v14122_v47 = vpop.f32.mrf.mxu0 }
 0x298   : > { %v8511_v42 = vsel %vm15545_vm11, 1.0, %v14934_v8  ;;  %v8513_v15 = vsel %vm15547_vm1, 1.0, %v14934_v8  ;;  %v7218_v4 = vadd.f32 %v7217_v23, %v7216_v6  ;;  %v7210_v52 = vrot.slane %v7209_v30, 4 }
 0x299   : > { %v7224_v17 = vrot.slane %v7223_v31, 4  ;;  %v6854_v21 = vrot.slane %v6853_v0, 1  ;;  %v6868_v12 = vrot.slane %v6867_v53, 1  ;;  %vm15549_vm8 = vcmp.eq.s32.totalorder %v15548_v16, %v15372_v60 }
 0x29a   : > { %v8512_v35 = vsel %vm15549_vm8, 1.0, %v14934_v8  ;;  %vm15551_vm12 = vcmp.eq.s32.totalorder %v15550_v61, %v15372_v60  ;;  %v7205_v62 = vrot.slane %v7204_v25, 2  ;;  %v7219_v26 = vrot.slane %v7218_v4, 2 }
 0x29b   : > { %v8514_v18 = vsel %vm15551_vm12, 1.0, %v14934_v8  ;;  %v7211_v5 = vadd.f32 %v7210_v52, %v7209_v30  ;;  %v7225_v32 = vadd.f32 %v7224_v17, %v7223_v31  ;;  %v7190_v58 = vmul.f32 %v8511_v42, %v13968_v19  ;;  %v14124_v19 = vpop.f32.mrf.mxu1  ;;  %v14138_v52 = vpop.f32.mrf.mxu0 }
 0x29c   : > { %v7192_v54 = vmul.f32 %v8513_v15, %v13970_v27  ;;  %vm15552_vm10 = vcmp.eq.s32.totalorder %v15544_v34, %v15360_v13  ;;  %vm15553_vm7 = vcmp.eq.s32.totalorder %v15546_v33, %v15360_v13  ;;  %v7206_v2 = vadd.f32 %v7205_v62, %v7204_v25 }
 0x29d   : > { %v8519_v9 = vsel %vm15552_vm10, 1.0, %v14934_v8  ;;  %v8521_v1 = vsel %vm15553_vm7, 1.0, %v14934_v8  ;;  %v7220_v24 = vadd.f32 %v7219_v26, %v7218_v4  ;;  %v7191_v28 = vmul.f32 %v8512_v35, %v13992_v50  ;;  %v14140_v17 = vpop.f32.mrf.mxu1 }
 0x29e   : > { %v7193_v6 = vmul.f32 %v8514_v18, %v13994_v43  ;;  %v7198_v27 = vmul.f32 %v8519_v9, %v14010_v39  ;;  %v7200_v41 = vmul.f32 %v8521_v1, %v14012_v63  ;;  %vm15554_vm4 = vcmp.eq.s32.totalorder %v15548_v16, %v15360_v13 }
 0x29f   : > { %v8520_v45 = vsel %vm15554_vm4, 1.0, %v14934_v8  ;;  %vm15555_vm11 = vcmp.eq.s32.totalorder %v15550_v61, %v15360_v13  ;;  %v7207_v23 = vrot.slane %v7206_v2, 1  ;;  %v7221_v43 = vrot.slane %v7220_v24, 1 }
 0x2a0   : > { %v8522_v50 = vsel %vm15555_vm11, 1.0, %v14934_v8  ;;  %v7212_v30 = vrot.slane %v7211_v5, 2  ;;  %v7226_v31 = vrot.slane %v7225_v32, 2  ;;  %v7230_v34 = vadd.f32 %v7198_v27, %v7190_v58  ;;  %v15559_v27 = vld [vmem:[#allocation143_spill] sm:$0xff] }
 0x2a1   : > { %v7244_v42 = vadd.f32 %v7200_v41, %v7192_v54  ;;  %v7199_v39 = vmul.f32 %v8520_v45, %v14024_v49  ;;  %v7201_v63 = vmul.f32 %v8522_v50, %v14026_v40  ;;  %v6848_v33 = vadd.f32 %v6847_v11, %v6846_v22  ;;  %v15560_v45 = vld [vmem:[#allocation144_spill] sm:$0xff] }
 0x2a2   : > { %v6862_v15 = vadd.f32 %v6861_v29, %v6860_v56  ;;  %v6855_v25 = vadd.f32 %v6854_v21, %v6853_v0  ;;  %v6869_v4 = vadd.f32 %v6868_v12, %v6867_v53  ;;  %v7231_v16 = vrot.slane %v7230_v34, 4  ;;  %v15556_v53 = vld [vmem:[#allocation115_spill] sm:$0xff]  ;;  %v14156_v29 = vpop.f32.mrf.mxu0  ;;  %v14158_v21 = vpop.f32.mrf.mxu1 }
 0x2a3   : > { %v7245_v35 = vrot.slane %v7244_v42, 4  ;;  %v7237_v61 = vadd.f32 %v7199_v39, %v7191_v28  ;;  %v7251_v18 = vadd.f32 %v7201_v63, %v7193_v6  ;;  %v7208_v62 = vadd.f32 %v7207_v23, %v7206_v2  ;;  %v15558_v2 = vld [vmem:[#allocation146_spill] sm:$0xff] }
 0x2a4   : > { %v7222_v26 = vadd.f32 %v7221_v43, %v7220_v24  ;;  %v7213_v58 = vadd.f32 %v7212_v30, %v7211_v5  ;;  %v7227_v54 = vadd.f32 %v7226_v31, %v7225_v32  ;;  %v7232_v9 = vadd.f32 %v7231_v16, %v7230_v34  ;;  %v7492_v23 = vpop.f32.mrf.mxu0  ;;  %v7569_v43 = vpop.f32.mrf.mxu1 }
 0x2a5   : > { %v7246_v49 = vadd.f32 %v7245_v35, %v7244_v42  ;;  %v7238_v1 = vrot.slane %v7237_v61, 4  ;;  %v7252_v40 = vrot.slane %v7251_v18, 4  ;;  %v14144_v22 = vadd.f32 %v14086_v10, %v14019_v51 }
 0x2a6   : > { %v14148_v56 = vadd.f32 %v14088_v36, %v14022_v3  ;;  %v14151_v0 = vadd.f32 %v6848_v33, %v13953_v44  ;;  %v14154_v11 = vadd.f32 %v6862_v15, %v15556_v53  ;;  %v14161_v12 = vadd.f32 %v6855_v25, %v14029_v14  ;;  %v15557_v44 = vld [vmem:[#allocation145_spill] sm:$0xff] }
 0x2a7   : > { %v14164_v51 = vadd.f32 %v6869_v4, %v14032_v59  ;;  %v7233_v10 = vrot.slane %v7232_v9, 2  ;;  %v7247_v5 = vrot.slane %v7246_v49, 2  ;;  %v7214_v3 = vrot.slane %v7213_v58, 1 }
 0x2a8   : > { %v7228_v36 = vrot.slane %v7227_v54, 1  ;;  %v8523_v32 = vsel %vm1299_vm0, 1.0, %v14934_v8  ;;  %v8525_v24 = vsel %vm1301_vm9, 1.0, %v14934_v8  ;;  %v14175_v14 = vadd.f32 %v7208_v62, %v14042_v38 }
 0x2a9   : > { %v14178_v59 = vadd.f32 %v7222_v26, %v14044_v46  ;;  %v7239_v28 = vadd.f32 %v7238_v1, %v7237_v61  ;;  %v7253_v6 = vadd.f32 %v7252_v40, %v7251_v18  ;;  %v8524_v41 = vsel %vm1300_vm14, 1.0, %v14934_v8  ;;  %v7494_v61 = vpop.f32.mrf.mxu0  ;;  %v7571_v18 = vpop.f32.mrf.mxu1 }
 0x2aa   : > { %v8526_v50 = vsel %vm1302_vm6, 1.0, %v14934_v8  ;;  %vm15561_vm0 = vcmp.eq.s32.totalorder %v15557_v44, %v15360_v13  ;;  %vm15562_vm9 = vcmp.eq.s32.totalorder %v15558_v2, %v15360_v13  ;;  %v14196_v30 = vadd.f32 %v7233_v10, %v7232_v9 }
 0x2ab   : > { %v8531_v38 = vsel %vm15561_vm0, 1.0, %v14934_v8  ;;  %v8533_v46 = vsel %vm15562_vm9, 1.0, %v14934_v8  ;;  %v14198_v31 = vadd.f32 %v7247_v5, %v7246_v49  ;;  %v7574_v34 = vmul.f32 %v8523_v32, %v14062_v48  ;;  %v14234_v32 = vpop.f32.mrf.mxu0  ;;  %v14236_v2 = vpop.f32.mrf.mxu1 }
 0x2ac   : > { %v7576_v42 = vmul.f32 %v8525_v24, %v14064_v55  ;;  %v7582_v39 = vmul.f32 %v8531_v38, %v14098_v7  ;;  %v7584_v63 = vmul.f32 %v8533_v46, %v14100_v20  ;;  %vm15563_vm6 = vcmp.eq.s32.totalorder %v15559_v27, %v15360_v13 }
 0x2ad   : > { %v8532_v33 = vsel %vm15563_vm6, 1.0, %v14934_v8  ;;  %vm15564_vm14 = vcmp.eq.s32.totalorder %v15560_v45, %v15360_v13  ;;  %v7240_v25 = vrot.slane %v7239_v28, 2  ;;  %v7254_v4 = vrot.slane %v7253_v6, 2 }
 0x2ae   : > { %v8534_v15 = vsel %vm15564_vm14, 1.0, %v14934_v8  ;;  %v7575_v48 = vmul.f32 %v8524_v41, %v14082_v37  ;;  %v7577_v55 = vmul.f32 %v8526_v50, %v14084_v57  ;;  %v7590_v16 = vadd.f32 %v7582_v39, %v7574_v34  ;;  %v15568_v41 = vld [vmem:[#allocation148_spill] sm:$0xff] }
 0x2af   : > { %v7604_v7 = vadd.f32 %v7584_v63, %v7576_v42  ;;  %v7583_v20 = vmul.f32 %v8532_v33, %v14122_v47  ;;  %v7585_v35 = vmul.f32 %v8534_v15, %v14124_v19  ;;  %v14216_v62 = vadd.f32 %v7214_v3, %v7213_v58  ;;  %v15566_v58 = vld [vmem:[#allocation151_spill] sm:$0xff] }
 0x2b0   : > { %v14218_v26 = vadd.f32 %v7228_v36, %v7227_v54  ;;  %v7235_v9 = vrot.slane %v14196_v30, 1  ;;  %v7249_v49 = vrot.slane %v14198_v31, 1  ;;  %v7591_v1 = vrot.slane %v7590_v16, 4 }
 0x2b1   : > { %v7605_v37 = vrot.slane %v7604_v7, 4  ;;  %v7597_v40 = vadd.f32 %v7583_v20, %v7575_v48  ;;  %v7611_v57 = vadd.f32 %v7585_v35, %v7577_v55  ;;  %v14222_v53 = vadd.f32 %v7240_v25, %v7239_v28  ;;  %v14260_v48 = vpop.f32.mrf.mxu1 }
 0x2b2   : > { %v14224_v10 = vadd.f32 %v7254_v4, %v7253_v6  ;;  %v8527_v19 = vsel %vm1303_vm15, 1.0, %v14934_v8  ;;  %v8529_v54 = vsel %vm1305_vm3, 1.0, %v14934_v8  ;;  %v7592_v5 = vadd.f32 %v7591_v1, %v7590_v16  ;;  %v15567_v6 = vld [vmem:[#allocation147_spill] sm:$0xff]  ;;  %v14258_v4 = vpop.f32.mrf.mxu0 }
 0x2b3   : > { %v7606_v3 = vadd.f32 %v7605_v37, %v7604_v7  ;;  %v7598_v36 = vrot.slane %v7597_v40, 4  ;;  %v7612_v44 = vrot.slane %v7611_v57, 4  ;;  %v7578_v24 = vmul.f32 %v8527_v19, %v14138_v52 }
 0x2b4   : > { %v7580_v28 = vmul.f32 %v8529_v54, %v14140_v17  ;;  %v8528_v27 = vsel %vm1304_vm5, 1.0, %v14934_v8  ;;  %v8530_v45 = vsel %vm1306_vm2, 1.0, %v14934_v8  ;;  %v7593_v50 = vrot.slane %v7592_v5, 2  ;;  %v7726_v54 = vpop.f32.mrf.mxu0 }
 0x2b5   : > { %v7607_v38 = vrot.slane %v7606_v3, 2  ;;  %v7599_v46 = vadd.f32 %v7598_v36, %v7597_v40  ;;  %v7613_v34 = vadd.f32 %v7612_v44, %v7611_v57  ;;  %v7579_v42 = vmul.f32 %v8528_v27, %v14156_v29 }
 0x2b6   : > { %v7581_v52 = vmul.f32 %v8530_v45, %v14158_v21  ;;  %v8535_v17 = vsel %vm1311_vm13, 1.0, %v14934_v8  ;;  %vm15569_vm15 = vcmp.eq.s32.totalorder %v15566_v58, %v15360_v13  ;;  %v7594_v63 = vadd.f32 %v7593_v50, %v7592_v5  ;;  %v7803_v5 = vpop.f32.mrf.mxu1 }
 0x2b7   : > { %v8537_v39 = vsel %vm15569_vm15, 1.0, %v14934_v8  ;;  %v7608_v33 = vadd.f32 %v7607_v38, %v7606_v3  ;;  %v7600_v15 = vrot.slane %v7599_v46, 2  ;;  %v7614_v25 = vrot.slane %v7613_v34, 2  ;;  %v7728_v38 = vpop.f32.mrf.mxu0 }
 0x2b8   : > { %v7586_v29 = vmul.f32 %v8535_v17, %v7492_v23  ;;  %v7588_v21 = vmul.f32 %v8537_v39, %v7569_v43  ;;  %vm15570_vm2 = vcmp.eq.s32.totalorder %v15567_v6, %v15360_v13  ;;  %vm15571_vm13 = vcmp.eq.s32.totalorder %v15568_v41, %v15360_v13 }
 0x2b9   : > { %v8536_v55 = vsel %vm15570_vm2, 1.0, %v14934_v8  ;;  %v8538_v16 = vsel %vm15571_vm13, 1.0, %v14934_v8  ;;  %v7595_v7 = vrot.slane %v7594_v63, 1  ;;  %v7609_v20 = vrot.slane %v7608_v33, 1 }
 0x2ba   : > { %v7601_v35 = vadd.f32 %v7600_v15, %v7599_v46  ;;  %v7615_v1 = vadd.f32 %v7614_v25, %v7613_v34  ;;  %v7618_v37 = vadd.f32 %v7586_v29, %v7578_v24  ;;  %v7632_v40 = vadd.f32 %v7588_v21, %v7580_v28  ;;  %v7805_v46 = vpop.f32.mrf.mxu1  ;;  %v7874_v21 = vpop.f32.mrf.mxu0 }
 0x2bb   : > { %v7587_v57 = vmul.f32 %v8536_v55, %v7494_v61  ;;  %v7589_v47 = vmul.f32 %v8538_v16, %v7571_v18  ;;  %v7236_v23 = vadd.f32 %v7235_v9, %v14196_v30  ;;  %v7250_v43 = vadd.f32 %v7249_v49, %v14198_v31 }
 0x2bc   : > { %v7242_v19 = vrot.slane %v14222_v53, 1  ;;  %v7256_v58 = vrot.slane %v14224_v10, 1  ;;  %v7619_v3 = vrot.slane %v7618_v37, 4  ;;  %v7633_v36 = vrot.slane %v7632_v40, 4  ;;  %v7951_v55 = vpop.f32.mrf.mxu1 }
 0x2bd   : > { %v7625_v44 = vadd.f32 %v7587_v57, %v7579_v42  ;;  %v7639_v6 = vadd.f32 %v7589_v47, %v7581_v52  ;;  %v7596_v27 = vadd.f32 %v7595_v7, %v7594_v63  ;;  %v7610_v41 = vadd.f32 %v7609_v20, %v7608_v33  ;;  %v15578_v33 = vld [vmem:[#allocation18_spill] sm:$0xff] }
 0x2be   : > { %v7602_v24 = vrot.slane %v7601_v35, 1  ;;  %v7616_v28 = vrot.slane %v7615_v1, 1  ;;  %v7620_v61 = vadd.f32 %v7619_v3, %v7618_v37  ;;  %v7634_v18 = vadd.f32 %v7633_v36, %v7632_v40  ;;  %v7953_v3 = vpop.f32.mrf.mxu1 }
 0x2bf   : > { %v7626_v45 = vrot.slane %v7625_v44, 4  ;;  %v7640_v30 = vrot.slane %v7639_v6, 4  ;;  %v7259_v31 = vadd.f32 %v14216_v62, %v14144_v22  ;;  %v7261_v9 = vadd.f32 %v14218_v26, %v14148_v56  ;;  %v15574_v62 = vld [vmem:[#allocation20_spill] sm:$0xff] }
 0x2c0   : > { %v14279_v49 = vadd.f32 %v7236_v23, %v14151_v0  ;;  %v14282_v50 = vadd.f32 %v7250_v43, %v14154_v11  ;;  %v14285_v34 = vadd.f32 %v7242_v19, %v14222_v53  ;;  %v14288_v42 = vadd.f32 %v7256_v58, %v14224_v10  ;;  %v15572_v0 = vld [vmem:[#allocation19_spill] sm:$0xff] }
 0x2c1   : > { %v7621_v52 = vrot.slane %v7620_v61, 2  ;;  %v7635_v17 = vrot.slane %v7634_v18, 2  ;;  %v14291_v22 = vadd.f32 %v7596_v27, %v14175_v14  ;;  %v14294_v56 = vadd.f32 %v7610_v41, %v14178_v59  ;;  %v15576_v14 = vld [vmem:[#allocation17_spill] sm:$0xff] }
 0x2c2   : > { %vm15573_vm3 = vcmp.eq.s32.totalorder %v15572_v0, %v15372_v60  ;;  %vm15575_vm5 = vcmp.eq.s32.totalorder %v15574_v62, %v15372_v60  ;;  %v7603_v53 = vadd.f32 %v7602_v24, %v7601_v35  ;;  %v7617_v10 = vadd.f32 %v7616_v28, %v7615_v1 }
 0x2c3   : > { %v8283_v11 = vsel %vm15573_vm3, 1.0, %v14934_v8  ;;  %v8285_v26 = vsel %vm15575_vm5, 1.0, %v14934_v8  ;;  %v7627_v39 = vadd.f32 %v7626_v45, %v7625_v44  ;;  %v7641_v63 = vadd.f32 %v7640_v30, %v7639_v6  ;;  %v15586_v30 = vld [vmem:[#allocation24_spill] sm:$0xff] }
 0x2c4   : > { %vm15577_vm1 = vcmp.eq.s32.totalorder %v15576_v14, %v15372_v60  ;;  %vm15579_vm8 = vcmp.eq.s32.totalorder %v15578_v33, %v15372_v60  ;;  %vm15580_vm12 = vcmp.eq.s32.totalorder %v15572_v0, %v15360_v13  ;;  %vm15581_vm10 = vcmp.eq.s32.totalorder %v15574_v62, %v15360_v13  ;;  %v7957_v0 = vpop.f32.mrf.mxu1 }
 0x2c5   : > { %v8284_v59 = vsel %vm15577_vm1, 1.0, %v14934_v8  ;;  %v8286_v15 = vsel %vm15579_vm8, 1.0, %v14934_v8  ;;  %v8291_v25 = vsel %vm15580_vm12, 1.0, %v14934_v8  ;;  %v8293_v29 = vsel %vm15581_vm10, 1.0, %v14934_v8 }
 0x2c6   : > { %v14320_v16 = vadd.f32 %v7621_v52, %v7620_v61  ;;  %v14322_v7 = vadd.f32 %v7635_v17, %v7634_v18  ;;  %v7962_v20 = vmul.f32 %v8283_v11, %v14234_v32  ;;  %v7964_v35 = vmul.f32 %v8285_v26, %v14236_v2  ;;  %v15584_v18 = vld [vmem:[#allocation23_spill] sm:$0xff]  ;;  %v15588_v26 = vld [vmem:[#allocation21_spill] sm:$0xff] }
 0x2c7   : > { %v7970_v1 = vmul.f32 %v8291_v25, %v7726_v54  ;;  %v7972_v37 = vmul.f32 %v8293_v29, %v7803_v5  ;;  %vm15582_vm7 = vcmp.eq.s32.totalorder %v15576_v14, %v15360_v13  ;;  %vm15583_vm4 = vcmp.eq.s32.totalorder %v15578_v33, %v15360_v13  ;;  %v7876_v5 = vpop.f32.mrf.mxu0 }
 0x2c8   : > { %v8292_v40 = vsel %vm15582_vm7, 1.0, %v14934_v8  ;;  %v8294_v57 = vsel %vm15583_vm4, 1.0, %v14934_v8  ;;  %v7628_v47 = vrot.slane %v7627_v39, 2  ;;  %v7642_v23 = vrot.slane %v7641_v63, 2 }
 0x2c9   : > { %v7963_v43 = vmul.f32 %v8284_v59, %v14258_v4  ;;  %v7965_v32 = vmul.f32 %v8286_v15, %v14260_v48  ;;  %v7978_v19 = vadd.f32 %v7970_v1, %v7962_v20  ;;  %v7992_v2 = vadd.f32 %v7972_v37, %v7964_v35  ;;  %v7880_v17 = vpop.f32.mrf.mxu0  ;;  %v7959_v37 = vpop.f32.mrf.mxu1 }
 0x2ca   : > { %v7971_v58 = vmul.f32 %v8292_v40, %v7728_v38  ;;  %v7973_v54 = vmul.f32 %v8294_v57, %v7805_v46  ;;  %v14336_v36 = vadd.f32 %v7603_v53, %v7259_v31  ;;  %v14338_v44 = vadd.f32 %v7617_v10, %v7261_v9  ;;  %v15590_v10 = vld [vmem:[#allocation22_spill] sm:$0xff] }
 0x2cb   : > { %v7623_v6 = vrot.slane %v14320_v16, 1  ;;  %v7637_v27 = vrot.slane %v14322_v7, 1  ;;  %v7979_v41 = vrot.slane %v7978_v19, 4  ;;  %v7993_v24 = vrot.slane %v7992_v2, 4  ;;  %v7882_v1 = vpop.f32.mrf.mxu0 }
 0x2cc   : > { %v7985_v28 = vadd.f32 %v7971_v58, %v7963_v43  ;;  %v7999_v4 = vadd.f32 %v7973_v54, %v7965_v32  ;;  %v14342_v61 = vadd.f32 %v7628_v47, %v7627_v39  ;;  %v14344_v48 = vadd.f32 %v7642_v23, %v7641_v63 }
 0x2cd   : > { %vm15585_vm11 = vcmp.eq.s32.totalorder %v15584_v18, %v15372_v60  ;;  %vm15587_vm0 = vcmp.eq.s32.totalorder %v15586_v30, %v15372_v60  ;;  %v7980_v9 = vadd.f32 %v7979_v41, %v7978_v19  ;;  %v7994_v38 = vadd.f32 %v7993_v24, %v7992_v2 }
 0x2ce   : > { %v8287_v45 = vsel %vm15585_vm11, 1.0, %v14934_v8  ;;  %v8289_v31 = vsel %vm15587_vm0, 1.0, %v14934_v8  ;;  %v7986_v46 = vrot.slane %v7985_v28, 4  ;;  %v8000_v52 = vrot.slane %v7999_v4, 4 }
 0x2cf   : > { %v7966_v11 = vmul.f32 %v8287_v45, %v7874_v21  ;;  %v7968_v62 = vmul.f32 %v8289_v31, %v7951_v55  ;;  %vm15589_vm9 = vcmp.eq.s32.totalorder %v15588_v26, %v15372_v60  ;;  %vm15591_vm6 = vcmp.eq.s32.totalorder %v15590_v10, %v15372_v60 }
 0x2d0   : > { %v8288_v53 = vsel %vm15589_vm9, 1.0, %v14934_v8  ;;  %v8290_v39 = vsel %vm15591_vm6, 1.0, %v14934_v8  ;;  %v7981_v63 = vrot.slane %v7980_v9, 2  ;;  %v7995_v14 = vrot.slane %v7994_v38, 2 }
 0x2d1   : > { %v7987_v59 = vadd.f32 %v7986_v46, %v7985_v28  ;;  %v8001_v33 = vadd.f32 %v8000_v52, %v7999_v4  ;;  %v7967_v15 = vmul.f32 %v8288_v53, %v7876_v5  ;;  %v7969_v25 = vmul.f32 %v8290_v39, %v7953_v3 }
 0x2d2   : > { %vm15592_vm14 = vcmp.eq.s32.totalorder %v15584_v18, %v15360_v13  ;;  %vm15593_vm15 = vcmp.eq.s32.totalorder %v15586_v30, %v15360_v13  ;;  %v7982_v55 = vadd.f32 %v7981_v63, %v7980_v9  ;;  %v7996_v20 = vadd.f32 %v7995_v14, %v7994_v38 }
 0x2d3   : > { %v8295_v29 = vsel %vm15592_vm14, 1.0, %v14934_v8  ;;  %v8297_v21 = vsel %vm15593_vm15, 1.0, %v14934_v8  ;;  %v7988_v60 = vrot.slane %v7987_v59, 2  ;;  %v8002_v35 = vrot.slane %v8001_v33, 2 }
 0x2d4   : > { %v7974_v40 = vmul.f32 %v8295_v29, %v7880_v17  ;;  %v7976_v57 = vmul.f32 %v8297_v21, %v7957_v0  ;;  %vm15594_vm2 = vcmp.eq.s32.totalorder %v15588_v26, %v15360_v13  ;;  %vm15595_vm13 = vcmp.eq.s32.totalorder %v15590_v10, %v15360_v13 }
 0x2d5   : > { %v8296_v47 = vsel %vm15594_vm2, 1.0, %v14934_v8  ;;  %v8298_v23 = vsel %vm15595_vm13, 1.0, %v14934_v8  ;;  %v7983_v43 = vrot.slane %v7982_v55, 1  ;;  %v7997_v32 = vrot.slane %v7996_v20, 1 }
 0x2d6   : > { %v7989_v19 = vadd.f32 %v7988_v60, %v7987_v59  ;;  %v8003_v2 = vadd.f32 %v8002_v35, %v8001_v33  ;;  %v8006_v58 = vadd.f32 %v7974_v40, %v7966_v11  ;;  %v8020_v54 = vadd.f32 %v7976_v57, %v7968_v62 }
 0x2d7   : > { %v7975_v5 = vmul.f32 %v8296_v47, %v7882_v1  ;;  %v7977_v3 = vmul.f32 %v8298_v23, %v7959_v37  ;;  %v7984_v41 = vadd.f32 %v7983_v43, %v7982_v55  ;;  %v7998_v24 = vadd.f32 %v7997_v32, %v7996_v20  ;;  %v15596_v55 = vld [vmem:[#allocation15_spill] sm:$0xff] }
 0x2d8   : > { %v7990_v28 = vrot.slane %v7989_v19, 1  ;;  %v8004_v4 = vrot.slane %v8003_v2, 1  ;;  %v8007_v18 = vrot.slane %v8006_v58, 4  ;;  %v8021_v45 = vrot.slane %v8020_v54, 4 }
 0x2d9   : > { %v8013_v30 = vadd.f32 %v7975_v5, %v7967_v15  ;;  %v8027_v31 = vadd.f32 %v7977_v3, %v7969_v25  ;;  %v7630_v9 = vrot.slane %v14342_v61, 1  ;;  %v7644_v8 = vrot.slane %v14344_v48, 1 }
 0x2da   : > { %v7991_v13 = vadd.f32 %v7990_v28, %v7989_v19  ;;  %v8005_v38 = vadd.f32 %v8004_v4, %v8003_v2  ;;  %v8008_v46 = vadd.f32 %v8007_v18, %v8006_v58  ;;  %v8022_v52 = vadd.f32 %v8021_v45, %v8020_v54 }
 0x2db   : > { %v8014_v17 = vrot.slane %v8013_v30, 4  ;;  %v8028_v0 = vrot.slane %v8027_v31, 4  ;;  %v8034_v11 = vadd.f32 %v7984_v41, %v14291_v22  ;;  %v8036_v62 = vadd.f32 %v7998_v24, %v14294_v56 }
 0x2dc   : > { %v8035_v26 = vadd.f32 %v7991_v13, %v14336_v36  ;;  %v8037_v53 = vadd.f32 %v8005_v38, %v14338_v44  ;;  %v8009_v10 = vrot.slane %v8008_v46, 2  ;;  %v8023_v39 = vrot.slane %v8022_v52, 2 }
 0x2dd   : > { %v8015_v63 = vadd.f32 %v8014_v17, %v8013_v30  ;;  %v8029_v14 = vadd.f32 %v8028_v0, %v8027_v31  ;;  %v7624_v59 = vadd.f32 %v7623_v6, %v14320_v16  ;;  %v7638_v33 = vadd.f32 %v7637_v27, %v14322_v7 }
 0x2de   : > { %v8046_v22 = vcombine.low %v8034_v11, %v8035_v26  ;;  %v8047_v15 = vcombine.low %v8036_v62, %v8037_v53  ;;  %v8010_v56 = vadd.f32 %v8009_v10, %v8008_v46  ;;  %v8024_v25 = vadd.f32 %v8023_v39, %v8022_v52 }
 0x2df   : > { %v8016_v36 = vrot.slane %v8015_v63, 2  ;;  %v8030_v29 = vrot.slane %v8029_v14, 2  ;;  %v7631_v44 = vadd.f32 %v7630_v9, %v14342_v61  ;;  %v7645_v21 = vadd.f32 %v7644_v8, %v14344_v48 }
 0x2e0   : > { %v8054_v20 = vrot.slane %v8046_v22, %v15596_v55  ;;  %v8061_v60 = vrot.slane %v8047_v15, %v15596_v55  ;;  %v8011_v16 = vrot.slane %v8010_v56, 1  ;;  %v8025_v6 = vrot.slane %v8024_v25, 1 }
 0x2e1   : > { %v8017_v35 = vadd.f32 %v8016_v36, %v8015_v63  ;;  %v8031_v1 = vadd.f32 %v8030_v29, %v8029_v14  ;;  %v7263_v7 = vadd.f32 %v14285_v34, %v14161_v12  ;;  %v7265_v27 = vadd.f32 %v14288_v42, %v14164_v51 }
 0x2e2   : > { %v8062_v37 = vcombine.low %v8054_v20, %v8061_v60  ;;  %v15597_v40 = vlaneseq  ;;  %v8012_v48 = vadd.f32 %v8011_v16, %v8010_v56  ;;  %v8026_v57 = vadd.f32 %v8025_v6, %v8024_v25 }
 0x2e3   : > { %v8018_v47 = vrot.slane %v8017_v35, 1  ;;  %v8032_v23 = vrot.slane %v8031_v1, 1  ;;  %v7650_v43 = vadd.f32 %v7624_v59, %v14279_v49  ;;  %v7652_v32 = vadd.f32 %v7638_v33, %v14282_v50 }
 0x2e4   : > { %vm14400_vm3 = vcmp.lt.s32.totalorder %v15597_v40, 512  ;;  %v8069_v12 = vrot.slane %v8062_v37, %v15596_v55  ;;  %v7651_v34 = vadd.f32 %v7631_v44, %v7263_v7  ;;  %v7653_v19 = vadd.f32 %v7645_v21, %v7265_v27 }
 0x2e5   : > { %v8019_v51 = vadd.f32 %v8018_v47, %v8017_v35  ;;  %v8033_v42 = vadd.f32 %v8032_v23, %v8031_v1  ;;  %v8038_v2 = vadd.f32 %v8012_v48, %v7650_v43  ;;  %v8040_v58 = vadd.f32 %v8026_v57, %v7652_v32 }
 0x2e6   : > { %8075 = vst.msk [vmem:[%s214_s29] ss:$2 sm:$0xf] %vm14400_vm3, %v8069_v12 }
 0x2e7   : > { %v8039_v54 = vadd.f32 %v8019_v51, %v7651_v34  ;;  %v8041_v5 = vadd.f32 %v8033_v42, %v7653_v19 }
 0x2e9   : > { %v8080_v49 = vcombine.low %v8038_v2, %v8039_v54  ;;  %v8081_v3 = vcombine.low %v8040_v58, %v8041_v5 }
 0x2eb   : > { %v8088_v50 = vrot.slane %v8080_v49, %v15596_v55  ;;  %v8095_v41 = vrot.slane %v8081_v3, %v15596_v55 }
 0x2ed   : > { %v8096_v24 = vcombine.low %v8088_v50, %v8095_v41 }
 0x2ef   : > { %v8103_v28 = vrot.slane %v8096_v24, %v15596_v55 }
 0x2f1   : > { %8923 = vst.msk [vmem:[%s214_s29 + $0x1] ss:$2 sm:$0xf] %vm14400_vm3, %v8103_v28 }
 0x2f2   : > { %9129 = shalt.err (!%p9126_p5)
}
 0x2f3   : > { %s9130_s5 = scalar_lea.hbm %s8141_s11, 128  ;;  %s9134_s7 = scalar_lea.hbm %s14452_s3, 256 }
 0x2f4   : > { %p9131_p11 = scmp.ne.s32.totalorder %s8141_s11, %s9130_s5  ;;  %p9135_p0 = scmp.lt.s32.totalorder %s8141_s11, %s14452_s3 }
 0x2f5   : > { %p9136_p1 = scmp.lt.s32.totalorder %s9134_s7, %s9130_s5 }
 0x2f6   : > { %p9132_p6 = pnand %p9131_p11, %p15501_p13 }
 0x2f7   : > { %p9137_p12 = por %p9136_p1, %p9135_p0 }
 0x2f8   : > { %p9133_p4 = pneg %p9132_p6 }
 0x2fa   : > { %p9138_p2 = pnand %p9137_p12, %p9133_p4 }
 0x2fc   : > { %9141 = shalt.err (!%p9138_p2)
}
 0x2fd   : > { %8942 = dma.vmem_to_hbm [thread:$0]  (%p15501_p13), %s8144_s8, 128, %s8141_s11, %s8113_s17  }
 0x2fe PF: > { %s8155_s9 = sand.u32 1, %s9176_s12   ;;  %p15600_p3 = scmp.ne.s32.totalorder %s14911_s25, 0 }
 0x2ff   : > { %p15601_p7 = scmp.ge.s32.totalorder %s9188_s15, 2  ;;  %s8156_s20 = scalar_lea.sflag [#allocation4], %s8155_s9 }
 0x301   : > { %p8954_p8 = pnand %p15601_p7, %p15600_p3 }
 0x303   : > { %p8955_p9 = pneg %p8954_p8 }
 0x305   : > { %9167 = dma.done.wait (%p8955_p9), %s8156_s20, 2048  }
 0x306   : > { %9169 = vsyncadd (%p8955_p9), %s8156_s20, 4294965248  ;;  %s8165_s29 = scalar_lea.sflag [#allocation9], %s8155_s9 }
 0x307   : > { %9171 = dma.done.wait (%p8955_p9), %s8165_s29, 128  }
 0x308   : > { %9173 = vsyncadd (%p8955_p9), %s8165_s29, 4294967168  ;;  %p21_p13 = scmp.ge.s32.totalorder %s9250_s18, 4   ;;  %s15602_s12 = smov %s9180_s13 }
 0x309   : > { %s15603_s13 = smov %s9184_s14  ;;  %s15604_s14 = smov %s9262_s21 }
 0x30a   : > { %s15605_s15 = smov %s9250_s18  ;;  %23 = sbr.rel (!%p21_p13) target bundleno = 8 (0x8), region = 97 }
 0x30f   :  { %8170 = vsyncpa [#allocation3], 1 }
 0x310   :  { %8172 = vsyncpa [#allocation3 + $0x1], 1 }
 0x311   :  { %8173 = vsyncpa [#allocation6], 1 }
 0x312   :  { %8174 = vsyncpa [#allocation4], 1 }
 0x313   :  { %8176 = vsyncpa [#allocation4 + $0x1], 1 }
 0x314   :  { %8177 = vsyncpa [#allocation9], 1 }
 0x315   :  { %8179 = vsyncpa [#allocation9 + $0x1], 1 }

</bundles_post_ra>
